<compile_context>
chip_gen: v7x
topology: tpu7x:2x2x1
jax: 0.10.0
libtpu: 0.0.40
codegen_flags: <defaults>
</compile_context>

<pallas_src>
import jax
import jax.numpy as jnp
import numpy as np
from jax.experimental import pallas as pl
from jax.experimental.pallas import tpu as pltpu

NEG_INF = -1e30
LEAKY_SLOPE = 0.2
BN_EPS = 1e-5
LANE = 128  # lane-dense padding width


# ---------------------------------------------------------------------------
# Fused Pallas kernel
# ---------------------------------------------------------------------------
def _gat_layer(x, neg_mask, w, b, att_bd, head_sel):
    """One GATv2 layer (no output bias) on lane-padded operands.

    x:        [N, 128]            zero-padded input features
    neg_mask: [N, N]              0 on edges/self-loops, NEG_INF elsewhere
    w:        [128, 256]          wl in cols 0:HC, wr in cols 128:128+HC
    b:        [1, 256]
    att_bd:   [128, H]            block-diagonal att vector (rows h*C+c, col h)
    head_sel: [H, 128] or None    head -> output-column selector (None iff H==1)
    returns:  [N, 128]            (columns >= H*C are zero)
    """
    n = x.shape[0]
    heads = att_bd.shape[1]

    proj = jnp.dot(x, w, preferred_element_type=jnp.float32) + b      # [N, 2*128]
    xl = proj[:, :LANE]                                                # source proj
    xr = proj[:, LANE:]                                                # target proj

    # GATv2 scores for all heads at once: s[i, j, :] = xr[i] + xl[j]
    s = xr[:, None, :] + xl[None, :, :]                                # [N, N, 128]
    s = jnp.where(s >= 0.0, s, LEAKY_SLOPE * s)                        # LeakyReLU
    e = jnp.dot(s.reshape(n * n, LANE), att_bd,
                preferred_element_type=jnp.float32).reshape(n, n, heads)
    e = e + neg_mask[:, :, None]                                       # mask non-edges

    # Masked softmax over source nodes j (axis=1), all heads together.
    e_max = jnp.max(e, axis=1, keepdims=True)
    p = jnp.exp(e - e_max)                                             # masked -> 0
    denom = jnp.sum(p, axis=1, keepdims=True)
    alpha = p * pl.reciprocal(denom, approx=True)                      # [N, N, H]

    # Aggregate over source nodes into one lane-dense [N, 128] buffer.
    if head_sel is None:
        # heads == 1: alpha broadcasts straight over lanes (xl pad lanes are 0).
        out = jnp.sum(alpha * xl[None, :, :], axis=1)                  # [N, 128]
    else:
        # Expand alpha over output columns (head blocks) via one MXU matmul,
        # then one elementwise multiply + sublane reduce; no per-head slices.
        a_exp = jnp.dot(alpha.reshape(n * n, heads), head_sel,
                        preferred_element_type=jnp.float32).reshape(n, n, LANE)
        out = jnp.sum(a_exp * xl[None, :, :], axis=1)                  # [N, 128]
    return out


def _gat_fused_kernel(x_ref, adj_ref, w1_ref, b1_ref, att1_ref, sel1_ref,
                      bn_scale_ref, bn_shift_ref, prelu_ref,
                      w4_ref, b4_ref, att4_ref, bias4_ref,
                      out_ref, logp_ref):
    neg_mask = jnp.where(adj_ref[...] > 0.0, 0.0, NEG_INF)             # [N, N]

    # ---- GATv2 layer 1 (heads=10, concat) ----
    h = _gat_layer(x_ref[...], neg_mask, w1_ref[...], b1_ref[...],
                   att1_ref[...], sel1_ref[...])

    # ---- eval-mode BatchNorm (scale/shift with GAT-1 bias pre-folded) + PReLU ----
    h = h * bn_scale_ref[...] + bn_shift_ref[...]
    h = jnp.where(h >= 0.0, h, prelu_ref[...] * h)

    # ---- GATv2 layer 2 (heads=1, concat=False); bias4 carries -inf on pad lanes ----
    h2 = _gat_layer(h, neg_mask, w4_ref[...], b4_ref[...],
                    att4_ref[...], None) + bias4_ref[...]              # [N, 128]
    out_ref[...] = h2

    # ---- log-softmax (padded lanes are already -inf via bias4, so no masking) ----
    z = h2 - jnp.max(h2, axis=1, keepdims=True)
    lse = jnp.log(jnp.sum(jnp.exp(z), axis=1, keepdims=True))
    logp_ref[...] = z - lse


# ---------------------------------------------------------------------------
# Wrapper: parameter packing + pallas_call
# ---------------------------------------------------------------------------
def _full_spec(shape):
    n = len(shape)
    return pl.BlockSpec(shape, lambda i, _n=n: (0,) * _n)


def prepare_params(p):
    """Pack / pad raw parameters once into the lane-dense layout the kernel uses."""
    heads1, dim_h, dim_out = p["heads1"], p["dim_h"], p["dim_out"]
    hc1 = heads1 * dim_h
    assert p["wl1"].shape[0] <= LANE and hc1 <= LANE and dim_out <= LANE

    def pack_w(wl, wr, bl, br):
        f, hc = wl.shape
        w = jnp.zeros((LANE, 2 * LANE), jnp.float32)
        w = w.at[:f, :hc].set(wl).at[:f, LANE:LANE + hc].set(wr)
        b = jnp.zeros((1, 2 * LANE), jnp.float32)
        b = b.at[:, :hc].set(bl).at[:, LANE:LANE + hc].set(br)
        return w, b

    def pad_row(v):
        return jnp.zeros((1, LANE), jnp.float32).at[:, :v.shape[1]].set(v)

    def att_blockdiag(att):
        h, c = att.shape
        bd = jnp.zeros((LANE, h), jnp.float32)
        return bd.at[jnp.arange(h * c), jnp.repeat(jnp.arange(h), c)].set(
            att.reshape(-1))

    def head_sel(h, c):
        sel = jnp.zeros((h, LANE), jnp.float32)
        return sel.at[jnp.repeat(jnp.arange(h), c), jnp.arange(h * c)].set(1.0)

    w1, b1 = pack_w(p["wl1"], p["wr1"], p["bl1"], p["br1"])
    w4, b4 = pack_w(p["wl4"], p["wr4"], p["bl4"], p["br4"])

    # Eval-mode BN folded to scale/shift; GAT-1 bias folded into the shift.
    scale = p["bn_g"] * jax.lax.rsqrt(p["bn_v"] + BN_EPS)
    shift = p["bn_b"] - p["bn_m"] * scale + p["bias1"] * scale

    # Layer-2 bias carries the output-column padding mask (-inf on padded lanes),
    # so the kernel's log-softmax needs no iota/compare/select.
    bias4 = jnp.full((1, LANE), NEG_INF, jnp.float32).at[:, :dim_out].set(p["bias4"])

    return {
        "dim_out": dim_out,
        "w1": w1, "b1": b1,
        "att1_bd": att_blockdiag(p["att1"]),
        "sel1": head_sel(heads1, dim_h),
        "bn_scale": pad_row(scale),
        "bn_shift": pad_row(shift),
        "prelu_w": pad_row(p["prelu_w"]),
        "w4": w4, "b4": b4,
        "att4_bd": att_blockdiag(p["att4"]),
        "bias4": bias4,
    }


def gat_forward_pallas(packed, x, adj):
    n, fin = x.shape
    dim_out = packed["dim_out"]
    x_pad = jnp.zeros((n, LANE), jnp.float32).at[:, :fin].set(x)

    args = (x_pad, adj, packed["w1"], packed["b1"], packed["att1_bd"],
            packed["sel1"], packed["bn_scale"], packed["bn_shift"],
            packed["prelu_w"], packed["w4"], packed["b4"],
            packed["att4_bd"], packed["bias4"])

    out_pad, logp_pad = pl.pallas_call(
        _gat_fused_kernel,
        out_shape=(jax.ShapeDtypeStruct((n, LANE), jnp.float32),
                   jax.ShapeDtypeStruct((n, LANE), jnp.float32)),
        grid=(1,),
        in_specs=[_full_spec(a.shape) for a in args],
        out_specs=(_full_spec((n, LANE)), _full_spec((n, LANE))),
        compiler_params=pltpu.CompilerParams(
            dimension_semantics=("arbitrary",)),
    )(*args)
    return out_pad[:, :dim_out], logp_pad[:, :dim_out]


# ---------------------------------------------------------------------------
# Pure-JAX reference (for correctness check)
# ---------------------------------------------------------------------------
def gatv2_ref(x, wl, bl, wr, br, att, adj, bias, *, heads, out_ch, concat):
    n = x.shape[0]
    xl = (x @ wl + bl).reshape(n, heads, out_ch)
    xr = (x @ wr + br).reshape(n, heads, out_ch)
    s = xr[:, None, :, :] + xl[None, :, :, :]
    s = jnp.where(s >= 0.0, s, LEAKY_SLOPE * s)
    e = jnp.einsum("ijhc,hc->ijh", s, att)
    mask = (adj > 0.0)[:, :, None]
    e = jnp.where(mask, e, NEG_INF)
    p = jnp.exp(e - jnp.max(e, axis=1, keepdims=True))
    p = jnp.where(mask, p, 0.0)
    alpha = p / jnp.sum(p, axis=1, keepdims=True)
    out = jnp.einsum("ijh,jhc->ihc", alpha, xl)
    out = out.reshape(n, heads * out_ch) if concat else out.mean(axis=1)
    return out + bias


def gat_forward_ref(params, x, adj):
    p = params
    h = gatv2_ref(x, p["wl1"], p["bl1"], p["wr1"], p["br1"], p["att1"], adj,
                  p["bias1"], heads=p["heads1"], out_ch=p["dim_h"], concat=True)
    h = (h - p["bn_m"]) * jax.lax.rsqrt(p["bn_v"] + BN_EPS) * p["bn_g"] + p["bn_b"]
    h = jnp.where(h >= 0.0, h, p["prelu_w"] * h)
    h = gatv2_ref(h, p["wl4"], p["bl4"], p["wr4"], p["br4"], p["att4"], adj,
                  p["bias4"], heads=1, out_ch=p["dim_out"], concat=False)
    return h, jax.nn.log_softmax(h, axis=1)


# ---------------------------------------------------------------------------
# Deterministic setup & run
# ---------------------------------------------------------------------------
def glorot(key, shape):
    s = jnp.sqrt(6.0 / (shape[0] + shape[1]))
    return jax.random.uniform(key, shape, jnp.float32, -s, s)


if __name__ == "__main__":
    N, E = 16, 40
    dim_in, dim_h, dim_out, heads1 = 8, 8, 4, 10
    hc1 = heads1 * dim_h  # 80

    keys = jax.random.split(jax.random.PRNGKey(0), 24)
    x = jax.random.normal(keys[0], (N, dim_in), jnp.float32)

    # Random edge_index [2, E]; dense adjacency with self-loops.
    src = jax.random.randint(keys[1], (E,), 0, N)
    dst = jax.random.randint(keys[2], (E,), 0, N)
    adj = jnp.zeros((N, N), jnp.float32).at[dst, src].set(1.0)
    adj = jnp.maximum(adj, jnp.eye(N, dtype=jnp.float32))

    params = {
        "heads1": heads1, "dim_h": dim_h, "dim_out": dim_out,
        # gat1: GATv2Conv(dim_in, dim_h, heads=10)
        "wl1": glorot(keys[3], (dim_in, hc1)),
        "bl1": 0.05 * jax.random.normal(keys[4], (1, hc1), jnp.float32),
        "wr1": glorot(keys[5], (dim_in, hc1)),
        "br1": 0.05 * jax.random.normal(keys[6], (1, hc1), jnp.float32),
        "att1": glorot(keys[7], (heads1, dim_h)),
        "bias1": 0.05 * jax.random.normal(keys[8], (1, hc1), jnp.float32),
        # bn1: BatchNorm(10 * dim_h), eval-mode running stats
        "bn_g": 1.0 + 0.05 * jax.random.normal(keys[9], (1, hc1), jnp.float32),
        "bn_b": 0.05 * jax.random.normal(keys[10], (1, hc1), jnp.float32),
        "bn_m": 0.05 * jax.random.normal(keys[11], (1, hc1), jnp.float32),
        "bn_v": 1.0 + 0.2 * jax.random.uniform(keys[12], (1, hc1), jnp.float32),
        # prelu (num_parameters=1, default init 0.25), broadcast as glue
        "prelu_w": jnp.full((1, hc1), 0.25, jnp.float32),
        # gat4: GATv2Conv(10*dim_h, dim_out, heads=1, concat=False)
        "wl4": glorot(keys[13], (hc1, dim_out)),
        "bl4": 0.05 * jax.random.normal(keys[14], (1, dim_out), jnp.float32),
        "wr4": glorot(keys[15], (hc1, dim_out)),
        "br4": 0.05 * jax.random.normal(keys[16], (1, dim_out), jnp.float32),
        "att4": glorot(keys[17], (1, dim_out)),
        "bias4": 0.05 * jax.random.normal(keys[18], (1, dim_out), jnp.float32),
    }
    # NOTE: bn2 / bn4 exist in __init__ but are unused in forward -> omitted.

    packed = prepare_params(params)
    out, logp = gat_forward_pallas(packed, x, adj)
    jax.block_until_ready((out, logp))

    out_ref, logp_ref = gat_forward_ref(params, x, adj)
    np.testing.assert_allclose(np.asarray(out), np.asarray(out_ref),
                               rtol=1e-2, atol=1e-2)
    np.testing.assert_allclose(np.asarray(logp), np.asarray(logp_ref),
                               rtol=1e-2, atol=1e-2)

    print("KERNEL_OK")
</pallas_src>

<mosaic_0001>
module attributes {stable_mosaic.version = 11 : i64} {
  func.func @_gat_fused_kernel(%arg0: i32, %arg1: memref<16x128xf32, #tpu.memory_space<vmem>>, %arg2: memref<16x16xf32, #tpu.memory_space<vmem>>, %arg3: memref<128x256xf32, #tpu.memory_space<vmem>>, %arg4: memref<1x256xf32, #tpu.memory_space<vmem>>, %arg5: memref<128x10xf32, #tpu.memory_space<vmem>>, %arg6: memref<10x128xf32, #tpu.memory_space<vmem>>, %arg7: memref<1x128xf32, #tpu.memory_space<vmem>>, %arg8: memref<1x128xf32, #tpu.memory_space<vmem>>, %arg9: memref<1x128xf32, #tpu.memory_space<vmem>>, %arg10: memref<128x256xf32, #tpu.memory_space<vmem>>, %arg11: memref<1x256xf32, #tpu.memory_space<vmem>>, %arg12: memref<128x1xf32, #tpu.memory_space<vmem>>, %arg13: memref<1x128xf32, #tpu.memory_space<vmem>>, %arg14: memref<16x128xf32, #tpu.memory_space<vmem>>, %arg15: memref<16x128xf32, #tpu.memory_space<vmem>>) attributes {dimension_semantics = [#tpu.dimension_semantics<arbitrary>], iteration_bounds = array<i64: 1>, scalar_prefetch = 0 : i64, scratch_operands = 0 : i64, tpu.core_type = #tpu.core_type<tc>, window_params = [{pipeline_mode = #tpu.pipeline_mode<synchronous>, transform_indices = @transform_0, window_bounds = array<i64: 16, 128>}, {pipeline_mode = #tpu.pipeline_mode<synchronous>, transform_indices = @transform_1, window_bounds = array<i64: 16, 16>}, {pipeline_mode = #tpu.pipeline_mode<synchronous>, transform_indices = @transform_2, window_bounds = array<i64: 128, 256>}, {pipeline_mode = #tpu.pipeline_mode<synchronous>, transform_indices = @transform_3, window_bounds = array<i64: 1, 256>}, {pipeline_mode = #tpu.pipeline_mode<synchronous>, transform_indices = @transform_4, window_bounds = array<i64: 128, 10>}, {pipeline_mode = #tpu.pipeline_mode<synchronous>, transform_indices = @transform_5, window_bounds = array<i64: 10, 128>}, {pipeline_mode = #tpu.pipeline_mode<synchronous>, transform_indices = @transform_6, window_bounds = array<i64: 1, 128>}, {pipeline_mode = #tpu.pipeline_mode<synchronous>, transform_indices = @transform_7, window_bounds = array<i64: 1, 128>}, {pipeline_mode = #tpu.pipeline_mode<synchronous>, transform_indices = @transform_8, window_bounds = array<i64: 1, 128>}, {pipeline_mode = #tpu.pipeline_mode<synchronous>, transform_indices = @transform_9, window_bounds = array<i64: 128, 256>}, {pipeline_mode = #tpu.pipeline_mode<synchronous>, transform_indices = @transform_10, window_bounds = array<i64: 1, 256>}, {pipeline_mode = #tpu.pipeline_mode<synchronous>, transform_indices = @transform_11, window_bounds = array<i64: 128, 1>}, {pipeline_mode = #tpu.pipeline_mode<synchronous>, transform_indices = @transform_12, window_bounds = array<i64: 1, 128>}, {pipeline_mode = #tpu.pipeline_mode<synchronous>, transform_indices = @transform_13, window_bounds = array<i64: 16, 128>}, {pipeline_mode = #tpu.pipeline_mode<synchronous>, transform_indices = @transform_14, window_bounds = array<i64: 16, 128>}]} {
    %c0 = arith.constant 0 : index
    %c0_0 = arith.constant 0 : index
    %0 = vector.load %arg2[%c0, %c0_0] : memref<16x16xf32, #tpu.memory_space<vmem>>, vector<16x16xf32>
    %cst = arith.constant 0.000000e+00 : f32
    %1 = vector.broadcast %cst : f32 to vector<16x16xf32>
    %2 = arith.cmpf ogt, %0, %1 : vector<16x16xf32>
    %cst_1 = arith.constant 0.000000e+00 : f32
    %cst_2 = arith.constant -1.000000e+30 : f32
    %3 = vector.broadcast %cst_1 : f32 to vector<16x16xf32>
    %4 = vector.broadcast %cst_2 : f32 to vector<16x16xf32>
    %5 = arith.select %2, %3, %4 : vector<16x16xi1>, vector<16x16xf32>
    %c0_3 = arith.constant 0 : index
    %c0_4 = arith.constant 0 : index
    %6 = vector.load %arg1[%c0_3, %c0_4] : memref<16x128xf32, #tpu.memory_space<vmem>>, vector<16x128xf32>
    %c0_5 = arith.constant 0 : index
    %c0_6 = arith.constant 0 : index
    %7 = vector.load %arg3[%c0_5, %c0_6] : memref<128x256xf32, #tpu.memory_space<vmem>>, vector<128x256xf32>
    %c0_7 = arith.constant 0 : index
    %c0_8 = arith.constant 0 : index
    %8 = vector.load %arg4[%c0_7, %c0_8] : memref<1x256xf32, #tpu.memory_space<vmem>>, vector<1x256xf32>
    %c0_9 = arith.constant 0 : index
    %c0_10 = arith.constant 0 : index
    %9 = vector.load %arg5[%c0_9, %c0_10] : memref<128x10xf32, #tpu.memory_space<vmem>>, vector<128x10xf32>
    %c0_11 = arith.constant 0 : index
    %c0_12 = arith.constant 0 : index
    %10 = vector.load %arg6[%c0_11, %c0_12] : memref<10x128xf32, #tpu.memory_space<vmem>>, vector<10x128xf32>
    %cst_13 = arith.constant dense<0.000000e+00> : vector<16x256xf32>
    %11 = tpu.matmul %6, %7, %cst_13 {dimension_numbers = #tpu.dot_dimension_numbers<[1], [0], [0], [1], [0, 0, 1, 1], [], []>} : vector<16x128xf32>, vector<128x256xf32>, vector<16x256xf32> -> vector<16x256xf32>
    %12 = vector.broadcast %8 : vector<1x256xf32> to vector<16x256xf32>
    %13 = arith.addf %11, %12 : vector<16x256xf32>
    %14 = vector.extract_strided_slice %13 {offsets = [0, 0], sizes = [16, 128], strides = [1, 1]} : vector<16x256xf32> to vector<16x128xf32>
    %15 = vector.extract_strided_slice %13 {offsets = [0, 128], sizes = [16, 128], strides = [1, 1]} : vector<16x256xf32> to vector<16x128xf32>
    %16 = vector.shape_cast %15 : vector<16x128xf32> to vector<16x1x128xf32>
    %17 = vector.shape_cast %14 : vector<16x128xf32> to vector<1x16x128xf32>
    %18 = vector.broadcast %16 : vector<16x1x128xf32> to vector<16x16x128xf32>
    %19 = vector.broadcast %17 : vector<1x16x128xf32> to vector<16x16x128xf32>
    %20 = arith.addf %18, %19 : vector<16x16x128xf32>
    %cst_14 = arith.constant 0.000000e+00 : f32
    %21 = vector.broadcast %cst_14 : f32 to vector<16x16x128xf32>
    %22 = arith.cmpf oge, %20, %21 : vector<16x16x128xf32>
    %cst_15 = arith.constant 2.000000e-01 : f32
    %23 = vector.broadcast %cst_15 : f32 to vector<16x16x128xf32>
    %24 = arith.mulf %23, %20 : vector<16x16x128xf32>
    %25 = arith.select %22, %20, %24 : vector<16x16x128xi1>, vector<16x16x128xf32>
    %26 = vector.shape_cast %25 : vector<16x16x128xf32> to vector<256x128xf32>
    %cst_16 = arith.constant dense<0.000000e+00> : vector<256x10xf32>
    %27 = tpu.matmul %26, %9, %cst_16 {dimension_numbers = #tpu.dot_dimension_numbers<[1], [0], [0], [1], [0, 0, 1, 1], [], []>} : vector<256x128xf32>, vector<128x10xf32>, vector<256x10xf32> -> vector<256x10xf32>
    %28 = vector.shape_cast %27 : vector<256x10xf32> to vector<16x16x10xf32>
    %29 = vector.shape_cast %5 : vector<16x16xf32> to vector<16x16x1xf32>
    %30 = vector.broadcast %29 : vector<16x16x1xf32> to vector<16x16x10xf32>
    %31 = arith.addf %28, %30 : vector<16x16x10xf32>
    %cst_17 = arith.constant dense<0xFF800000> : vector<16x10xf32>
    %32 = vector.multi_reduction <maximumf>, %31, %cst_17 [1] : vector<16x16x10xf32> to vector<16x10xf32>
    %33 = vector.shape_cast %32 : vector<16x10xf32> to vector<16x1x10xf32>
    %34 = vector.broadcast %33 : vector<16x1x10xf32> to vector<16x16x10xf32>
    %35 = arith.subf %31, %34 : vector<16x16x10xf32>
    %36 = math.exp %35 : vector<16x16x10xf32>
    %cst_18 = arith.constant dense<0.000000e+00> : vector<16x10xf32>
    %37 = vector.multi_reduction <add>, %36, %cst_18 [1] : vector<16x16x10xf32> to vector<16x10xf32>
    %38 = vector.shape_cast %37 : vector<16x10xf32> to vector<16x1x10xf32>
    %39 = tpu.reciprocal %38 {approx = true} : vector<16x1x10xf32> -> vector<16x1x10xf32>
    %40 = vector.broadcast %39 : vector<16x1x10xf32> to vector<16x16x10xf32>
    %41 = arith.mulf %36, %40 : vector<16x16x10xf32>
    %42 = vector.shape_cast %41 : vector<16x16x10xf32> to vector<256x10xf32>
    %cst_19 = arith.constant dense<0.000000e+00> : vector<256x128xf32>
    %43 = tpu.matmul %42, %10, %cst_19 {dimension_numbers = #tpu.dot_dimension_numbers<[1], [0], [0], [1], [0, 0, 1, 1], [], []>} : vector<256x10xf32>, vector<10x128xf32>, vector<256x128xf32> -> vector<256x128xf32>
    %44 = vector.shape_cast %43 : vector<256x128xf32> to vector<16x16x128xf32>
    %45 = vector.shape_cast %14 : vector<16x128xf32> to vector<1x16x128xf32>
    %46 = vector.broadcast %45 : vector<1x16x128xf32> to vector<16x16x128xf32>
    %47 = arith.mulf %44, %46 : vector<16x16x128xf32>
    %cst_20 = arith.constant dense<0.000000e+00> : vector<16x128xf32>
    %48 = vector.multi_reduction <add>, %47, %cst_20 [1] : vector<16x16x128xf32> to vector<16x128xf32>
    %c0_21 = arith.constant 0 : index
    %c0_22 = arith.constant 0 : index
    %49 = vector.load %arg7[%c0_21, %c0_22] : memref<1x128xf32, #tpu.memory_space<vmem>>, vector<1x128xf32>
    %50 = vector.broadcast %49 : vector<1x128xf32> to vector<16x128xf32>
    %51 = arith.mulf %48, %50 : vector<16x128xf32>
    %c0_23 = arith.constant 0 : index
    %c0_24 = arith.constant 0 : index
    %52 = vector.load %arg8[%c0_23, %c0_24] : memref<1x128xf32, #tpu.memory_space<vmem>>, vector<1x128xf32>
    %53 = vector.broadcast %52 : vector<1x128xf32> to vector<16x128xf32>
    %54 = arith.addf %51, %53 : vector<16x128xf32>
    %cst_25 = arith.constant 0.000000e+00 : f32
    %55 = vector.broadcast %cst_25 : f32 to vector<16x128xf32>
    %56 = arith.cmpf oge, %54, %55 : vector<16x128xf32>
    %c0_26 = arith.constant 0 : index
    %c0_27 = arith.constant 0 : index
    %57 = vector.load %arg9[%c0_26, %c0_27] : memref<1x128xf32, #tpu.memory_space<vmem>>, vector<1x128xf32>
    %58 = vector.broadcast %57 : vector<1x128xf32> to vector<16x128xf32>
    %59 = arith.mulf %58, %54 : vector<16x128xf32>
    %60 = arith.select %56, %54, %59 : vector<16x128xi1>, vector<16x128xf32>
    %c0_28 = arith.constant 0 : index
    %c0_29 = arith.constant 0 : index
    %61 = vector.load %arg10[%c0_28, %c0_29] : memref<128x256xf32, #tpu.memory_space<vmem>>, vector<128x256xf32>
    %c0_30 = arith.constant 0 : index
    %c0_31 = arith.constant 0 : index
    %62 = vector.load %arg11[%c0_30, %c0_31] : memref<1x256xf32, #tpu.memory_space<vmem>>, vector<1x256xf32>
    %c0_32 = arith.constant 0 : index
    %c0_33 = arith.constant 0 : index
    %63 = vector.load %arg12[%c0_32, %c0_33] : memref<128x1xf32, #tpu.memory_space<vmem>>, vector<128x1xf32>
    %cst_34 = arith.constant dense<0.000000e+00> : vector<16x256xf32>
    %64 = tpu.matmul %60, %61, %cst_34 {dimension_numbers = #tpu.dot_dimension_numbers<[1], [0], [0], [1], [0, 0, 1, 1], [], []>} : vector<16x128xf32>, vector<128x256xf32>, vector<16x256xf32> -> vector<16x256xf32>
    %65 = vector.broadcast %62 : vector<1x256xf32> to vector<16x256xf32>
    %66 = arith.addf %64, %65 : vector<16x256xf32>
    %67 = vector.extract_strided_slice %66 {offsets = [0, 0], sizes = [16, 128], strides = [1, 1]} : vector<16x256xf32> to vector<16x128xf32>
    %68 = vector.extract_strided_slice %66 {offsets = [0, 128], sizes = [16, 128], strides = [1, 1]} : vector<16x256xf32> to vector<16x128xf32>
    %69 = vector.shape_cast %68 : vector<16x128xf32> to vector<16x1x128xf32>
    %70 = vector.shape_cast %67 : vector<16x128xf32> to vector<1x16x128xf32>
    %71 = vector.broadcast %69 : vector<16x1x128xf32> to vector<16x16x128xf32>
    %72 = vector.broadcast %70 : vector<1x16x128xf32> to vector<16x16x128xf32>
    %73 = arith.addf %71, %72 : vector<16x16x128xf32>
    %cst_35 = arith.constant 0.000000e+00 : f32
    %74 = vector.broadcast %cst_35 : f32 to vector<16x16x128xf32>
    %75 = arith.cmpf oge, %73, %74 : vector<16x16x128xf32>
    %cst_36 = arith.constant 2.000000e-01 : f32
    %76 = vector.broadcast %cst_36 : f32 to vector<16x16x128xf32>
    %77 = arith.mulf %76, %73 : vector<16x16x128xf32>
    %78 = arith.select %75, %73, %77 : vector<16x16x128xi1>, vector<16x16x128xf32>
    %79 = vector.shape_cast %78 : vector<16x16x128xf32> to vector<256x128xf32>
    %cst_37 = arith.constant dense<0.000000e+00> : vector<256x1xf32>
    %80 = tpu.matmul %79, %63, %cst_37 {dimension_numbers = #tpu.dot_dimension_numbers<[1], [0], [0], [1], [0, 0, 1, 1], [], []>} : vector<256x128xf32>, vector<128x1xf32>, vector<256x1xf32> -> vector<256x1xf32>
    %81 = vector.shape_cast %80 : vector<256x1xf32> to vector<16x16x1xf32>
    %82 = vector.shape_cast %5 : vector<16x16xf32> to vector<16x16x1xf32>
    %83 = arith.addf %81, %82 : vector<16x16x1xf32>
    %cst_38 = arith.constant dense<0xFF800000> : vector<16x1xf32>
    %84 = vector.multi_reduction <maximumf>, %83, %cst_38 [1] : vector<16x16x1xf32> to vector<16x1xf32>
    %85 = vector.shape_cast %84 : vector<16x1xf32> to vector<16x1x1xf32>
    %86 = vector.broadcast %85 : vector<16x1x1xf32> to vector<16x16x1xf32>
    %87 = arith.subf %83, %86 : vector<16x16x1xf32>
    %88 = math.exp %87 : vector<16x16x1xf32>
    %cst_39 = arith.constant dense<0.000000e+00> : vector<16x1xf32>
    %89 = vector.multi_reduction <add>, %88, %cst_39 [1] : vector<16x16x1xf32> to vector<16x1xf32>
    %90 = vector.shape_cast %89 : vector<16x1xf32> to vector<16x1x1xf32>
    %91 = tpu.reciprocal %90 {approx = true} : vector<16x1x1xf32> -> vector<16x1x1xf32>
    %92 = vector.broadcast %91 : vector<16x1x1xf32> to vector<16x16x1xf32>
    %93 = arith.mulf %88, %92 : vector<16x16x1xf32>
    %94 = vector.shape_cast %67 : vector<16x128xf32> to vector<1x16x128xf32>
    %95 = vector.broadcast %93 : vector<16x16x1xf32> to vector<16x16x128xf32>
    %96 = vector.broadcast %94 : vector<1x16x128xf32> to vector<16x16x128xf32>
    %97 = arith.mulf %95, %96 : vector<16x16x128xf32>
    %cst_40 = arith.constant dense<0.000000e+00> : vector<16x128xf32>
    %98 = vector.multi_reduction <add>, %97, %cst_40 [1] : vector<16x16x128xf32> to vector<16x128xf32>
    %c0_41 = arith.constant 0 : index
    %c0_42 = arith.constant 0 : index
    %99 = vector.load %arg13[%c0_41, %c0_42] : memref<1x128xf32, #tpu.memory_space<vmem>>, vector<1x128xf32>
    %100 = vector.broadcast %99 : vector<1x128xf32> to vector<16x128xf32>
    %101 = arith.addf %98, %100 : vector<16x128xf32>
    %c0_43 = arith.constant 0 : index
    %c0_44 = arith.constant 0 : index
    %102 = vector.load %arg14[%c0_43, %c0_44] : memref<16x128xf32, #tpu.memory_space<vmem>>, vector<16x128xf32>
    tpu.vector_store %arg14[%c0_43, %c0_44], %101 {strides = array<i32>} : memref<16x128xf32, #tpu.memory_space<vmem>>, vector<16x128xf32>,
    %cst_45 = arith.constant dense<0xFF800000> : vector<16xf32>
    %103 = vector.multi_reduction <maximumf>, %101, %cst_45 [1] : vector<16x128xf32> to vector<16xf32>
    %104 = vector.shape_cast %103 : vector<16xf32> to vector<16x1xf32>
    %105 = vector.broadcast %104 : vector<16x1xf32> to vector<16x128xf32>
    %106 = arith.subf %101, %105 : vector<16x128xf32>
    %107 = math.exp %106 : vector<16x128xf32>
    %cst_46 = arith.constant dense<0.000000e+00> : vector<16xf32>
    %108 = vector.multi_reduction <add>, %107, %cst_46 [1] : vector<16x128xf32> to vector<16xf32>
    %109 = vector.shape_cast %108 : vector<16xf32> to vector<16x1xf32>
    %110 = math.log %109 : vector<16x1xf32>
    %111 = vector.broadcast %110 : vector<16x1xf32> to vector<16x128xf32>
    %112 = arith.subf %106, %111 : vector<16x128xf32>
    %c0_47 = arith.constant 0 : index
    %c0_48 = arith.constant 0 : index
    %113 = vector.load %arg15[%c0_47, %c0_48] : memref<16x128xf32, #tpu.memory_space<vmem>>, vector<16x128xf32>
    tpu.vector_store %arg15[%c0_47, %c0_48], %112 {strides = array<i32>} : memref<16x128xf32, #tpu.memory_space<vmem>>, vector<16x128xf32>,
    return
  }
  func.func @transform_0(%arg0: i32) -> (i32, i32) {
    %c0_i32 = arith.constant 0 : i32
    %c0_i32_0 = arith.constant 0 : i32
    %c0_i32_1 = arith.constant 0 : i32
    return %c0_i32, %c0_i32_0 : i32, i32
  }
  func.func @transform_1(%arg0: i32) -> (i32, i32) {
    %c0_i32 = arith.constant 0 : i32
    %c0_i32_0 = arith.constant 0 : i32
    %c0_i32_1 = arith.constant 0 : i32
    return %c0_i32, %c0_i32_0 : i32, i32
  }
  func.func @transform_2(%arg0: i32) -> (i32, i32) {
    %c0_i32 = arith.constant 0 : i32
    %c0_i32_0 = arith.constant 0 : i32
    %c0_i32_1 = arith.constant 0 : i32
    return %c0_i32, %c0_i32_0 : i32, i32
  }
  func.func @transform_3(%arg0: i32) -> (i32, i32) {
    %c0_i32 = arith.constant 0 : i32
    %c0_i32_0 = arith.constant 0 : i32
    %c0_i32_1 = arith.constant 0 : i32
    return %c0_i32, %c0_i32_0 : i32, i32
  }
  func.func @transform_4(%arg0: i32) -> (i32, i32) {
    %c0_i32 = arith.constant 0 : i32
    %c0_i32_0 = arith.constant 0 : i32
    %c0_i32_1 = arith.constant 0 : i32
    return %c0_i32, %c0_i32_0 : i32, i32
  }
  func.func @transform_5(%arg0: i32) -> (i32, i32) {
    %c0_i32 = arith.constant 0 : i32
    %c0_i32_0 = arith.constant 0 : i32
    %c0_i32_1 = arith.constant 0 : i32
    return %c0_i32, %c0_i32_0 : i32, i32
  }
  func.func @transform_6(%arg0: i32) -> (i32, i32) {
    %c0_i32 = arith.constant 0 : i32
    %c0_i32_0 = arith.constant 0 : i32
    %c0_i32_1 = arith.constant 0 : i32
    return %c0_i32, %c0_i32_0 : i32, i32
  }
  func.func @transform_7(%arg0: i32) -> (i32, i32) {
    %c0_i32 = arith.constant 0 : i32
    %c0_i32_0 = arith.constant 0 : i32
    %c0_i32_1 = arith.constant 0 : i32
    return %c0_i32, %c0_i32_0 : i32, i32
  }
  func.func @transform_8(%arg0: i32) -> (i32, i32) {
    %c0_i32 = arith.constant 0 : i32
    %c0_i32_0 = arith.constant 0 : i32
    %c0_i32_1 = arith.constant 0 : i32
    return %c0_i32, %c0_i32_0 : i32, i32
  }
  func.func @transform_9(%arg0: i32) -> (i32, i32) {
    %c0_i32 = arith.constant 0 : i32
    %c0_i32_0 = arith.constant 0 : i32
    %c0_i32_1 = arith.constant 0 : i32
    return %c0_i32, %c0_i32_0 : i32, i32
  }
  func.func @transform_10(%arg0: i32) -> (i32, i32) {
    %c0_i32 = arith.constant 0 : i32
    %c0_i32_0 = arith.constant 0 : i32
    %c0_i32_1 = arith.constant 0 : i32
    return %c0_i32, %c0_i32_0 : i32, i32
  }
  func.func @transform_11(%arg0: i32) -> (i32, i32) {
    %c0_i32 = arith.constant 0 : i32
    %c0_i32_0 = arith.constant 0 : i32
    %c0_i32_1 = arith.constant 0 : i32
    return %c0_i32, %c0_i32_0 : i32, i32
  }
  func.func @transform_12(%arg0: i32) -> (i32, i32) {
    %c0_i32 = arith.constant 0 : i32
    %c0_i32_0 = arith.constant 0 : i32
    %c0_i32_1 = arith.constant 0 : i32
    return %c0_i32, %c0_i32_0 : i32, i32
  }
  func.func @transform_13(%arg0: i32) -> (i32, i32) {
    %c0_i32 = arith.constant 0 : i32
    %c0_i32_0 = arith.constant 0 : i32
    %c0_i32_1 = arith.constant 0 : i32
    return %c0_i32, %c0_i32_0 : i32, i32
  }
  func.func @transform_14(%arg0: i32) -> (i32, i32) {
    %c0_i32 = arith.constant 0 : i32
    %c0_i32_0 = arith.constant 0 : i32
    %c0_i32_1 = arith.constant 0 : i32
    return %c0_i32, %c0_i32_0 : i32, i32
  }
}

</mosaic_0001>

<bundles_post_ra>
// kernel: tpu_custom_call.1
= control target key start
LH: loop header
LB: loop body
LE: loop exit
PB: predicated region body
PF: predicated region fallthrough
CT: control target
= control target key end

     0   :  { %20 = vsyncpa [#allocation3], 0  ;;  %s6638_s0 = inlined_call_operand.vmem [shape: f32[16,128], index: 0, kind: input, shape index: {}]   ;;  %s6639_s1 = inlined_call_operand.hbm [shape: f32[16,16], index: 1, kind: input, shape index: {}]   ;;  %s6640_s2 = inlined_call_operand.vmem [shape: f32[128,256], index: 2, kind: input, shape index: {}]   ;;  %s6641_s3 = inlined_call_operand.hbm [shape: f32[1,256], index: 3, kind: input, shape index: {}]   ;;  %s6642_s4 = inlined_call_operand.vmem [shape: f32[128,10], index: 4, kind: input, shape index: {}]   ;;  %s6643_s5 = inlined_call_operand.vmem [shape: f32[10,128], index: 5, kind: input, shape index: {}]   ;;  %s6644_s6 = inlined_call_operand.vmem [shape: f32[1,128], index: 6, kind: input, shape index: {}]   ;;  %s6645_s7 = inlined_call_operand.vmem [shape: f32[1,128], index: 7, kind: input, shape index: {}]   ;;  %s6646_s8 = inlined_call_operand.vmem [shape: f32[1,128], index: 8, kind: input, shape index: {}]   ;;  %s6647_s9 = inlined_call_operand.hbm [shape: f32[128,256], index: 9, kind: input, shape index: {}]   ;;  %s6648_s10 = inlined_call_operand.vmem [shape: f32[1,256], index: 10, kind: input, shape index: {}]   ;;  %s6649_s11 = inlined_call_operand.vmem [shape: f32[128,1], index: 11, kind: input, shape index: {}]   ;;  %s6650_s12 = inlined_call_operand.vmem [shape: f32[1,128], index: 12, kind: input, shape index: {}]   ;;  %s6651_s13 = inlined_call_operand.hbm [shape: f32[16,128], index: 13, kind: output, shape index: {0}]   ;;  %s6652_s14 = inlined_call_operand.hbm [shape: f32[16,128], index: 14, kind: output, shape index: {1}]  }
   0x1   :  { %21 = vsyncpa [#allocation6], 0 }
   0x2   :  { %22 = vsyncpa [#allocation4], 0 }
   0x3   :  { %23 = vsyncpa [#allocation10], 0  ;;  %s4748_s29 = smov [#allocation5]   ;;  %s4749_s15 = smov [#allocation2]  }
   0x4   :  { %s46_s30 = sshll.u32 %s4748_s29, 4  ;;  %s31_s16 = sshll.u32 %s4749_s15, 4  ;;  %s47_s30 = int_to_ptr.vmem [resolvable:$true] %s46_s30  ;;  %s4837_s16 = int_to_ptr.vmem [resolvable:$true] %s31_s16 }
   0x5   :  { %s4630_s19 = scalar_lea.hbm %s6641_s3, 32 }
   0x6   :  { %p4631_p0 = scmp.ne.s32.totalorder %s6641_s3, %s4630_s19  ;;  %p4634_p1 = scmp.lt.u32.totalorder %s4630_s19, %s6641_s3 }
   0x8   :  { %p4636_p2 = pnand %p4634_p1, %p4631_p0 }
   0xa   :  { %4639 = shalt.err (!%p4636_p2)
}
   0xb   :  { %s4640_s24 = scalar_lea.vmem %s47_s30, 32  ;;  %p4645_p4 = scmp.lt.s32.totalorder %s47_s30, %s47_s30 }
   0xc   :  { %p4641_p3 = scmp.ne.s32.totalorder %s47_s30, %s4640_s24  ;;  %p4646_p5 = scmp.lt.s32.totalorder %s4640_s24, %s4640_s24 }
   0xe   :  { %p4647_p6 = por %p4646_p5, %p4645_p4 }
  0x10   :  { %p4648_p7 = pnand %p4647_p6, %p4641_p3 }
  0x12   :  { %4651 = shalt.err (!%p4648_p7)
}
  0x13   :  { %49 = dma.hbm_to_vmem [thread:$0]  %s6641_s3, 32, %s47_s30, [#allocation6]  }
  0x14   :  { %s4652_s29 = scalar_lea.hbm %s6639_s1, 256 }
  0x15   :  { %p4653_p8 = scmp.ne.s32.totalorder %s6639_s1, %s4652_s29  ;;  %p4656_p9 = scmp.lt.u32.totalorder %s4652_s29, %s6639_s1 }
  0x17   :  { %p4658_p10 = pnand %p4656_p9, %p4653_p8 }
  0x19   :  { %4661 = shalt.err (!%p4658_p10)
}
  0x1a   :  { %s4662_s20 = scalar_lea.vmem %s4837_s16, 256  ;;  %p4667_p12 = scmp.lt.s32.totalorder %s4837_s16, %s4837_s16 }
  0x1b   :  { %p4663_p11 = scmp.ne.s32.totalorder %s4837_s16, %s4662_s20  ;;  %p4668_p13 = scmp.lt.s32.totalorder %s4662_s20, %s4662_s20 }
  0x1d   :  { %p4669_p0 = por %p4668_p13, %p4667_p12 }
  0x1f   :  { %p4670_p1 = pnand %p4669_p0, %p4663_p11 }
  0x21   :  { %4673 = shalt.err (!%p4670_p1)
}
  0x22   :  { %s4750_s3 = smov 128   ;;  %s4751_s30 = smov 8  }
  0x23   :  { %37 = dma.hbm_to_vmem [thread:$0]  %s6639_s1, 256, %s4837_s16, [#allocation3], %s4750_s3, %s4750_s3, %s4751_s30  }
  0x24   :  { %s4752_s23 = smov [#allocation7]   ;;  %s4674_s27 = scalar_lea.hbm %s6647_s9, 4096 }
  0x25   :  { %s65_s24 = sshll.u32 %s4752_s23, 4  ;;  %p4675_p2 = scmp.ne.s32.totalorder %s6647_s9, %s4674_s27  ;;  %s66_s24 = int_to_ptr.vmem [resolvable:$true] %s65_s24 }
  0x26   :  { %p4678_p3 = scmp.lt.u32.totalorder %s4674_s27, %s6647_s9 }
  0x28   :  { %p4680_p4 = pnand %p4678_p3, %p4675_p2 }
  0x2a   :  { %4683 = shalt.err (!%p4680_p4)
}
  0x2b   :  { %s4684_s18 = scalar_lea.vmem %s66_s24, 4096  ;;  %p4689_p6 = scmp.lt.s32.totalorder %s66_s24, %s66_s24 }
  0x2c   :  { %p4685_p5 = scmp.ne.s32.totalorder %s66_s24, %s4684_s18  ;;  %p4690_p7 = scmp.lt.s32.totalorder %s4684_s18, %s4684_s18 }
  0x2e   :  { %p4691_p8 = por %p4690_p7, %p4689_p6 }
  0x30   :  { %p4692_p9 = pnand %p4691_p8, %p4685_p5 }
  0x32   :  { %4695 = shalt.err (!%p4692_p9)
}
  0x33   :  { %s4753_s1 = smov 256   ;;  %s4754_s16 = smov 16  }
  0x34   :  { %71 = dma.hbm_to_vmem [thread:$0]  %s6647_s9, 4096, %s66_s24, [#allocation6], %s4753_s1, %s4753_s1, %s4754_s16  }
  0x35   :  { %4740 = dma.done.wait [#allocation3], 256  }
  0x36   :  { %4741 = vsyncadd [#allocation3], 4294967040 }
  0x37   :  { %4742 = dma.done.wait [#allocation6], 4128  }
  0x38   :  { %4743 = vsyncadd [#allocation6], 4294963168  ;;  %v6653_v0 = vmov 0.0   ;;  %v96_v1 = vld [vmem:[%s6640_s2 + $0x8] sm:$0xff]  ;;  %v98_v2 = vld [vmem:[%s6640_s2 + $0x18] sm:$0xff] }
  0x39   :  { %221 = vmatprep.mubr.f32.mxu1 %v6653_v0  ;;  %v95_v3 = vld [vmem:[%s6640_s2] sm:$0xff]  ;;  %v4252_v4 = vpack.c.bf16 %v98_v2, %v96_v1  ;;  %v97_v5 = vld [vmem:[%s6640_s2 + $0x10] sm:$0xff]  ;;  %v100_v6 = vld [vmem:[%s6640_s2 + $0x28] sm:$0xff] }
  0x3a   :  { %v102_v7 = vld [vmem:[%s6640_s2 + $0x38] sm:$0xff]  ;;  %v4254_v8 = vpack.c.bf16 %v97_v5, %v95_v3  ;;  %v99_v10 = vld [vmem:[%s6640_s2 + $0x20] sm:$0xff]  ;;  %v101_v11 = vld [vmem:[%s6640_s2 + $0x30] sm:$0xff] }
  0x3b   :  { %v4256_v9 = vpack.c.bf16 %v102_v7, %v100_v6  ;;  %v104_v12 = vld [vmem:[%s6640_s2 + $0x48] sm:$0xff]  ;;  %4253 = vmatprep.subr.bf16.mxu1 %v4252_v4  ;;  %v106_v13 = vld [vmem:[%s6640_s2 + $0x58] sm:$0xff]  ;;  %v4258_v14 = vpack.c.bf16 %v101_v11, %v99_v10  ;;  %v103_v16 = vld [vmem:[%s6640_s2 + $0x40] sm:$0xff] }
  0x3c   :  { %4255 = vmatpush1.bf16.msra.mxu1 %v4254_v8  ;;  %v4260_v15 = vpack.c.bf16 %v106_v13, %v104_v12  ;;  %v105_v17 = vld [vmem:[%s6640_s2 + $0x50] sm:$0xff]  ;;  %v108_v18 = vld [vmem:[%s6640_s2 + $0x68] sm:$0xff]  ;;  %v110_v19 = vld [vmem:[%s6640_s2 + $0x78] sm:$0xff]  ;;  %v147_v12 = vlaneseq }
  0x3d   :  { %4257 = vmatprep.subr.bf16.mxu1 %v4256_v9  ;;  %v4262_v20 = vpack.c.bf16 %v105_v17, %v103_v16  ;;  %v4264_v21 = vpack.c.bf16 %v110_v19, %v108_v18  ;;  %v107_v22 = vld [vmem:[%s6640_s2 + $0x60] sm:$0xff]  ;;  %v109_v23 = vld [vmem:[%s6640_s2 + $0x70] sm:$0xff]  ;;  %v112_v24 = vld [vmem:[%s6640_s2 + $0x88] sm:$0xff]  ;;  %v4756_v17 = vmov -1e+30  }
  0x3e   :  { %v114_v25 = vld [vmem:[%s6640_s2 + $0x98] sm:$0xff]  ;;  %v4266_v26 = vpack.c.bf16 %v109_v23, %v107_v22  ;;  %v111_v28 = vld [vmem:[%s6640_s2 + $0x80] sm:$0xff]  ;;  %v113_v29 = vld [vmem:[%s6640_s2 + $0x90] sm:$0xff]  ;;  %v5035_v13 = vshrl.u32 %v147_v12, 7 }
  0x3f   :  { %v4268_v27 = vpack.c.bf16 %v114_v25, %v112_v24  ;;  %v116_v30 = vld [vmem:[%s6640_s2 + $0xa8] sm:$0xff]  ;;  %v118_v31 = vld [vmem:[%s6640_s2 + $0xb8] sm:$0xff]  ;;  %v4270_v32 = vpack.c.bf16 %v113_v29, %v111_v28  ;;  %v115_v34 = vld [vmem:[%s6640_s2 + $0xa0] sm:$0xff] }
  0x40   :  { %4259 = vmatpush1.bf16.msra.mxu1 %v4258_v14  ;;  %v4272_v33 = vpack.c.bf16 %v118_v31, %v116_v30  ;;  %v117_v35 = vld [vmem:[%s6640_s2 + $0xb0] sm:$0xff]  ;;  %v120_v36 = vld [vmem:[%s6640_s2 + $0xc8] sm:$0xff]  ;;  %v122_v37 = vld [vmem:[%s6640_s2 + $0xd8] sm:$0xff]  ;;  %v5041_v16 = vsub.s32 1, %v5035_v13  ;;  %v802_v23 = vsub.s32 3, %v5035_v13  ;;  %v813_v25 = vsub.s32 4, %v5035_v13 }
  0x41   :  { %4261 = vmatprep.subr.bf16.mxu1 %v4260_v15  ;;  %v4274_v38 = vpack.c.bf16 %v117_v35, %v115_v34  ;;  %v4276_v39 = vpack.c.bf16 %v122_v37, %v120_v36  ;;  %v119_v40 = vld [vmem:[%s6640_s2 + $0xc0] sm:$0xff]  ;;  %v121_v41 = vld [vmem:[%s6640_s2 + $0xd0] sm:$0xff]  ;;  %v124_v42 = vld [vmem:[%s6640_s2 + $0xe8] sm:$0xff]  ;;  %v5038_v15 = vsub.s32 0, %v5035_v13  ;;  %v835_v29 = vsub.s32 6, %v5035_v13 }
  0x42   :  { %v126_v43 = vld [vmem:[%s6640_s2 + $0xf8] sm:$0xff]  ;;  %v4278_v44 = vpack.c.bf16 %v121_v41, %v119_v40  ;;  %v123_v46 = vld [vmem:[%s6640_s2 + $0xe0] sm:$0xff]  ;;  %v125_v47 = vld [vmem:[%s6640_s2 + $0xf0] sm:$0xff] }
  0x43   :  { %v4280_v45 = vpack.c.bf16 %v126_v43, %v124_v42  ;;  %v128_v48 = vld [vmem:[%s6642_s4] sm:$0xff]  ;;  %v129_v49 = vld [vmem:[%s6642_s4 + $0x8] sm:$0xff]  ;;  %v4282_v50 = vpack.c.bf16 %v125_v47, %v123_v46  ;;  %v130_v52 = vld [vmem:[%s6642_s4 + $0x10] sm:$0xff]  ;;  %6688 = vst [vmem:[#allocation15_spill] sm:$0xff] %v5038_v15 }
  0x44   :  { %4263 = vmatpush1.bf16.msra.mxu1 %v4262_v20  ;;  %v4284_v51 = vpack.c.bf16 %v129_v49, %v128_v48  ;;  %v131_v53 = vld [vmem:[%s6642_s4 + $0x18] sm:$0xff]  ;;  %v93_v54 = vld [vmem:[%s6638_s0] sm:$0xff]  ;;  %v133_v57 = vld [vmem:[%s6642_s4 + $0x28] sm:$0xff] }
  0x45   :  { %4265 = vmatprep.subr.bf16.mxu1 %v4264_v21  ;;  %v4288_v55 = vpack.c.bf16 %v131_v53, %v130_v52  ;;  %v132_v56 = vld [vmem:[%s6642_s4 + $0x20] sm:$0xff]  ;;  %v94_v58 = vld [vmem:[%s6638_s0 + $0x8] sm:$0xff]  ;;  %v134_v60 = vld [vmem:[%s6642_s4 + $0x30] sm:$0xff]  ;;  %v791_v21 = vsub.s32 2, %v5035_v13 }
  0x46   :  { %v4292_v59 = vpack.c.bf16 %v133_v57, %v132_v56  ;;  %v135_v61 = vld [vmem:[%s6642_s4 + $0x38] sm:$0xff]  ;;  %v136_v63 = vld [vmem:[%s6642_s4 + $0x40] sm:$0xff]  ;;  %v137_v1 = vld [vmem:[%s6642_s4 + $0x48] sm:$0xff] }
  0x47   :  { %v4296_v62 = vpack.c.bf16 %v135_v61, %v134_v60  ;;  %v4300_v2 = vpack.c.bf16 %v137_v1, %v136_v63  ;;  %v138_v3 = vld [vmem:[%s6642_s4 + $0x50] sm:$0xff]  ;;  %v139_v4 = vld [vmem:[%s6642_s4 + $0x58] sm:$0xff]  ;;  %v140_v6 = vld [vmem:[%s6642_s4 + $0x60] sm:$0xff] }
  0x48   :  { %4267 = vmatpush1.bf16.msra.mxu1 %v4266_v26  ;;  %v4304_v5 = vpack.c.bf16 %v139_v4, %v138_v3  ;;  %v141_v7 = vld [vmem:[%s6642_s4 + $0x68] sm:$0xff]  ;;  %v142_v9 = vld [vmem:[%s6642_s4 + $0x70] sm:$0xff]  ;;  %v143_v10 = vld [vmem:[%s6642_s4 + $0x78] sm:$0xff] }
  0x49   :  { %4269 = vmatprep.subr.bf16.mxu1 %v4268_v27  ;;  %v4308_v8 = vpack.c.bf16 %v141_v7, %v140_v6  ;;  %v4312_v11 = vpack.c.bf16 %v143_v10, %v142_v9  ;;  %v87_v14 = vld [vmem:[#allocation2] sm:$0xff]  ;;  %v824_v27 = vsub.s32 5, %v5035_v13  ;;  %v88_v30 = vld [vmem:[#allocation2 + $0x8] sm:$0xff]  ;;  %v127_v40 = vld [vmem:[#allocation5] sm:$0x3] }
  0x4a   :  { %vm89_vm0 = vcmp.gt.f32.partialorder %v87_v14, 0.0  ;;  %vm90_vm1 = vcmp.gt.f32.partialorder %v88_v30, 0.0  ;;  %v5054_v43 = vrot.slane %v127_v40, %v5041_v16  ;;  %v150_v53 = vrot.slane %v127_v40, %v5038_v15 }
  0x4b   :  { %v91_v18 = vsel %vm89_vm0, 0.0, %v4756_v17  ;;  %v92_v34 = vsel %vm90_vm1, 0.0, %v4756_v17 }
  0x4c   :  { %4271 = vmatpush1.bf16.msra.mxu1 %v4270_v32  ;;  %v770_v19 = vrot.slane %v91_v18, %v5038_v15  ;;  %v781_v20 = vrot.slane %v91_v18, %v5041_v16  ;;  %v792_v22 = vrot.slane %v91_v18, %v791_v21  ;;  %v803_v24 = vrot.slane %v91_v18, %v802_v23 }
  0x4d   :  { %4273 = vmatprep.subr.bf16.mxu1 %v4272_v33  ;;  %v814_v26 = vrot.slane %v91_v18, %v813_v25  ;;  %v825_v28 = vrot.slane %v91_v18, %v824_v27  ;;  %v836_v31 = vrot.slane %v91_v18, %v835_v29  ;;  %v846_v32 = vsub.s32 7, %v5035_v13 }
  0x4e   :  { %772 = vbcast.lane.b32.xlu0 %v770_v19, 256  ;;  %783 = vbcast.lane.b32.xlu1 %v781_v20, 256  ;;  %v858_v35 = vrot.slane %v92_v34, %v5038_v15  ;;  %v869_v36 = vrot.slane %v92_v34, %v5041_v16  ;;  %v880_v37 = vrot.slane %v92_v34, %v791_v21 }
  0x4f   :  { %v847_v33 = vrot.slane %v91_v18, %v846_v32  ;;  %v891_v41 = vrot.slane %v92_v34, %v802_v23  ;;  %v913_v49 = vrot.slane %v92_v34, %v824_v27  ;;  %v935_v3 = vrot.slane %v92_v34, %v846_v32 }
  0x50   :  { %4275 = vmatpush1.bf16.msra.mxu1 %v4274_v38  ;;  %v4757_v38 = vmov 1966171168  }
  0x51   :  { %4277 = vmatprep.subr.bf16.mxu1 %v4276_v39  ;;  %v238_v39 = vunpack.c.l.s4 %v4757_v38 }
  0x52   :  { %776 = vbcast.lane.b32.xlu0 %v770_v19, 264  ;;  %787 = vbcast.lane.b32.xlu1 %v781_v20, 264 }
  0x53   :  { %v239_v42 = vunpack.c.0.s8 %v238_v39 }
  0x54   :  { %4279 = vmatpush1.bf16.msra.mxu1 %v4278_v44  ;;  %v902_v44 = vrot.slane %v92_v34, %v813_v25 }
  0x55   :  { %4281 = vmatprep.subr.bf16.mxu1 %v4280_v45  ;;  %v5057_v46 = vsub.s32 %v239_v42, %v5035_v13 }
  0x56   :  { %798 = vbcast.lane.b32.xlu1 %v792_v22, 264  ;;  %794 = vbcast.lane.b32.xlu0 %v792_v22, 256 }
  0x58   :  { %4283 = vmatpush1.bf16.msra.mxu1 %v4282_v50 }
  0x59   :  { %4285 = vmatprep.subr.bf16.mxu1 %v4284_v51 }
  0x5a   :  { %809 = vbcast.lane.b32.xlu1 %v803_v24, 264  ;;  %805 = vbcast.lane.b32.xlu0 %v803_v24, 256 }
  0x5b   :  { %222 = vmatmul.mubr.f32.vlgmr.msra.gmra.mrb[0].mxu1 %v93_v54 }
  0x5c   :  { %227 = vmatprep.mubr.f32.mxu1 %v6653_v0  ;;  %4287 = vmatpush3.bf16.msra.mxu1 %v4284_v51 }
  0x5d   :  { %4289 = vmatprep.subr.bf16.mxu1 %v4288_v55 }
  0x5e   :  { %820 = vbcast.lane.b32.xlu1 %v814_v26, 264  ;;  %816 = vbcast.lane.b32.xlu0 %v814_v26, 256 }
  0x5f   :  { %228 = vmatmul.mubr.f32.gmra.mrb[2].mxu1 %v94_v58  ;;  %v924_v58 = vrot.slane %v92_v34, %v835_v29 }
  0x60   :  { %4291 = vmatpush3.bf16.msra.mxu1 %v4288_v55 }
  0x61   :  { %4293 = vmatprep.subr.bf16.mxu1 %v4292_v59 }
  0x62   :  { %831 = vbcast.lane.b32.xlu1 %v825_v28, 264  ;;  %827 = vbcast.lane.b32.xlu0 %v825_v28, 256 }
  0x64   :  { %4295 = vmatpush3.bf16.msra.mxu1 %v4292_v59 }
  0x65   :  { %4297 = vmatprep.subr.bf16.mxu1 %v4296_v62 }
  0x66   :  { %842 = vbcast.lane.b32.xlu1 %v836_v31, 264  ;;  %838 = vbcast.lane.b32.xlu0 %v836_v31, 256 }
  0x68   :  { %4299 = vmatpush3.bf16.msra.mxu1 %v4296_v62 }
  0x69   :  { %4301 = vmatprep.subr.bf16.mxu1 %v4300_v2 }
  0x6a   :  { %853 = vbcast.lane.b32.xlu1 %v847_v33, 264  ;;  %849 = vbcast.lane.b32.xlu0 %v847_v33, 256 }
  0x6c   :  { %4303 = vmatpush3.bf16.msra.mxu1 %v4300_v2 }
  0x6d   :  { %4305 = vmatprep.subr.bf16.mxu1 %v4304_v5 }
  0x6e   :  { %864 = vbcast.lane.b32.xlu1 %v858_v35, 264  ;;  %860 = vbcast.lane.b32.xlu0 %v858_v35, 256 }
  0x70   :  { %4307 = vmatpush3.bf16.msra.mxu1 %v4304_v5 }
  0x71   :  { %4309 = vmatprep.subr.bf16.mxu1 %v4308_v8 }
  0x72   :  { %875 = vbcast.lane.b32.xlu1 %v869_v36, 264  ;;  %871 = vbcast.lane.b32.xlu0 %v869_v36, 256 }
  0x74   :  { %4311 = vmatpush3.bf16.msra.mxu1 %v4308_v8 }
  0x75   :  { %4313 = vmatprep.subr.bf16.mxu1 %v4312_v11 }
  0x76   :  { %886 = vbcast.lane.b32.xlu1 %v880_v37, 264  ;;  %882 = vbcast.lane.b32.xlu0 %v880_v37, 256 }
  0x78   :  { %4315 = vmatpush3.bf16.msra.mxu1 %v4312_v11 }
  0x7a   :  { %897 = vbcast.lane.b32.xlu1 %v891_v41, 264  ;;  %893 = vbcast.lane.b32.xlu0 %v891_v41, 256 }
  0x7e   :  { %908 = vbcast.lane.b32.xlu1 %v902_v44, 264  ;;  %904 = vbcast.lane.b32.xlu0 %v902_v44, 256 }
  0x82   :  { %919 = vbcast.lane.b32.xlu1 %v913_v49, 264  ;;  %915 = vbcast.lane.b32.xlu0 %v913_v49, 256 }
  0x86   :  { %930 = vbcast.lane.b32.xlu1 %v924_v58, 264  ;;  %926 = vbcast.lane.b32.xlu0 %v924_v58, 256 }
  0x8a   :  { %941 = vbcast.lane.b32.xlu1 %v935_v3, 264  ;;  %937 = vbcast.lane.b32.xlu0 %v935_v3, 256 }
 0x12e   :  { %v223_v45 = vpop.f32.mrb[0].mxu1 }
 0x12f   :  { %v225_v47 = vpop.f32.mrb[1].mxu1  ;;  %v5068_v63 = vadd.f32 %v223_v45, %v150_v53 }
 0x130   :  { %v226_v48 = vadd.f32 %v225_v47, %v5054_v43 }
 0x132   :  { %v236_v50 = vcombine.high %v226_v48, %v226_v48  ;;  %v243_v51 = vrot.slane %v226_v48, %v5057_v46  ;;  %v229_v52 = vpop.f32.mrb[2].mxu1 }
 0x133   :  { %v231_v54 = vpop.f32.mrb[3].mxu1  ;;  %v5063_v57 = vadd.f32 %v229_v52, %v150_v53 }
 0x134   :  { %v251_v55 = vcombine.high %v243_v51, %v243_v51  ;;  %v259_v56 = vrot.slane %v243_v51, %v5057_v46  ;;  %v250_v59 = vrot.slane %v236_v50, %v5057_v46  ;;  %v5083_v27 = vadd.f32 %v231_v54, %v5054_v43 }
 0x136   :  { %v273_v60 = vrot.slane %v251_v55, %v5057_v46  ;;  %v281_v61 = vcombine.high %v259_v56, %v259_v56  ;;  %v337_v62 = vrot.slane %v259_v56, %v5038_v15  ;;  %v252_v4 = vcombine.high %v250_v59, %v250_v59 }
 0x137   :  { %v266_v7 = vrot.slane %v250_v59, %v5057_v46  ;;  %v292_v36 = vrot.slane %v5083_v27, %v5057_v46 }
 0x138   :  { %v341_v1 = vrot.slane %v273_v60, %v5038_v15  ;;  %v415_v2 = vadd.f32 %v337_v62, %v5063_v57  ;;  %v414_v5 = vadd.f32 %v337_v62, %v5068_v63  ;;  %v345_v9 = vrot.slane %v281_v61, %v5038_v15 }
 0x139   :  { %v283_v10 = vcombine.high %v273_v60, %v273_v60  ;;  %v280_v13 = vrot.slane %v252_v4, %v5057_v46  ;;  %v353_v24 = vrot.slane %v266_v7, %v5038_v15  ;;  %v282_v26 = vcombine.high %v266_v7, %v266_v7 }
 0x13a   :  { %v416_v6 = vadd.f32 %v341_v1, %v5068_v63  ;;  %v417_v8 = vadd.f32 %v341_v1, %v5063_v57  ;;  %vm446_vm2 = vcmp.ge.f32.partialorder %v414_v5, 0.0  ;;  %v478_v11 = vmul.f32 0.2, %v414_v5 }
 0x13b   :  { %vm447_vm3 = vcmp.ge.f32.partialorder %v415_v2, 0.0  ;;  %v479_v12 = vmul.f32 0.2, %v415_v2  ;;  %v418_v20 = vadd.f32 %v345_v9, %v5068_v63  ;;  %v419_v21 = vadd.f32 %v345_v9, %v5063_v57 }
 0x13c   :  { %v510_v14 = vsel %vm446_vm2, %v414_v5, %v478_v11  ;;  %vm448_vm4 = vcmp.ge.f32.partialorder %v416_v6, 0.0  ;;  %v480_v17 = vmul.f32 0.2, %v416_v6  ;;  %v481_v19 = vmul.f32 0.2, %v417_v8 }
 0x13d   :  { %4072 = vmatprep.mubr.f32.mxu1 %v510_v14  ;;  %v511_v18 = vsel %vm447_vm3, %v415_v2, %v479_v12  ;;  %vm449_vm5 = vcmp.ge.f32.partialorder %v417_v8, 0.0  ;;  %v349_v23 = vrot.slane %v283_v10, %v5038_v15  ;;  %vm450_vm6 = vcmp.ge.f32.partialorder %v418_v20, 0.0 }
 0x13e   :  { %4073 = vmatmul.mubr.f32.vlgmr.msra.gmra.mrb[4].mxu1 %v511_v18  ;;  %v512_v22 = vsel %vm448_vm4, %v416_v6, %v480_v17  ;;  %v482_v25 = vmul.f32 0.2, %v418_v20  ;;  %v513_v29 = vsel %vm449_vm5, %v417_v8, %v481_v19  ;;  %v483_v30 = vmul.f32 0.2, %v419_v21 }
 0x13f   :  { %4075 = vmatprep.mubr.f32.mxu1 %v512_v22  ;;  %v420_v28 = vadd.f32 %v349_v23, %v5068_v63  ;;  %v421_v31 = vadd.f32 %v349_v23, %v5063_v57  ;;  %v357_v32 = vrot.slane %v280_v13, %v5038_v15  ;;  %vm451_vm7 = vcmp.ge.f32.partialorder %v419_v21, 0.0 }
 0x140   :  { %v514_v33 = vsel %vm450_vm6, %v418_v20, %v482_v25  ;;  %v422_v35 = vadd.f32 %v353_v24, %v5068_v63  ;;  %v423_v37 = vadd.f32 %v353_v24, %v5063_v57  ;;  %v515_v38 = vsel %vm451_vm7, %v419_v21, %v483_v30 }
 0x141   :  { %v484_v34 = vmul.f32 0.2, %v420_v28  ;;  %vm452_vm8 = vcmp.ge.f32.partialorder %v420_v28, 0.0  ;;  %vm453_vm9 = vcmp.ge.f32.partialorder %v421_v31, 0.0  ;;  %v485_v39 = vmul.f32 0.2, %v421_v31 }
 0x142   :  { %4076 = vmatmul.mubr.f32.gmra.mrb[6].mxu1 %v513_v29  ;;  %v424_v40 = vadd.f32 %v357_v32, %v5068_v63  ;;  %v486_v42 = vmul.f32 0.2, %v422_v35  ;;  %v361_v43 = vrot.slane %v282_v26, %v5038_v15  ;;  %v284_v44 = vcombine.high %v280_v13, %v280_v13 }
 0x143   :  { %4078 = vmatprep.mubr.f32.mxu1 %v514_v33  ;;  %v516_v41 = vsel %vm452_vm8, %v420_v28, %v484_v34  ;;  %vm454_vm10 = vcmp.ge.f32.partialorder %v422_v35, 0.0  ;;  %v300_v45 = vcombine.high %v292_v36, %v292_v36  ;;  %v308_v47 = vrot.slane %v292_v36, %v5057_v46 }
 0x144   :  { %v517_v48 = vsel %vm453_vm9, %v421_v31, %v485_v39  ;;  %vm455_vm11 = vcmp.ge.f32.partialorder %v423_v37, 0.0  ;;  %v487_v49 = vmul.f32 0.2, %v423_v37  ;;  %v425_v50 = vadd.f32 %v357_v32, %v5063_v57 }
 0x145   :  { %v518_v51 = vsel %vm454_vm10, %v422_v35, %v486_v42  ;;  %v488_v52 = vmul.f32 0.2, %v424_v40  ;;  %v426_v53 = vadd.f32 %v361_v43, %v5068_v63  ;;  %v365_v54 = vrot.slane %v284_v44, %v5038_v15 }
 0x146   :  { %4079 = vmatmul.mubr.f32.gmra.mrb[8].mxu1 %v515_v38  ;;  %vm456_vm12 = vcmp.ge.f32.partialorder %v424_v40, 0.0  ;;  %v322_v55 = vrot.slane %v300_v45, %v5057_v46  ;;  %v369_v56 = vrot.slane %v308_v47, %v5038_v15  ;;  %v519_v58 = vsel %vm455_vm11, %v423_v37, %v487_v49 }
 0x147   :  { %4081 = vmatprep.mubr.f32.mxu1 %v516_v41  ;;  %v489_v59 = vmul.f32 0.2, %v425_v50  ;;  %v427_v60 = vadd.f32 %v361_v43, %v5063_v57  ;;  %v520_v61 = vsel %vm456_vm12, %v424_v40, %v488_v52  ;;  %vm457_vm13 = vcmp.ge.f32.partialorder %v425_v50, 0.0 }
 0x148   :  { %v490_v62 = vmul.f32 0.2, %v426_v53  ;;  %v428_v1 = vadd.f32 %v365_v54, %v5068_v63  ;;  %vm458_vm14 = vcmp.ge.f32.partialorder %v426_v53, 0.0  ;;  %v285_v2 = vcombine.high %v5083_v27, %v5083_v27 }
 0x149   :  { %v330_v3 = vcombine.high %v308_v47, %v308_v47  ;;  %v521_v4 = vsel %vm457_vm13, %v425_v50, %v489_v59  ;;  %v491_v5 = vmul.f32 0.2, %v427_v60  ;;  %v429_v6 = vadd.f32 %v365_v54, %v5063_v57 }
 0x14a   :  { %4082 = vmatmul.mubr.f32.gmra.mrb[10].mxu1 %v517_v48  ;;  %v430_v7 = vadd.f32 %v369_v56, %v5068_v63  ;;  %v522_v8 = vsel %vm458_vm14, %v426_v53, %v490_v62  ;;  %vm459_vm15 = vcmp.ge.f32.partialorder %v427_v60, 0.0  ;;  %v492_v9 = vmul.f32 0.2, %v428_v1 }
 0x14b   :  { %4084 = vmatprep.mubr.f32.mxu1 %v518_v51  ;;  %v373_v10 = vrot.slane %v322_v55, %v5038_v15  ;;  %vm460_vm0 = vcmp.ge.f32.partialorder %v428_v1, 0.0  ;;  %v299_v11 = vrot.slane %v285_v2, %v5057_v46  ;;  %v332_v12 = vcombine.high %v322_v55, %v322_v55 }
 0x14c   :  { %v523_v13 = vsel %vm459_vm15, %v427_v60, %v491_v5  ;;  %v493_v14 = vmul.f32 0.2, %v429_v6  ;;  %v431_v17 = vadd.f32 %v369_v56, %v5063_v57  ;;  %v377_v18 = vrot.slane %v330_v3, %v5038_v15 }
 0x14d   :  { %v524_v19 = vsel %vm460_vm0, %v428_v1, %v492_v9  ;;  %vm461_vm1 = vcmp.ge.f32.partialorder %v429_v6, 0.0  ;;  %v494_v20 = vmul.f32 0.2, %v430_v7  ;;  %v432_v21 = vadd.f32 %v373_v10, %v5068_v63 }
 0x14e   :  { %4085 = vmatmul.mubr.f32.gmra.mrb[12].mxu1 %v519_v58  ;;  %vm462_vm2 = vcmp.ge.f32.partialorder %v430_v7, 0.0  ;;  %v301_v22 = vcombine.high %v299_v11, %v299_v11  ;;  %v315_v23 = vrot.slane %v299_v11, %v5057_v46  ;;  %v525_v24 = vsel %vm461_vm1, %v429_v6, %v493_v14 }
 0x14f   :  { %4087 = vmatprep.mubr.f32.mxu1 %v520_v61  ;;  %vm463_vm3 = vcmp.ge.f32.partialorder %v431_v17, 0.0  ;;  %v495_v25 = vmul.f32 0.2, %v431_v17  ;;  %v433_v26 = vadd.f32 %v373_v10, %v5063_v57  ;;  %v526_v27 = vsel %vm462_vm2, %v430_v7, %v494_v20  ;;  %v145_v20 = vld [vmem:[%s6643_s5 + $0x8] sm:$0x3] }
 0x150   :  { %v496_v28 = vmul.f32 0.2, %v432_v21  ;;  %v434_v29 = vadd.f32 %v377_v18, %v5068_v63  ;;  %v381_v30 = vrot.slane %v332_v12, %v5038_v15  ;;  %vm464_vm4 = vcmp.ge.f32.partialorder %v432_v21, 0.0 }
 0x151   :  { %v329_v31 = vrot.slane %v301_v22, %v5057_v46  ;;  %v527_v32 = vsel %vm463_vm3, %v431_v17, %v495_v25  ;;  %vm465_vm5 = vcmp.ge.f32.partialorder %v433_v26, 0.0  ;;  %v497_v33 = vmul.f32 0.2, %v433_v26  ;;  %v5138_v22 = vpop.permute.xlu1 %783 }
 0x152   :  { %4088 = vmatmul.mubr.f32.gmra.mrb[14].mxu1 %v521_v4  ;;  %v435_v34 = vadd.f32 %v377_v18, %v5063_v57  ;;  %v528_v35 = vsel %vm464_vm4, %v432_v21, %v496_v28  ;;  %v498_v36 = vmul.f32 0.2, %v434_v29  ;;  %v436_v37 = vadd.f32 %v381_v30, %v5068_v63  ;;  %6689 = vst [vmem:[#allocation16_spill] sm:$0xff] %v5138_v22 }
 0x153   :  { %4090 = vmatprep.mubr.f32.mxu1 %v522_v8  ;;  %v385_v38 = vrot.slane %v315_v23, %v5038_v15  ;;  %vm466_vm6 = vcmp.ge.f32.partialorder %v434_v29, 0.0  ;;  %v331_v39 = vcombine.high %v315_v23, %v315_v23  ;;  %v529_v40 = vsel %vm465_vm5, %v433_v26, %v497_v33  ;;  %v5140_v23 = vpop.permute.xlu0 %772 }
 0x154   :  { %vm467_vm7 = vcmp.ge.f32.partialorder %v435_v34, 0.0  ;;  %v499_v41 = vmul.f32 0.2, %v435_v34  ;;  %v437_v42 = vadd.f32 %v381_v30, %v5063_v57  ;;  %v530_v43 = vsel %vm466_vm6, %v434_v29, %v498_v36  ;;  %6690 = vst [vmem:[#allocation17_spill] sm:$0xff] %v5140_v23 }
 0x155   :  { %v500_v44 = vmul.f32 0.2, %v436_v37  ;;  %v438_v45 = vadd.f32 %v385_v38, %v5068_v63  ;;  %v389_v47 = vrot.slane %v329_v31, %v5038_v15  ;;  %vm468_vm8 = vcmp.ge.f32.partialorder %v436_v37, 0.0 }
 0x156   :  { %4091 = vmatmul.mubr.f32.gmra.mrb[16].mxu1 %v523_v13  ;;  %v439_v48 = vadd.f32 %v385_v38, %v5063_v57  ;;  %v531_v49 = vsel %vm467_vm7, %v435_v34, %v499_v41  ;;  %vm469_vm9 = vcmp.ge.f32.partialorder %v437_v42, 0.0  ;;  %v501_v50 = vmul.f32 0.2, %v437_v42 }
 0x157   :  { %4093 = vmatprep.mubr.f32.mxu1 %v524_v19  ;;  %v393_v51 = vrot.slane %v331_v39, %v5038_v15  ;;  %v532_v52 = vsel %vm468_vm8, %v436_v37, %v500_v44  ;;  %v502_v53 = vmul.f32 0.2, %v438_v45  ;;  %v440_v54 = vadd.f32 %v389_v47, %v5068_v63  ;;  %v144_v19 = vld [vmem:[%s6643_s5] sm:$0xff]  ;;  %v5144_v25 = vpop.permute.xlu0 %776 }
 0x158   :  { %v333_v55 = vcombine.high %v329_v31, %v329_v31  ;;  %vm470_vm10 = vcmp.ge.f32.partialorder %v438_v45, 0.0  ;;  %v533_v56 = vsel %vm469_vm9, %v437_v42, %v501_v50  ;;  %vm471_vm11 = vcmp.ge.f32.partialorder %v439_v48, 0.0  ;;  %6692 = vst [vmem:[#allocation19_spill] sm:$0xff] %v5144_v25 }
 0x159   :  { %v503_v58 = vmul.f32 0.2, %v439_v48  ;;  %v441_v59 = vadd.f32 %v389_v47, %v5063_v57  ;;  %v534_v60 = vsel %vm470_vm10, %v438_v45, %v502_v53  ;;  %v504_v61 = vmul.f32 0.2, %v440_v54 }
 0x15a   :  { %4094 = vmatmul.mubr.f32.gmra.mrb[18].mxu1 %v525_v24  ;;  %v442_v62 = vadd.f32 %v393_v51, %v5068_v63  ;;  %v397_v1 = vrot.slane %v333_v55, %v5038_v15  ;;  %vm472_vm12 = vcmp.ge.f32.partialorder %v440_v54, 0.0  ;;  %v443_v4 = vadd.f32 %v393_v51, %v5063_v57  ;;  %v5142_v24 = vpop.permute.xlu1 %787 }
 0x15b   :  { %4096 = vmatprep.mubr.f32.mxu1 %v526_v27  ;;  %v535_v2 = vsel %vm471_vm11, %v439_v48, %v503_v58  ;;  %v505_v3 = vmul.f32 0.2, %v441_v59  ;;  %v536_v5 = vsel %vm472_vm12, %v440_v54, %v504_v61  ;;  %vm473_vm13 = vcmp.ge.f32.partialorder %v441_v59, 0.0  ;;  %6691 = vst [vmem:[#allocation18_spill] sm:$0xff] %v5142_v24  ;;  %v5148_v27 = vpop.permute.xlu0 %794 }
 0x15c   :  { %v506_v6 = vmul.f32 0.2, %v442_v62  ;;  %v444_v7 = vadd.f32 %v397_v1, %v5068_v63  ;;  %vm474_vm14 = vcmp.ge.f32.partialorder %v442_v62, 0.0  ;;  %v507_v9 = vmul.f32 0.2, %v443_v4  ;;  %6694 = vst [vmem:[#allocation21_spill] sm:$0xff] %v5148_v27 }
 0x15d   :  { %v537_v8 = vsel %vm473_vm13, %v441_v59, %v505_v3  ;;  %v445_v10 = vadd.f32 %v397_v1, %v5063_v57  ;;  %vm475_vm15 = vcmp.ge.f32.partialorder %v443_v4, 0.0  ;;  %vm1504_vm2 = vcmask 1041408  }
 0x15e   :  { %4097 = vmatmul.mubr.f32.gmra.mrb[20].mxu1 %v527_v32  ;;  %v538_v11 = vsel %vm474_vm14, %v442_v62, %v506_v6  ;;  %v508_v12 = vmul.f32 0.2, %v444_v7  ;;  %vm476_vm0 = vcmp.ge.f32.partialorder %v444_v7, 0.0  ;;  %v539_v13 = vsel %vm475_vm15, %v443_v4, %v507_v9  ;;  %v5146_v26 = vpop.permute.xlu1 %798 }
 0x15f   :  { %4099 = vmatprep.mubr.f32.mxu1 %v528_v35  ;;  %v509_v14 = vmul.f32 0.2, %v445_v10  ;;  %vm477_vm1 = vcmp.ge.f32.partialorder %v445_v10, 0.0  ;;  %v4316_v21 = vpack.c.bf16 %v145_v20, %v144_v19  ;;  %vm4758_vm3 = vmmov 1   ;;  %6693 = vst [vmem:[#allocation20_spill] sm:$0xff] %v5146_v26  ;;  %v5156_v36 = vpop.permute.xlu0 %805 }
 0x160   :  { %v540_v17 = vsel %vm476_vm0, %v444_v7, %v508_v12  ;;  %vm4317_vm4 = vmpackc.low %vm1504_vm2, %vm4758_vm3  ;;  %vm975_vm5 = vcmask 80896   ;;  %6696 = vst [vmem:[#allocation23_spill] sm:$0xff] %v5156_v36  ;;  %vm1963_vm6 = vcmask 1041409   ;;  %vm1966_vm7 = vcmask 1042434  }
 0x161   :  { %v541_v18 = vsel %vm477_vm1, %v445_v10, %v509_v14  ;;  %4318 = vmatprep.subr.msk.bf16.mxu0 %vm4317_vm4, %v4316_v21  ;;  %vm1969_vm8 = vcmask 1043459   ;;  %vm1972_vm9 = vcmask 1044484   ;;  %vm1975_vm10 = vcmask 1045509  }
 0x162   :  { %4100 = vmatmul.mubr.f32.gmra.mrb[22].mxu1 %v529_v40  ;;  %4321 = vmatpush3.bf16.msk.msra.mxu0 %vm4317_vm4, %v4316_v21  ;;  %v5153_v33 = vpop.permute.xlu1 %809  ;;  %vm1978_vm11 = vcmask 1046534   ;;  %vm1981_vm12 = vcmask 1047559  }
 0x163   :  { %4102 = vmatprep.mubr.f32.mxu1 %v530_v43  ;;  %6695 = vst [vmem:[#allocation22_spill] sm:$0xff] %v5153_v33 }
 0x166   :  { %4103 = vmatmul.mubr.f32.gmra.mrb[24].mxu1 %v531_v49  ;;  %v5171_v50 = vpop.permute.xlu1 %820 }
 0x167   :  { %4105 = vmatprep.mubr.f32.mxu1 %v532_v52  ;;  %6697 = vst [vmem:[#allocation24_spill] sm:$0xff] %v5171_v50  ;;  %v5176_v52 = vpop.permute.xlu0 %816 }
 0x168   :  { %6698 = vst [vmem:[#allocation25_spill] sm:$0xff] %v5176_v52 }
 0x16a   :  { %4106 = vmatmul.mubr.f32.gmra.mrb[26].mxu1 %v533_v56  ;;  %v5190_v7 = vpop.permute.xlu1 %831 }
 0x16b   :  { %4108 = vmatprep.mubr.f32.mxu1 %v534_v60  ;;  %6699 = vst [vmem:[#allocation26_spill] sm:$0xff] %v5190_v7  ;;  %v5194_v10 = vpop.permute.xlu0 %827 }
 0x16c   :  { %6700 = vst [vmem:[#allocation27_spill] sm:$0xff] %v5194_v10 }
 0x16e   :  { %4109 = vmatmul.mubr.f32.gmra.mrb[28].mxu1 %v535_v2 }
 0x16f   :  { %4111 = vmatprep.mubr.f32.mxu1 %v536_v5 }
 0x172   :  { %4112 = vmatmul.mubr.f32.gmra.mrb[30].mxu1 %v537_v8 }
 0x173   :  { %4114 = vmatprep.mubr.f32.mxu1 %v538_v11 }
 0x176   :  { %4115 = vmatmul.mubr.f32.gmra.mrb[32].mxu1 %v539_v13 }
 0x177   :  { %4117 = vmatprep.mubr.f32.mxu1 %v540_v17 }
 0x17a   :  { %4118 = vmatmul.mubr.f32.gmra.mrb[34].mxu1 %v541_v18 }
 0x17b   :  { %2219 = vmatprep.mubr.f32.mxu1 %v6653_v0 }
 0x211   :  { %v4074_v28 = vpop.f32.mrb[4].mxu1 }
 0x212   :  { %v944_v29 = vadd.f32 %v4074_v28, %v5144_v25  ;;  %v608_v30 = vpop.f32.mrb[5].mxu1 }
 0x213   :  { %v943_v31 = vadd.f32 %v5140_v23, %v608_v30 }
 0x214   :  { %v977_v32 = vsel %vm975_vm5, %v944_v29, -inf }
 0x215   :  { %v976_v34 = vsel %vm975_vm5, %v943_v31, -inf  ;;  %v4077_v35 = vpop.f32.mrb[6].mxu1 }
 0x216   :  { %v978_v37 = vmax.f32 %v976_v34, %v977_v32  ;;  %v5159_v38 = vadd.f32 %v4077_v35, %v5142_v24  ;;  %v618_v39 = vpop.f32.mrb[7].mxu1 }
 0x217   :  { %v5162_v40 = vadd.f32 %v5138_v22, %v618_v39 }
 0x218   :  { %v979_v41 = vrot.slane %v978_v37, 4  ;;  %v986_v42 = vsel %vm975_vm5, %v5159_v38, -inf }
 0x219   :  { %v985_v43 = vsel %vm975_vm5, %v5162_v40, -inf  ;;  %v4080_v44 = vpop.f32.mrb[8].mxu1 }
 0x21a   :  { %v980_v45 = vmax.f32 %v978_v37, %v979_v41  ;;  %v987_v47 = vmax.f32 %v985_v43, %v986_v42  ;;  %v5169_v48 = vadd.f32 %v4080_v44, %v5146_v26  ;;  %v628_v49 = vpop.f32.mrb[9].mxu1 }
 0x21b   :  { %v5174_v51 = vadd.f32 %v5148_v27, %v628_v49 }
 0x21c   :  { %v981_v53 = vrot.slane %v980_v45, 2  ;;  %v988_v54 = vrot.slane %v987_v47, 4  ;;  %v995_v55 = vsel %vm975_vm5, %v5169_v48, -inf }
 0x21d   :  { %v994_v56 = vsel %vm975_vm5, %v5174_v51, -inf  ;;  %v4083_v58 = vpop.f32.mrb[10].mxu1 }
 0x21e   :  { %v982_v59 = vmax.f32 %v980_v45, %v981_v53  ;;  %v989_v60 = vmax.f32 %v987_v47, %v988_v54  ;;  %v996_v61 = vmax.f32 %v994_v56, %v995_v55  ;;  %v5183_v62 = vadd.f32 %v4083_v58, %v5153_v33  ;;  %v638_v1 = vpop.f32.mrb[11].mxu1  ;;  %v5206_v45 = vpop.permute.xlu1 %842 }
 0x21f   :  { %v5186_v2 = vadd.f32 %v5156_v36, %v638_v1  ;;  %6701 = vst [vmem:[#allocation28_spill] sm:$0xff] %v5206_v45  ;;  %v5214_v53 = vpop.permute.xlu0 %838 }
 0x220   :  { %v983_v3 = vrot.slane %v982_v59, 1  ;;  %v990_v4 = vrot.slane %v989_v60, 2  ;;  %v997_v5 = vrot.slane %v996_v61, 4  ;;  %v1004_v6 = vsel %vm975_vm5, %v5183_v62, -inf  ;;  %6702 = vst [vmem:[#allocation29_spill] sm:$0xff] %v5214_v53 }
 0x221   :  { %v1003_v8 = vsel %vm975_vm5, %v5186_v2, -inf  ;;  %v4086_v9 = vpop.f32.mrb[12].mxu1 }
 0x222   :  { %v984_v11 = vmax.f32 %v982_v59, %v983_v3  ;;  %v991_v12 = vmax.f32 %v989_v60, %v990_v4  ;;  %v998_v13 = vmax.f32 %v996_v61, %v997_v5  ;;  %v1005_v14 = vmax.f32 %v1003_v8, %v1004_v6  ;;  %v648_v17 = vpop.f32.mrb[13].mxu1 }
 0x223   :  { %v5197_v18 = vadd.f32 %v4086_v9, %v5171_v50  ;;  %v5200_v19 = vadd.f32 %v5176_v52, %v648_v17 }
 0x224   :  { %v1120_v20 = vsub.f32 %v943_v31, %v984_v11  ;;  %v1121_v21 = vsub.f32 %v944_v29, %v984_v11  ;;  %v992_v28 = vrot.slane %v991_v12, 1  ;;  %v999_v30 = vrot.slane %v998_v13, 2 }
 0x225   :  { %v1006_v32 = vrot.slane %v1005_v14, 4  ;;  %v1013_v34 = vsel %vm975_vm5, %v5197_v18, -inf  ;;  %v1012_v35 = vsel %vm975_vm5, %v5200_v19, -inf  ;;  %v4089_v37 = vpop.f32.mrb[14].mxu1 }
 0x226   :  { %v1152_v39 = vmul.f32 1.442695, %v1120_v20  ;;  %v1154_v41 = vmul.f32 1.442695, %v1121_v21  ;;  %v993_v42 = vmax.f32 %v991_v12, %v992_v28  ;;  %v1000_v43 = vmax.f32 %v998_v13, %v999_v30  ;;  %v658_v44 = vpop.f32.mrb[15].mxu1  ;;  %v5232_v30 = vpop.permute.xlu0 %849 }
 0x227   :  { %v1007_v47 = vmax.f32 %v1005_v14, %v1006_v32  ;;  %v1014_v31 = vmax.f32 %v1012_v35, %v1013_v34  ;;  %v5209_v29 = vadd.f32 %v4089_v37, %v5190_v7  ;;  %v5212_v49 = vadd.f32 %v5194_v10, %v658_v44  ;;  %v5230_v14 = vpop.permute.xlu1 %853  ;;  %6704 = vst [vmem:[#allocation31_spill] sm:$0xff] %v5232_v30 }
 0x228   :  { %4402 = vpow2.f32 %v1152_v39  ;;  %v1122_v54 = vsub.f32 %v5162_v40, %v993_v42  ;;  %v1123_v55 = vsub.f32 %v5159_v38, %v993_v42  ;;  %v1001_v56 = vrot.slane %v1000_v43, 1  ;;  %6703 = vst [vmem:[#allocation30_spill] sm:$0xff] %v5230_v14 }
 0x229   :  { %4404 = vpow2.f32 %v1154_v41  ;;  %v1008_v58 = vrot.slane %v1007_v47, 2  ;;  %v1015_v59 = vrot.slane %v1014_v31, 4  ;;  %v1022_v60 = vsel %vm975_vm5, %v5209_v29, -inf  ;;  %v4092_v61 = vpop.f32.mrb[16].mxu1 }
 0x22a   :  { %v1156_v1 = vmul.f32 1.442695, %v1122_v54  ;;  %v1158_v3 = vmul.f32 1.442695, %v1123_v55  ;;  %v1002_v4 = vmax.f32 %v1000_v43, %v1001_v56  ;;  %v1021_v5 = vsel %vm975_vm5, %v5212_v49, -inf  ;;  %v668_v6 = vpop.f32.mrb[17].mxu1 }
 0x22b   :  { %v1009_v8 = vmax.f32 %v1007_v47, %v1008_v58  ;;  %v1016_v9 = vmax.f32 %v1014_v31, %v1015_v59  ;;  %v1023_v40 = vmax.f32 %v1021_v5, %v1022_v60  ;;  %v5223_v38 = vadd.f32 %v4092_v61, %v5206_v45 }
 0x22c   :  { %4406 = vpow2.f32 %v1156_v1  ;;  %v1124_v11 = vsub.f32 %v5174_v51, %v1002_v4  ;;  %v1125_v12 = vsub.f32 %v5169_v48, %v1002_v4  ;;  %v5228_v13 = vadd.f32 %v5214_v53, %v668_v6  ;;  %v5252_v1 = vpop.permute.xlu1 %864 }
 0x22d   :  { %4408 = vpow2.f32 %v1158_v3  ;;  %v1010_v17 = vrot.slane %v1009_v8, 1  ;;  %v1017_v20 = vrot.slane %v1016_v9, 2  ;;  %v1024_v21 = vrot.slane %v1023_v40, 4  ;;  %v4095_v28 = vpop.f32.mrb[18].mxu1  ;;  %6705 = vst [vmem:[#allocation32_spill] sm:$0xff] %v5252_v1 }
 0x22e   :  { %v1160_v32 = vmul.f32 1.442695, %v1124_v11  ;;  %v1162_v34 = vmul.f32 1.442695, %v1125_v12  ;;  %v1031_v35 = vsel %vm975_vm5, %v5223_v38, -inf  ;;  %v1030_v48 = vsel %vm975_vm5, %v5228_v13, -inf }
 0x22f   :  { %v1011_v51 = vmax.f32 %v1009_v8, %v1010_v17  ;;  %v1018_v37 = vmax.f32 %v1016_v9, %v1017_v20  ;;  %v1025_v39 = vmax.f32 %v1023_v40, %v1024_v21  ;;  %v1032_v41 = vmax.f32 %v1030_v48, %v1031_v35  ;;  %v678_v42 = vpop.f32.mrb[19].mxu1  ;;  %v5264_v21 = vpop.permute.xlu0 %860 }
 0x230   :  { %4410 = vpow2.f32 %v1160_v32  ;;  %v5239_v43 = vadd.f32 %v4095_v28, %v5230_v14  ;;  %v5242_v44 = vadd.f32 %v5232_v30, %v678_v42  ;;  %6706 = vst [vmem:[#allocation33_spill] sm:$0xff] %v5264_v21 }
 0x231   :  { %4412 = vpow2.f32 %v1162_v34  ;;  %v1126_v47 = vsub.f32 %v5186_v2, %v1011_v51  ;;  %v1127_v31 = vsub.f32 %v5183_v62, %v1011_v51  ;;  %v1019_v54 = vrot.slane %v1018_v37, 1  ;;  %v4098_v55 = vpop.f32.mrb[20].mxu1 }
 0x232   :  { %v5246_v56 = vpop.eup %4402  ;;  %v1026_v58 = vrot.slane %v1025_v39, 2  ;;  %v1033_v59 = vrot.slane %v1032_v41, 4  ;;  %v1040_v60 = vsel %vm975_vm5, %v5239_v43, -inf  ;;  %v1039_v61 = vsel %vm975_vm5, %v5242_v44, -inf  ;;  %v688_v3 = vpop.f32.mrb[21].mxu1 }
 0x233   :  { %v5254_v4 = vpop.eup %4404  ;;  %v1216_v62 = vsel %vm975_vm5, %v5246_v56, 0.0  ;;  %v1164_v2 = vmul.f32 1.442695, %v1126_v47  ;;  %v1166_v5 = vmul.f32 1.442695, %v1127_v31  ;;  %v1020_v6 = vmax.f32 %v1018_v37, %v1019_v54 }
 0x234   :  { %v1217_v8 = vsel %vm975_vm5, %v5254_v4, 0.0  ;;  %v1027_v9 = vmax.f32 %v1025_v39, %v1026_v58  ;;  %v1034_v40 = vmax.f32 %v1032_v41, %v1033_v59  ;;  %v1041_v11 = vmax.f32 %v1039_v61, %v1040_v60  ;;  %v5279_v58 = vpop.permute.xlu1 %875 }
 0x235   :  { %v5260_v12 = vadd.f32 %v1217_v8, %v1216_v62  ;;  %4414 = vpow2.f32 %v1164_v2  ;;  %v1128_v17 = vsub.f32 %v5200_v19, %v1020_v6  ;;  %v1129_v20 = vsub.f32 %v5197_v18, %v1020_v6  ;;  %v5266_v28 = vpop.f32.mrb[22].mxu1  ;;  %6707 = vst [vmem:[#allocation34_spill] sm:$0xff] %v5279_v58 }
 0x236   :  { %v5268_v32 = vpop.eup %4406  ;;  %4416 = vpow2.f32 %v1166_v5  ;;  %v1028_v34 = vrot.slane %v1027_v9, 1  ;;  %v1035_v35 = vrot.slane %v1034_v40, 2  ;;  %v1042_v48 = vrot.slane %v1041_v11, 4  ;;  %v5270_v51 = vpop.f32.mrb[23].mxu1 }
 0x237   :  { %v5272_v37 = vpop.eup %4408  ;;  %v1225_v19 = vsel %vm975_vm5, %v5268_v32, 0.0  ;;  %v1168_v18 = vmul.f32 1.442695, %v1128_v17  ;;  %v1170_v41 = vmul.f32 1.442695, %v1129_v20  ;;  %v5282_v60 = vadd.f32 %v4098_v55, %v5252_v1  ;;  %v5301_v20 = vpop.permute.xlu0 %871 }
 0x238   :  { %v1226_v42 = vsel %vm975_vm5, %v5272_v37, 0.0  ;;  %v1029_v47 = vmax.f32 %v1027_v9, %v1028_v34  ;;  %v1036_v31 = vmax.f32 %v1034_v40, %v1035_v35  ;;  %v1043_v54 = vmax.f32 %v1041_v11, %v1042_v48  ;;  %6708 = vst [vmem:[#allocation35_spill] sm:$0xff] %v5301_v20 }
 0x239   :  { %v1227_v59 = vadd.f32 %v1226_v42, %v1225_v19  ;;  %4418 = vpow2.f32 %v1168_v18  ;;  %v5285_v61 = vadd.f32 %v5264_v21, %v688_v3  ;;  %v5287_v62 = vpop.f32.mrb[24].mxu1  ;;  %v1049_v17 = vsel %vm975_vm5, %v5282_v60, -inf  ;;  %v5309_v21 = vpop.permute.xlu1 %886 }
 0x23a   :  { %v5289_v2 = vpop.eup %4410  ;;  %4420 = vpow2.f32 %v1170_v41  ;;  %v1130_v5 = vsub.f32 %v5212_v49, %v1029_v47  ;;  %v1131_v6 = vsub.f32 %v5209_v29, %v1029_v47  ;;  %v1037_v8 = vrot.slane %v1036_v31, 1  ;;  %v5293_v9 = vpop.f32.mrb[25].mxu1  ;;  %6709 = vst [vmem:[#allocation36_spill] sm:$0xff] %v5309_v21 }
 0x23b   :  { %v5295_v40 = vpop.eup %4412  ;;  %v1228_v11 = vrot.slane %v1227_v59, 4  ;;  %v1234_v55 = vsel %vm975_vm5, %v5289_v2, 0.0  ;;  %v1044_v3 = vrot.slane %v1043_v54, 2  ;;  %v1048_v41 = vsel %vm975_vm5, %v5285_v61, -inf }
 0x23c   :  { %v1235_v49 = vsel %vm975_vm5, %v5295_v40, 0.0  ;;  %v1172_v34 = vmul.f32 1.442695, %v1130_v5  ;;  %v1174_v29 = vmul.f32 1.442695, %v1131_v6  ;;  %v1038_v35 = vmax.f32 %v1036_v31, %v1037_v8 }
 0x23d   :  { %v1229_v48 = vadd.f32 %v1228_v11, %v1227_v59  ;;  %v1236_v19 = vadd.f32 %v1235_v49, %v1234_v55  ;;  %v1045_v18 = vmax.f32 %v1043_v54, %v1044_v3  ;;  %v4107_v42 = vpop.f32.mrb[26].mxu1  ;;  %v1050_v39 = vmax.f32 %v1048_v41, %v1049_v17 }
 0x23e   :  { %4422 = vpow2.f32 %v1172_v34  ;;  %v1132_v47 = vsub.f32 %v5228_v13, %v1038_v35  ;;  %v1133_v0 = vsub.f32 %v5223_v38, %v1038_v35  ;;  %v5311_v1 = vpop.f32.mrb[27].mxu1  ;;  %v5323_v34 = vpop.permute.xlu0 %882  ;;  %v5329_v30 = vadd.f32 %v5266_v28, %v5279_v58 }
 0x23f   :  { %v5313_v5 = vpop.eup %4414  ;;  %v1230_v31 = vrot.slane %v1229_v48, 2  ;;  %v1237_v59 = vrot.slane %v1236_v19, 4  ;;  %4424 = vpow2.f32 %v1174_v29  ;;  %v1046_v54 = vrot.slane %v1045_v18, 1  ;;  %6710 = vst [vmem:[#allocation37_spill] sm:$0xff] %v5323_v34 }
 0x240   :  { %v5315_v6 = vpop.eup %4416  ;;  %v1243_v8 = vsel %vm975_vm5, %v5313_v5, 0.0  ;;  %v1176_v11 = vmul.f32 1.442695, %v1132_v47  ;;  %v1178_v13 = vmul.f32 1.442695, %v1133_v0  ;;  %v1051_v55 = vrot.slane %v1050_v39, 4 }
 0x241   :  { %v5319_v38 = vadd.f32 %v1230_v31, %v1229_v48  ;;  %v1238_v3 = vadd.f32 %v1237_v59, %v1236_v19  ;;  %v1244_v17 = vsel %vm975_vm5, %v5315_v6, 0.0  ;;  %v1047_v49 = vmax.f32 %v1045_v18, %v1046_v54  ;;  %v5325_v35 = vpop.f32.mrb[28].mxu1 }
 0x242   :  { %v1245_v29 = vadd.f32 %v1244_v17, %v1243_v8  ;;  %4426 = vpow2.f32 %v1176_v11  ;;  %v1052_v41 = vmax.f32 %v1050_v39, %v1051_v55  ;;  %v5331_v0 = vpop.f32.mrb[29].mxu1  ;;  %v1058_v28 = vsel %vm975_vm5, %v5329_v30, -inf  ;;  %v5343_v8 = vpop.permute.xlu1 %897 }
 0x243   :  { %v5333_v48 = vpop.eup %4418  ;;  %v1239_v19 = vrot.slane %v1238_v3, 2  ;;  %4428 = vpow2.f32 %v1178_v13  ;;  %v1134_v47 = vsub.f32 %v5242_v44, %v1047_v49  ;;  %v1135_v18 = vsub.f32 %v5239_v43, %v1047_v49  ;;  %6711 = vst [vmem:[#allocation38_spill] sm:$0xff] %v5343_v8 }
 0x244   :  { %v5337_v31 = vpop.eup %4420  ;;  %v1246_v59 = vrot.slane %v1245_v29, 4  ;;  %v1252_v39 = vsel %vm975_vm5, %v5333_v48, 0.0  ;;  %v1053_v54 = vrot.slane %v1052_v41, 2  ;;  %v5353_v14 = vadd.f32 %v5301_v20, %v5270_v51 }
 0x245   :  { %v5345_v11 = vadd.f32 %v1239_v19, %v1238_v3  ;;  %v1253_v13 = vsel %vm975_vm5, %v5337_v31, 0.0  ;;  %v1180_v44 = vmul.f32 1.442695, %v1134_v47  ;;  %v1182_v55 = vmul.f32 1.442695, %v1135_v18  ;;  %v5349_v43 = vpop.f32.mrb[30].mxu1 }
 0x246   :  { %v1247_v17 = vadd.f32 %v1246_v59, %v1245_v29  ;;  %v1254_v49 = vadd.f32 %v1253_v13, %v1252_v39  ;;  %v1054_v58 = vmax.f32 %v1052_v41, %v1053_v54  ;;  %v5355_v53 = vpop.f32.mrb[31].mxu1  ;;  %v5359_v3 = vadd.f32 %v5287_v62, %v5309_v21  ;;  %v5368_v29 = vpop.permute.xlu0 %893 }
 0x247   :  { %4430 = vpow2.f32 %v1180_v44  ;;  %v5363_v19 = vadd.f32 %v5323_v34, %v5293_v9  ;;  %v5366_v47 = vadd.f32 %v4107_v42, %v5343_v8  ;;  %6712 = vst [vmem:[#allocation39_spill] sm:$0xff] %v5368_v29  ;;  %v1057_v9 = vsel %vm975_vm5, %v5353_v14, -inf }
 0x248   :  { %v5370_v41 = vpop.eup %4422  ;;  %v1248_v51 = vrot.slane %v1247_v17, 2  ;;  %v1255_v18 = vrot.slane %v1254_v49, 4  ;;  %4432 = vpow2.f32 %v1182_v55  ;;  %v1055_v59 = vrot.slane %v1054_v58, 1 }
 0x249   :  { %v5372_v39 = vpop.eup %4424  ;;  %v1261_v62 = vsel %vm975_vm5, %v5370_v41, 0.0  ;;  %v1067_v42 = vsel %vm975_vm5, %v5359_v3, -inf  ;;  %v1066_v54 = vsel %vm975_vm5, %v5363_v19, -inf  ;;  %v5382_v13 = vpop.f32.mrb[32].mxu1  ;;  %v1059_v45 = vmax.f32 %v1057_v9, %v1058_v28 }
 0x24a   :  { %v5384_v44 = vadd.f32 %v1248_v51, %v1247_v17  ;;  %v1256_v55 = vadd.f32 %v1255_v18, %v1254_v49  ;;  %v1262_v8 = vsel %vm975_vm5, %v5372_v39, 0.0  ;;  %v1056_v34 = vmax.f32 %v1054_v58, %v1055_v59  ;;  %v5388_v21 = vpop.f32.mrb[33].mxu1  ;;  %v5400_v58 = vpop.permute.xlu1 %908 }
 0x24b   :  { %v1263_v20 = vadd.f32 %v1262_v8, %v1261_v62  ;;  %v1068_v10 = vmax.f32 %v1066_v54, %v1067_v42  ;;  %v1076_v7 = vsel %vm975_vm5, %v5366_v47, -inf  ;;  %v5398_v49 = vadd.f32 %v5368_v29, %v5311_v1  ;;  %6713 = vst [vmem:[#allocation40_spill] sm:$0xff] %v5400_v58  ;;  %v5406_v62 = vpop.permute.xlu0 %904 }
 0x24c   :  { %v5392_v52 = vpop.eup %4426  ;;  %v1257_v50 = vrot.slane %v1256_v55, 2  ;;  %v1136_v36 = vsub.f32 %v5285_v61, %v1056_v34  ;;  %v1137_v17 = vsub.f32 %v5282_v60, %v1056_v34  ;;  %v1060_v18 = vrot.slane %v1059_v45, 4  ;;  %6714 = vst [vmem:[#allocation41_spill] sm:$0xff] %v5406_v62 }
 0x24d   :  { %v5402_v51 = vpop.eup %4428  ;;  %v1264_v28 = vrot.slane %v1263_v20, 4  ;;  %v1270_v8 = vsel %vm975_vm5, %v5392_v52, 0.0  ;;  %v1069_v59 = vrot.slane %v1068_v10, 4  ;;  %v5408_v9 = vpop.f32.mrb[34].mxu1  ;;  %v1075_v26 = vsel %vm975_vm5, %v5398_v49, -inf }
 0x24e   :  { %v5410_v61 = vadd.f32 %v1257_v50, %v1256_v55  ;;  %v1271_v1 = vsel %vm975_vm5, %v5402_v51, 0.0  ;;  %v1184_v60 = vmul.f32 1.442695, %v1136_v36  ;;  %v1186_v34 = vmul.f32 1.442695, %v1137_v17  ;;  %v5414_v42 = vpop.f32.mrb[35].mxu1 }
 0x24f   :  { %v1265_v54 = vadd.f32 %v1264_v28, %v1263_v20  ;;  %v1272_v29 = vadd.f32 %v1271_v1, %v1270_v8  ;;  %v1061_v33 = vmax.f32 %v1059_v45, %v1060_v18  ;;  %v1070_v27 = vmax.f32 %v1068_v10, %v1069_v59  ;;  %v5434_v18 = vpop.permute.xlu1 %919 }
 0x250   :  { %4434 = vpow2.f32 %v1184_v60  ;;  %v5420_v22 = vadd.f32 %v5325_v35, %v5400_v58  ;;  %v5424_v50 = vadd.f32 %v5406_v62, %v5331_v0  ;;  %v1077_v8 = vmax.f32 %v1075_v26, %v1076_v7  ;;  %6715 = vst [vmem:[#allocation42_spill] sm:$0xff] %v5434_v18 }
 0x251   :  { %v5426_v36 = vpop.eup %4430  ;;  %v1266_v55 = vrot.slane %v1265_v54, 2  ;;  %v1273_v17 = vrot.slane %v1272_v29, 4  ;;  %4436 = vpow2.f32 %v1186_v34  ;;  %v1062_v20 = vrot.slane %v1061_v33, 2  ;;  %v5440_v34 = vpop.permute.xlu0 %915 }
 0x252   :  { %v5428_v45 = vpop.eup %4432  ;;  %v1279_v10 = vsel %vm975_vm5, %v5426_v36, 0.0  ;;  %v1071_v28 = vrot.slane %v1070_v27, 2  ;;  %v1085_v35 = vsel %vm975_vm5, %v5420_v22, -inf  ;;  %6716 = vst [vmem:[#allocation43_spill] sm:$0xff] %v5440_v34  ;;  %v1078_v24 = vrot.slane %v1077_v8, 4 }
 0x253   :  { %v5436_v0 = vadd.f32 %v1266_v55, %v1265_v54  ;;  %v1274_v59 = vadd.f32 %v1273_v17, %v1272_v29  ;;  %v1280_v1 = vsel %vm975_vm5, %v5428_v45, 0.0  ;;  %v1063_v60 = vmax.f32 %v1061_v33, %v1062_v20 }
 0x254   :  { %v1281_v62 = vadd.f32 %v1280_v1, %v1279_v10  ;;  %v1072_v58 = vmax.f32 %v1070_v27, %v1071_v28  ;;  %v1084_v26 = vsel %vm975_vm5, %v5424_v50, -inf  ;;  %v5446_v54 = vadd.f32 %v5349_v43, %v5434_v18 }
 0x255   :  { %v1275_v7 = vrot.slane %v1274_v59, 2  ;;  %v1064_v23 = vrot.slane %v1063_v60, 1  ;;  %v1086_v25 = vmax.f32 %v1084_v26, %v1085_v35  ;;  %v1079_v17 = vmax.f32 %v1077_v8, %v1078_v24 }
 0x256   :  { %v1282_v29 = vrot.slane %v1281_v62, 4  ;;  %v1073_v55 = vrot.slane %v1072_v58, 1  ;;  %v5450_v33 = vadd.f32 %v5440_v34, %v5355_v53  ;;  %v1094_v28 = vsel %vm975_vm5, %v5446_v54, -inf  ;;  %v5460_v34 = vpop.permute.xlu1 %930 }
 0x257   :  { %v5452_v20 = vadd.f32 %v1275_v7, %v1274_v59  ;;  %v1065_v27 = vmax.f32 %v1063_v60, %v1064_v23  ;;  %v1087_v10 = vrot.slane %v1086_v25, 4  ;;  %v1080_v26 = vrot.slane %v1079_v17, 2  ;;  %6717 = vst [vmem:[#allocation44_spill] sm:$0xff] %v5460_v34  ;;  %v5462_v59 = vpop.permute.xlu0 %926 }
 0x258   :  { %v1283_v1 = vadd.f32 %v1282_v29, %v1281_v62  ;;  %v1074_v35 = vmax.f32 %v1072_v58, %v1073_v55  ;;  %v1093_v43 = vsel %vm975_vm5, %v5450_v33, -inf  ;;  %6718 = vst [vmem:[#allocation45_spill] sm:$0xff] %v5462_v59 }
 0x259   :  { %v1138_v18 = vsub.f32 %v5353_v14, %v1065_v27  ;;  %v1139_v24 = vsub.f32 %v5329_v30, %v1065_v27  ;;  %v1088_v8 = vmax.f32 %v1086_v25, %v1087_v10  ;;  %v1095_v53 = vmax.f32 %v1093_v43, %v1094_v28 }
 0x25a   :  { %v5464_v23 = vpop.eup %4434  ;;  %v1284_v60 = vrot.slane %v1283_v1, 2  ;;  %v1140_v62 = vsub.f32 %v5363_v19, %v1074_v35  ;;  %v1141_v58 = vsub.f32 %v5359_v3, %v1074_v35  ;;  %v1081_v7 = vmax.f32 %v1079_v17, %v1080_v26 }
 0x25b   :  { %v5468_v29 = vpop.eup %4436  ;;  %v1288_v14 = vsel %vm975_vm5, %v5464_v23, 0.0  ;;  %v1188_v30 = vmul.f32 1.442695, %v1138_v18  ;;  %v1190_v25 = vmul.f32 1.442695, %v1139_v24  ;;  %v1089_v55 = vrot.slane %v1088_v8, 2 }
 0x25c   :  { %v5472_v27 = vadd.f32 %v1284_v60, %v1283_v1  ;;  %v1289_v10 = vsel %vm975_vm5, %v5468_v29, 0.0  ;;  %v1192_v28 = vmul.f32 1.442695, %v1140_v62  ;;  %v1194_v43 = vmul.f32 1.442695, %v1141_v58  ;;  %v5484_v60 = vpop.permute.xlu1 %941  ;;  %v5486_v62 = vpop.permute.xlu0 %937 }
 0x25d   :  { %v1290_v15 = vadd.f32 %v1289_v10, %v1288_v14  ;;  %4438 = vpow2.f32 %v1188_v30  ;;  %v1082_v19 = vrot.slane %v1081_v7, 1  ;;  %v1090_v3 = vmax.f32 %v1088_v8, %v1089_v55  ;;  %6719 = vst [vmem:[#allocation46_spill] sm:$0xff] %v5484_v60  ;;  %6720 = vst [vmem:[#allocation47_spill] sm:$0xff] %v5486_v62 }
 0x25e   :  { %4440 = vpow2.f32 %v1190_v25  ;;  %v1096_v17 = vrot.slane %v1095_v53, 4  ;;  %v5478_v35 = vadd.f32 %v5382_v13, %v5460_v34  ;;  %v5482_v18 = vadd.f32 %v5462_v59, %v5388_v21 }
 0x25f   :  { %v1291_v1 = vrot.slane %v1290_v15, 4  ;;  %4442 = vpow2.f32 %v1192_v28  ;;  %v1083_v26 = vmax.f32 %v1081_v7, %v1082_v19  ;;  %v1091_v24 = vrot.slane %v1090_v3, 1 }
 0x260   :  { %4444 = vpow2.f32 %v1194_v43  ;;  %v1097_v8 = vmax.f32 %v1095_v53, %v1096_v17  ;;  %v1103_v58 = vsel %vm975_vm5, %v5478_v35, -inf  ;;  %v1102_v13 = vsel %vm975_vm5, %v5482_v18, -inf }
 0x261   :  { %v1292_v14 = vadd.f32 %v1291_v1, %v1290_v15  ;;  %v1142_v21 = vsub.f32 %v5398_v49, %v1083_v26  ;;  %v1143_v30 = vsub.f32 %v5366_v47, %v1083_v26  ;;  %v1092_v25 = vmax.f32 %v1090_v3, %v1091_v24 }
 0x262   :  { %v1098_v7 = vrot.slane %v1097_v8, 2  ;;  %v1104_v55 = vmax.f32 %v1102_v13, %v1103_v58  ;;  %v5496_v10 = vadd.f32 %v5408_v9, %v5484_v60  ;;  %v5500_v53 = vadd.f32 %v5486_v62, %v5414_v42 }
 0x263   :  { %v1293_v28 = vrot.slane %v1292_v14, 2  ;;  %v1196_v43 = vmul.f32 1.442695, %v1142_v21  ;;  %v1198_v19 = vmul.f32 1.442695, %v1143_v30  ;;  %v1144_v15 = vsub.f32 %v5424_v50, %v1092_v25 }
 0x264   :  { %v1145_v49 = vsub.f32 %v5420_v22, %v1092_v25  ;;  %v1099_v17 = vmax.f32 %v1097_v8, %v1098_v7  ;;  %v1105_v47 = vrot.slane %v1104_v55, 4  ;;  %v1112_v3 = vsel %vm975_vm5, %v5496_v10, -inf }
 0x265   :  { %v5506_v1 = vadd.f32 %v1293_v28, %v1292_v14  ;;  %4446 = vpow2.f32 %v1196_v43  ;;  %v1200_v9 = vmul.f32 1.442695, %v1144_v15  ;;  %v1111_v42 = vsel %vm975_vm5, %v5500_v53, -inf }
 0x266   :  { %4448 = vpow2.f32 %v1198_v19  ;;  %v1202_v26 = vmul.f32 1.442695, %v1145_v49  ;;  %v1100_v24 = vrot.slane %v1099_v17, 1  ;;  %v1106_v58 = vmax.f32 %v1104_v55, %v1105_v47 }
 0x267   :  { %v5510_v13 = vpop.eup %4438  ;;  %4450 = vpow2.f32 %v1200_v9  ;;  %v1113_v22 = vmax.f32 %v1111_v42, %v1112_v3  ;;  %v6721_v50 = vrot.slane %v5260_v12, 4  ;;  %v1232_v14 = vrot.slane %v5319_v38, 1 }
 0x268   :  { %v5516_v21 = vpop.eup %4440  ;;  %v1297_v30 = vsel %vm975_vm5, %v5510_v13, 0.0  ;;  %4452 = vpow2.f32 %v1202_v26  ;;  %v1101_v25 = vmax.f32 %v1099_v17, %v1100_v24  ;;  %v1107_v7 = vrot.slane %v1106_v58, 2 }
 0x269   :  { %v1220_v8 = vadd.f32 %v6721_v50, %v5260_v12  ;;  %v5520_v28 = vpop.eup %4442  ;;  %v1298_v55 = vsel %vm975_vm5, %v5516_v21, 0.0  ;;  %v1114_v43 = vrot.slane %v1113_v22, 4  ;;  %v1233_v15 = vadd.f32 %v1232_v14, %v5319_v38 }
 0x26a   :  { %v5525_v12 = vpop.eup %4444  ;;  %v1299_v49 = vadd.f32 %v1298_v55, %v1297_v30  ;;  %v1306_v47 = vsel %vm975_vm5, %v5520_v28, 0.0  ;;  %v1146_v3 = vsub.f32 %v5450_v33, %v1101_v25  ;;  %v1147_v17 = vsub.f32 %v5446_v54, %v1101_v25 }
 0x26b   :  { %v1221_v19 = vrot.slane %v1220_v8, 2  ;;  %v1307_v9 = vsel %vm975_vm5, %v5525_v12, 0.0  ;;  %v1108_v42 = vmax.f32 %v1106_v58, %v1107_v7  ;;  %v1115_v26 = vmax.f32 %v1113_v22, %v1114_v43 }
 0x26c   :  { %v1300_v50 = vrot.slane %v1299_v49, 4  ;;  %v1308_v62 = vadd.f32 %v1307_v9, %v1306_v47  ;;  %v1204_v60 = vmul.f32 1.442695, %v1146_v3  ;;  %v1206_v38 = vmul.f32 1.442695, %v1147_v17 }
 0x26d   :  { %v1222_v24 = vadd.f32 %v1221_v19, %v1220_v8  ;;  %v1109_v14 = vrot.slane %v1108_v42, 1  ;;  %v1116_v59 = vrot.slane %v1115_v26, 2  ;;  %4454 = vrcp.f32 %v1233_v15 }
 0x26e   :  { %v1301_v55 = vadd.f32 %v1300_v50, %v1299_v49  ;;  %v1309_v34 = vrot.slane %v1308_v62, 4  ;;  %4456 = vpow2.f32 %v1204_v60  ;;  %v1241_v33 = vrot.slane %v5345_v11, 1 }
 0x26f   :  { %v1223_v30 = vrot.slane %v1222_v24, 1  ;;  %v5534_v54 = vpop.eup %4446  ;;  %4458 = vpow2.f32 %v1206_v38  ;;  %v1110_v25 = vmax.f32 %v1108_v42, %v1109_v14  ;;  %v1117_v58 = vmax.f32 %v1115_v26, %v1116_v59 }
 0x270   :  { %v5536_v8 = vpop.eup %4448  ;;  %v1302_v7 = vrot.slane %v1301_v55, 2  ;;  %v1310_v43 = vadd.f32 %v1309_v34, %v1308_v62  ;;  %v1315_v19 = vsel %vm975_vm5, %v5534_v54, 0.0  ;;  %v1242_v15 = vadd.f32 %v1241_v33, %v5345_v11 }
 0x271   :  { %v1224_v22 = vadd.f32 %v1223_v30, %v1222_v24  ;;  %v5541_v49 = vpop.eup %4450  ;;  %v1316_v60 = vsel %vm975_vm5, %v5536_v8, 0.0  ;;  %v1148_v47 = vsub.f32 %v5482_v18, %v1110_v25  ;;  %v1149_v3 = vsub.f32 %v5478_v35, %v1110_v25 }
 0x272   :  { %v1118_v59 = vrot.slane %v1117_v58, 1  ;;  %v5547_v17 = vpop.eup %4452  ;;  %v5549_v9 = vadd.f32 %v1302_v7, %v1301_v55  ;;  %v1311_v34 = vrot.slane %v1310_v43, 2  ;;  %v1317_v62 = vadd.f32 %v1316_v60, %v1315_v19 }
 0x273   :  { %v1324_v42 = vsel %vm975_vm5, %v5541_v49, 0.0  ;;  %v1325_v11 = vsel %vm975_vm5, %v5547_v17, 0.0  ;;  %v1208_v26 = vmul.f32 1.442695, %v1148_v47  ;;  %v1210_v24 = vmul.f32 1.442695, %v1149_v3 }
 0x274   :  { %v1119_v50 = vmax.f32 %v1117_v58, %v1118_v59  ;;  %v1312_v38 = vadd.f32 %v1311_v34, %v1310_v43  ;;  %v1318_v18 = vrot.slane %v1317_v62, 4  ;;  %v1326_v14 = vadd.f32 %v1325_v11, %v1324_v42 }
 0x275   :  { %4460 = vrcp.f32 %v1224_v22  ;;  %v1250_v55 = vrot.slane %v5384_v44, 1  ;;  %v1259_v7 = vrot.slane %v5410_v61, 1 }
 0x276   :  { %4462 = vpow2.f32 %v1208_v26  ;;  %v1150_v35 = vsub.f32 %v5500_v53, %v1119_v50  ;;  %v1151_v30 = vsub.f32 %v5496_v10, %v1119_v50  ;;  %v1319_v33 = vadd.f32 %v1318_v18, %v1317_v62 }
 0x277   :  { %v1327_v25 = vrot.slane %v1326_v14, 4  ;;  %4464 = vpow2.f32 %v1210_v24  ;;  %v4455_v19 = vpop.eup %4454  ;;  %v1251_v58 = vadd.f32 %v1250_v55, %v5384_v44  ;;  %v1260_v62 = vadd.f32 %v1259_v7, %v5410_v61 }
 0x278   :  { %v1212_v60 = vmul.f32 1.442695, %v1150_v35  ;;  %v1214_v47 = vmul.f32 1.442695, %v1151_v30  ;;  %4466 = vrcp.f32 %v1242_v15  ;;  %v5560_v43 = vpop.eup %4456  ;;  %v1320_v22 = vrot.slane %v1319_v33, 2 }
 0x279   :  { %v1328_v3 = vadd.f32 %v1327_v25, %v1326_v14  ;;  %v1378_v53 = vmul.f32 %v4455_v19, %v5268_v32  ;;  %v5564_v10 = vmul.f32 %v4455_v19, %v5272_v37  ;;  %v5566_v59 = vpop.eup %4458  ;;  %v1333_v34 = vsel %vm975_vm5, %v5560_v43, 0.0 }
 0x27a   :  { %4468 = vpow2.f32 %v1212_v60  ;;  %v1268_v15 = vrot.slane %v5436_v0, 1  ;;  %v1321_v44 = vadd.f32 %v1320_v22, %v1319_v33  ;;  %v1334_v11 = vsel %vm975_vm5, %v5566_v59, 0.0 }
 0x27b   :  { %v1329_v42 = vrot.slane %v1328_v3, 2  ;;  %4470 = vpow2.f32 %v1214_v47  ;;  %v1335_v32 = vadd.f32 %v1334_v11, %v1333_v34  ;;  %v1277_v26 = vrot.slane %v5452_v20, 1 }
 0x27c   :  { %4472 = vrcp.f32 %v1251_v58  ;;  %v1269_v37 = vadd.f32 %v1268_v15, %v5436_v0  ;;  %v1286_v50 = vrot.slane %v5472_v27, 1  ;;  %v1295_v61 = vrot.slane %v5506_v1, 1 }
 0x27d   :  { %v1330_v24 = vadd.f32 %v1329_v42, %v1328_v3  ;;  %4474 = vrcp.f32 %v1260_v62  ;;  %v1336_v18 = vrot.slane %v1335_v32, 4  ;;  %v1278_v14 = vadd.f32 %v1277_v26, %v5452_v20 }
 0x27e   :  { %4476 = vrcp.f32 %v1269_v37  ;;  %v1304_v35 = vrot.slane %v5549_v9, 1  ;;  %v1287_v55 = vadd.f32 %v1286_v50, %v5472_v27  ;;  %v1296_v33 = vadd.f32 %v1295_v61, %v5506_v1 }
 0x27f   :  { %v4461_v30 = vpop.eup %4460  ;;  %v1313_v0 = vrot.slane %v1312_v38, 1  ;;  %v1322_v25 = vrot.slane %v1321_v44, 1  ;;  %v1337_v19 = vadd.f32 %v1336_v18, %v1335_v32  ;;  %4478 = vrcp.f32 %v1278_v14 }
 0x280   :  { %v5582_v7 = vpop.eup %4462  ;;  %v1376_v60 = vmul.f32 %v4461_v30, %v5246_v56  ;;  %v1377_v47 = vmul.f32 %v4461_v30, %v5254_v4  ;;  %4480 = vrcp.f32 %v1287_v55  ;;  %v1305_v27 = vadd.f32 %v1304_v35, %v5549_v9 }
 0x281   :  { %v5586_v58 = vpop.eup %4464  ;;  %v1342_v20 = vsel %vm975_vm5, %v5582_v7, 0.0  ;;  %v1314_v22 = vadd.f32 %v1313_v0, %v1312_v38  ;;  %v1338_v3 = vrot.slane %v1337_v19, 2  ;;  %4482 = vrcp.f32 %v1296_v33 }
 0x282   :  { %v4467_v1 = vpop.eup %4466  ;;  %v1343_v34 = vsel %vm975_vm5, %v5586_v58, 0.0  ;;  %4124 = vmatprep.mubr.msk.f32.mxu0 %vm975_vm5, %v1376_v60  ;;  %v1323_v56 = vadd.f32 %v1322_v25, %v1321_v44  ;;  %4484 = vrcp.f32 %v1305_v27  ;;  %v1331_v38 = vrot.slane %v1330_v24, 1 }
 0x283   :  { %v1344_v4 = vadd.f32 %v1343_v34, %v1342_v20  ;;  %4125 = vmatmul.mubr.msk.f32.vlgmr.msra.gmra.mrb[0].mxu0 %vm975_vm5, %v1377_v47  ;;  %v1380_v62 = vmul.f32 %v4467_v1, %v5289_v2  ;;  %v1381_v15 = vmul.f32 %v4467_v1, %v5295_v40  ;;  %v1339_v9 = vadd.f32 %v1338_v3, %v1337_v19 }
 0x284   :  { %v5597_v42 = vpop.eup %4468  ;;  %4127 = vmatprep.mubr.msk.f32.mxu0 %vm975_vm5, %v1378_v53  ;;  %4486 = vrcp.f32 %v1314_v22  ;;  %v1332_v40 = vadd.f32 %v1331_v38, %v1330_v24 }
 0x285   :  { %v5600_v11 = vpop.eup %4470  ;;  %v1345_v32 = vrot.slane %v1344_v4, 4  ;;  %v1351_v44 = vsel %vm975_vm5, %v5597_v42, 0.0  ;;  %4488 = vrcp.f32 %v1323_v56  ;;  %v1340_v26 = vrot.slane %v1339_v9, 1 }
 0x286   :  { %v4473_v37 = vpop.eup %4472  ;;  %v1352_v2 = vsel %vm975_vm5, %v5600_v11, 0.0  ;;  %4490 = vrcp.f32 %v1332_v40  ;;  %v2056_v40 = vld [vmem:[#allocation7 + $0x38] sm:$0xff] }
 0x287   :  { %v4475_v50 = vpop.eup %4474  ;;  %v1346_v61 = vadd.f32 %v1345_v32, %v1344_v4  ;;  %v1353_v18 = vadd.f32 %v1352_v2, %v1351_v44  ;;  %4128 = vmatmul.mubr.msk.f32.gmra.mrb[2].mxu0 %vm975_vm5, %v5564_v10  ;;  %v1382_v53 = vmul.f32 %v4473_v37, %v5313_v5  ;;  %v1383_v14 = vmul.f32 %v4473_v37, %v5315_v6  ;;  %v2051_v44 = vld [vmem:[#allocation7 + $0x10] sm:$0xff]  ;;  %v2054_v2 = vld [vmem:[#allocation7 + $0x28] sm:$0xff] }
 0x288   :  { %v4477_v35 = vpop.eup %4476  ;;  %4130 = vmatprep.mubr.msk.f32.mxu0 %vm975_vm5, %v1380_v62  ;;  %v1384_v30 = vmul.f32 %v4475_v50, %v5333_v48  ;;  %v1385_v55 = vmul.f32 %v4475_v50, %v5337_v31  ;;  %v1341_v24 = vadd.f32 %v1340_v26, %v1339_v9  ;;  %v4326_v26 = vpack.c.bf16 %v2056_v40, %v2054_v2  ;;  %v2053_v50 = vld [vmem:[#allocation7 + $0x20] sm:$0xff] }
 0x289   :  { %v1347_v33 = vrot.slane %v1346_v61, 2  ;;  %v1354_v0 = vrot.slane %v1353_v18, 4  ;;  %v1386_v25 = vmul.f32 %v4477_v35, %v5370_v41  ;;  %v1387_v19 = vmul.f32 %v4477_v35, %v5372_v39  ;;  %v4479_v10 = vpop.eup %4478 }
 0x28a   :  { %4492 = vrcp.f32 %v1341_v24  ;;  %v4481_v5 = vpop.eup %4480  ;;  %v1388_v47 = vmul.f32 %v4479_v10, %v5392_v52  ;;  %v1389_v48 = vmul.f32 %v4479_v10, %v5402_v51  ;;  %v2063_v10 = vld [vmem:[#allocation7 + $0x70] sm:$0xff] }
 0x28b   :  { %v1348_v60 = vadd.f32 %v1347_v33, %v1346_v61  ;;  %v1355_v6 = vadd.f32 %v1354_v0, %v1353_v18  ;;  %4131 = vmatmul.mubr.msk.f32.gmra.mrb[4].mxu0 %vm975_vm5, %v1381_v15  ;;  %v4483_v31 = vpop.eup %4482  ;;  %v1390_v20 = vmul.f32 %v4481_v5, %v5426_v36  ;;  %v1391_v41 = vmul.f32 %v4481_v5, %v5428_v45  ;;  %v2055_v61 = vld [vmem:[#allocation7 + $0x30] sm:$0xff]  ;;  %v2062_v33 = vld [vmem:[#allocation7 + $0x68] sm:$0xff]  ;;  %v2064_v0 = vld [vmem:[#allocation7 + $0x78] sm:$0xff] }
 0x28c   :  { %4133 = vmatprep.mubr.msk.f32.mxu0 %vm975_vm5, %v1382_v53  ;;  %v4485_v27 = vpop.eup %4484  ;;  %v1392_v22 = vmul.f32 %v4483_v31, %v5464_v23  ;;  %v1393_v1 = vmul.f32 %v4483_v31, %v5468_v29  ;;  %v4328_v18 = vpack.c.bf16 %v2055_v61, %v2053_v50  ;;  %v2058_v53 = vld [vmem:[#allocation7 + $0x48] sm:$0xff]  ;;  %v2067_v31 = vld [vmem:[#allocation7 + $0x90] sm:$0xff] }
 0x28d   :  { %v1356_v39 = vrot.slane %v1355_v6, 2  ;;  %v1349_v3 = vrot.slane %v1348_v60, 1  ;;  %v1394_v56 = vmul.f32 %v4485_v27, %v5510_v13  ;;  %v1395_v52 = vmul.f32 %v4485_v27, %v5516_v21  ;;  %v2072_v27 = vld [vmem:[#allocation7 + $0xb8] sm:$0xff] }
 0x28e   :  { %v4487_v34 = vpop.eup %4486 }
 0x28f   :  { %v4489_v51 = vpop.eup %4488  ;;  %v1357_v4 = vadd.f32 %v1356_v39, %v1355_v6  ;;  %4134 = vmatmul.mubr.msk.f32.gmra.mrb[6].mxu0 %vm975_vm5, %v1383_v14  ;;  %v1396_v36 = vmul.f32 %v4487_v34, %v5520_v28  ;;  %v1397_v45 = vmul.f32 %v4487_v34, %v5525_v12  ;;  %v1350_v62 = vadd.f32 %v1349_v3, %v1348_v60  ;;  %v2060_v14 = vld [vmem:[#allocation7 + $0x58] sm:$0xff]  ;;  %v2066_v60 = vld [vmem:[#allocation7 + $0x88] sm:$0xff] }
 0x290   :  { %4136 = vmatprep.mubr.msk.f32.mxu0 %vm975_vm5, %v1384_v30  ;;  %v1398_v23 = vmul.f32 %v4489_v51, %v5534_v54  ;;  %v1399_v29 = vmul.f32 %v4489_v51, %v5536_v8  ;;  %v4491_v13 = vpop.eup %4490  ;;  %v4330_v35 = vpack.c.bf16 %v2060_v14, %v2058_v53  ;;  %v2057_v30 = vld [vmem:[#allocation7 + $0x40] sm:$0xff]  ;;  %v2068_v6 = vld [vmem:[#allocation7 + $0x98] sm:$0xff]  ;;  %v2074_v34 = vld [vmem:[#allocation7 + $0xc8] sm:$0xff] }
 0x291   :  { %4494 = vrcp.f32 %v1350_v62  ;;  %v1358_v15 = vrot.slane %v1357_v4, 1  ;;  %v1400_v21 = vmul.f32 %v4491_v13, %v5541_v49  ;;  %v1401_v9 = vmul.f32 %v4491_v13, %v5547_v17  ;;  %v2073_v51 = vld [vmem:[#allocation7 + $0xc0] sm:$0xff]  ;;  %v2080_v62 = vld [vmem:[#allocation7 + $0xf8] sm:$0xff] }
 0x293   :  { %4137 = vmatmul.mubr.msk.f32.gmra.mrb[8].mxu0 %vm975_vm5, %v1385_v55  ;;  %v1359_v38 = vadd.f32 %v1358_v15, %v1357_v4  ;;  %v2059_v55 = vld [vmem:[#allocation7 + $0x50] sm:$0xff] }
 0x294   :  { %v4493_v28 = vpop.eup %4492  ;;  %4139 = vmatprep.mubr.msk.f32.mxu0 %vm975_vm5, %v1386_v25  ;;  %v4332_v24 = vpack.c.bf16 %v2059_v55, %v2057_v30  ;;  %v4334_v25 = vpack.c.bf16 %v2064_v0, %v2062_v33  ;;  %v2075_v4 = vld [vmem:[#allocation7 + $0xd0] sm:$0xff] }
 0x295   :  { %v1402_v12 = vmul.f32 %v4493_v28, %v5560_v43  ;;  %v1403_v32 = vmul.f32 %v4493_v28, %v5566_v59  ;;  %4496 = vrcp.f32 %v1359_v38  ;;  %v2079_v15 = vld [vmem:[#allocation7 + $0xf0] sm:$0xff]  ;;  %v2084_v38 = vld [vmem:[%s6649_s11 + $0x10] sm:$0xff] }
 0x297   :  { %4140 = vmatmul.mubr.msk.f32.gmra.mrb[10].mxu0 %vm975_vm5, %v1387_v19  ;;  %v2061_v19 = vld [vmem:[#allocation7 + $0x60] sm:$0xff] }
 0x298   :  { %4142 = vmatprep.mubr.msk.f32.mxu0 %vm975_vm5, %v1388_v47  ;;  %v4336_v5 = vpack.c.bf16 %v2063_v10, %v2061_v19  ;;  %v4338_v47 = vpack.c.bf16 %v2068_v6, %v2066_v60 }
 0x29b   :  { %v4495_v54 = vpop.eup %4494  ;;  %4143 = vmatmul.mubr.msk.f32.gmra.mrb[12].mxu0 %vm975_vm5, %v1389_v48  ;;  %v2065_v48 = vld [vmem:[#allocation7 + $0x80] sm:$0xff] }
 0x29c   :  { %4145 = vmatprep.mubr.msk.f32.mxu0 %vm975_vm5, %v1390_v20  ;;  %v1404_v8 = vmul.f32 %v4495_v54, %v5582_v7  ;;  %v1405_v49 = vmul.f32 %v4495_v54, %v5586_v58  ;;  %v2050_v7 = vld [vmem:[#allocation7 + $0x8] sm:$0xff]  ;;  %v2052_v58 = vld [vmem:[#allocation7 + $0x18] sm:$0xff]  ;;  %v4340_v20 = vpack.c.bf16 %v2067_v31, %v2065_v48 }
 0x29d   :  { %v2086_v54 = vld [vmem:[%s6649_s11 + $0x20] sm:$0xff] }
 0x29f   :  { %v4497_v17 = vpop.eup %4496  ;;  %4146 = vmatmul.mubr.msk.f32.gmra.mrb[14].mxu0 %vm975_vm5, %v1391_v41  ;;  %v2070_v41 = vld [vmem:[#allocation7 + $0xa8] sm:$0xff] }
 0x2a0   :  { %4148 = vmatprep.mubr.msk.f32.mxu0 %vm975_vm5, %v1392_v22  ;;  %v1406_v43 = vmul.f32 %v4497_v17, %v5597_v42  ;;  %v1407_v59 = vmul.f32 %v4497_v17, %v5600_v11  ;;  %v4322_v42 = vpack.c.bf16 %v2052_v58, %v2050_v7  ;;  %v2049_v11 = vld [vmem:[#allocation7] sm:$0xff]  ;;  %v4342_v39 = vpack.c.bf16 %v2072_v27, %v2070_v41 }
 0x2a1   :  { %v4324_v37 = vpack.c.bf16 %v2051_v44, %v2049_v11  ;;  %v2069_v22 = vld [vmem:[#allocation7 + $0xa0] sm:$0xff] }
 0x2a2   :  { %4323 = vmatprep.subr.bf16.mxu1 %v4322_v42  ;;  %v2088_v17 = vld [vmem:[%s6649_s11 + $0x30] sm:$0xff] }
 0x2a3   :  { %4149 = vmatmul.mubr.msk.f32.gmra.mrb[16].mxu0 %vm975_vm5, %v1393_v1  ;;  %4325 = vmatpush1.bf16.msra.mxu1 %v4324_v37  ;;  %v2071_v1 = vld [vmem:[#allocation7 + $0xb0] sm:$0xff] }
 0x2a4   :  { %4151 = vmatprep.mubr.msk.f32.mxu0 %vm975_vm5, %v1394_v56  ;;  %4327 = vmatprep.subr.bf16.mxu1 %v4326_v26  ;;  %v4344_v3 = vpack.c.bf16 %v2071_v1, %v2069_v22  ;;  %v2076_v56 = vld [vmem:[#allocation7 + $0xd8] sm:$0xff] }
 0x2a7   :  { %4152 = vmatmul.mubr.msk.f32.gmra.mrb[18].mxu0 %vm975_vm5, %v1395_v52  ;;  %4329 = vmatpush1.bf16.msra.mxu1 %v4328_v18  ;;  %v4346_v52 = vpack.c.bf16 %v2076_v56, %v2074_v34 }
 0x2a8   :  { %4154 = vmatprep.mubr.msk.f32.mxu0 %vm975_vm5, %v1396_v36  ;;  %4331 = vmatprep.subr.bf16.mxu1 %v4330_v35  ;;  %v4348_v36 = vpack.c.bf16 %v2075_v4, %v2073_v51 }
 0x2ab   :  { %4155 = vmatmul.mubr.msk.f32.gmra.mrb[20].mxu0 %vm975_vm5, %v1397_v45  ;;  %4333 = vmatpush1.bf16.msra.mxu1 %v4332_v24  ;;  %v2078_v45 = vld [vmem:[#allocation7 + $0xe8] sm:$0xff] }
 0x2ac   :  { %4157 = vmatprep.mubr.msk.f32.mxu0 %vm975_vm5, %v1398_v23  ;;  %4335 = vmatprep.subr.bf16.mxu1 %v4334_v25  ;;  %v4350_v23 = vpack.c.bf16 %v2080_v62, %v2078_v45 }
 0x2af   :  { %4158 = vmatmul.mubr.msk.f32.gmra.mrb[22].mxu0 %vm975_vm5, %v1399_v29  ;;  %4337 = vmatpush1.bf16.msra.mxu1 %v4336_v5  ;;  %v2077_v29 = vld [vmem:[#allocation7 + $0xe0] sm:$0xff] }
 0x2b0   :  { %4160 = vmatprep.mubr.msk.f32.mxu0 %vm975_vm5, %v1400_v21  ;;  %4339 = vmatprep.subr.bf16.mxu1 %v4338_v47  ;;  %v4352_v13 = vpack.c.bf16 %v2079_v15, %v2077_v29  ;;  %v2082_v21 = vld [vmem:[%s6649_s11] sm:$0xff] }
 0x2b3   :  { %4161 = vmatmul.mubr.msk.f32.gmra.mrb[24].mxu0 %vm975_vm5, %v1401_v9  ;;  %4341 = vmatpush1.bf16.msra.mxu1 %v4340_v20  ;;  %v2083_v9 = vld [vmem:[%s6649_s11 + $0x8] sm:$0xff] }
 0x2b4   :  { %4163 = vmatprep.mubr.msk.f32.mxu0 %vm975_vm5, %v1402_v12  ;;  %4343 = vmatprep.subr.bf16.mxu1 %v4342_v39  ;;  %v4354_v28 = vpack.c.bf16 %v2083_v9, %v2082_v21  ;;  %v2085_v12 = vld [vmem:[%s6649_s11 + $0x18] sm:$0xff] }
 0x2b6   :  { %4355 = vmatprep.subr.bf16.mxu0 %v4354_v28 }
 0x2b7   :  { %4164 = vmatmul.mubr.msk.f32.gmra.mrb[26].mxu0 %vm975_vm5, %v1403_v32  ;;  %4345 = vmatpush1.bf16.msra.mxu1 %v4344_v3  ;;  %v4358_v32 = vpack.c.bf16 %v2085_v12, %v2084_v38 }
 0x2b8   :  { %4166 = vmatprep.mubr.msk.f32.mxu0 %vm975_vm5, %v1404_v8  ;;  %4347 = vmatprep.subr.bf16.mxu1 %v4346_v52  ;;  %v2087_v8 = vld [vmem:[%s6649_s11 + $0x28] sm:$0xff]  ;;  %v5698_v52 = vld [vmem:[%s6644_s6] ss:$0 sm:$0xff] }
 0x2b9   :  { %4357 = vmatpush3.bf16.msra.mxu0 %v4354_v28  ;;  %v5707_v28 = vld [vmem:[%s6645_s7] ss:$0 sm:$0xff] }
 0x2ba   :  { %4359 = vmatprep.subr.bf16.mxu0 %v4358_v32 }
 0x2bb   :  { %4167 = vmatmul.mubr.msk.f32.gmra.mrb[28].mxu0 %vm975_vm5, %v1405_v49  ;;  %4349 = vmatpush1.bf16.msra.mxu1 %v4348_v36  ;;  %v4362_v49 = vpack.c.bf16 %v2087_v8, %v2086_v54 }
 0x2bc   :  { %4169 = vmatprep.mubr.msk.f32.mxu0 %vm975_vm5, %v1406_v43  ;;  %4351 = vmatprep.subr.bf16.mxu1 %v4350_v23  ;;  %v2089_v43 = vld [vmem:[%s6649_s11 + $0x38] sm:$0xff] }
 0x2bd   :  { %4361 = vmatpush3.bf16.msra.mxu0 %v4358_v32 }
 0x2be   :  { %4363 = vmatprep.subr.bf16.mxu0 %v4362_v49 }
 0x2bf   :  { %4170 = vmatmul.mubr.msk.f32.gmra.mrb[30].mxu0 %vm975_vm5, %v1407_v59  ;;  %4353 = vmatpush1.bf16.msra.mxu1 %v4352_v13  ;;  %v4366_v59 = vpack.c.bf16 %v2089_v43, %v2088_v17 }
 0x2c1   :  { %4365 = vmatpush3.bf16.msra.mxu0 %v4362_v49 }
 0x2c2   :  { %4367 = vmatprep.subr.bf16.mxu0 %v4366_v59 }
 0x2c5   :  { %4369 = vmatpush3.bf16.msra.mxu0 %v4366_v59 }
 0x356   :  { %v4126_v7 = vpop.f32.mrb[0].mxu0 }
 0x357   :  { %v1734_v58 = vmul.f32 %v4126_v7, %v5063_v57  ;;  %v1574_v42 = vpop.f32.mrb[1].mxu0 }
 0x358   :  { %v1733_v11 = vmul.f32 %v1574_v42, %v5068_v63 }
 0x35a   :  { %v1765_v44 = vadd.f32 %v1734_v58, %v1733_v11  ;;  %v4129_v37 = vpop.f32.mrb[2].mxu0 }
 0x35b   :  { %v1736_v2 = vmul.f32 %v4129_v37, %v5063_v57  ;;  %v1584_v40 = vpop.f32.mrb[3].mxu0 }
 0x35c   :  { %v1766_v26 = vrot.slane %v1765_v44, 4  ;;  %v1735_v50 = vmul.f32 %v1584_v40, %v5068_v63 }
 0x35e   :  { %v1767_v61 = vadd.f32 %v1766_v26, %v1765_v44  ;;  %v1772_v18 = vadd.f32 %v1736_v2, %v1735_v50  ;;  %v4132_v53 = vpop.f32.mrb[4].mxu0 }
 0x35f   :  { %v1738_v14 = vmul.f32 %v4132_v53, %v5063_v57  ;;  %v1594_v35 = vpop.f32.mrb[5].mxu0 }
 0x360   :  { %v1768_v30 = vrot.slane %v1767_v61, 2  ;;  %v1773_v55 = vrot.slane %v1772_v18, 4  ;;  %v1737_v24 = vmul.f32 %v1594_v35, %v5068_v63 }
 0x362   :  { %v1769_v33 = vadd.f32 %v1768_v30, %v1767_v61  ;;  %v1774_v0 = vadd.f32 %v1773_v55, %v1772_v18  ;;  %v1779_v25 = vadd.f32 %v1738_v14, %v1737_v24  ;;  %v4135_v19 = vpop.f32.mrb[6].mxu0 }
 0x363   :  { %v1740_v10 = vmul.f32 %v4135_v19, %v5063_v57  ;;  %v1604_v5 = vpop.f32.mrb[7].mxu0 }
 0x364   :  { %v1770_v60 = vrot.slane %v1769_v33, 1  ;;  %v1775_v6 = vrot.slane %v1774_v0, 2  ;;  %v1780_v47 = vrot.slane %v1779_v25, 4  ;;  %v1739_v48 = vmul.f32 %v1604_v5, %v5068_v63 }
 0x366   :  { %v1776_v31 = vadd.f32 %v1775_v6, %v1774_v0  ;;  %v1781_v20 = vadd.f32 %v1780_v47, %v1779_v25  ;;  %v1786_v41 = vadd.f32 %v1740_v10, %v1739_v48  ;;  %v4138_v27 = vpop.f32.mrb[8].mxu0  ;;  %v1771_v1 = vadd.f32 %v1770_v60, %v1769_v33 }
 0x367   :  { %v1742_v39 = vmul.f32 %v4138_v27, %v5063_v57  ;;  %v1614_v22 = vpop.f32.mrb[9].mxu0 }
 0x368   :  { %v1777_v3 = vrot.slane %v1776_v31, 1  ;;  %v1782_v34 = vrot.slane %v1781_v20, 2  ;;  %v1787_v56 = vrot.slane %v1786_v41, 4  ;;  %v1741_v51 = vmul.f32 %v1614_v22, %v5068_v63 }
 0x369   :  { %v1884_v13 = vmul.f32 %v5698_v52, %v1771_v1 }
 0x36a   :  { %v1778_v4 = vadd.f32 %v1777_v3, %v1776_v31  ;;  %v1783_v36 = vadd.f32 %v1782_v34, %v1781_v20  ;;  %v1788_v45 = vadd.f32 %v1787_v56, %v1786_v41  ;;  %v4141_v62 = vpop.f32.mrb[10].mxu0  ;;  %v1793_v23 = vadd.f32 %v1742_v39, %v1741_v51 }
 0x36b   :  { %v1744_v29 = vmul.f32 %v4141_v62, %v5063_v57  ;;  %v1624_v15 = vpop.f32.mrb[11].mxu0  ;;  %v5715_v42 = vadd.f32 %v5707_v28, %v1884_v13 }
 0x36c   :  { %v1885_v21 = vmul.f32 %v5698_v52, %v1778_v4  ;;  %v1784_v9 = vrot.slane %v1783_v36, 1  ;;  %v1789_v38 = vrot.slane %v1788_v45, 2  ;;  %v1794_v12 = vrot.slane %v1793_v23, 4 }
 0x36d   :  { %v1743_v32 = vmul.f32 %v1624_v15, %v5068_v63  ;;  %vm1923_vm13 = vcmp.ge.f32.partialorder %v5715_v42, 0.0 }
 0x36e   :  { %v5711_v54 = vadd.f32 %v5707_v28, %v1885_v21  ;;  %v1785_v8 = vadd.f32 %v1784_v9, %v1783_v36  ;;  %v1790_v49 = vadd.f32 %v1789_v38, %v1788_v45  ;;  %v4144_v17 = vpop.f32.mrb[12].mxu0  ;;  %v1795_v43 = vadd.f32 %v1794_v12, %v1793_v23 }
 0x36f   :  { %v1800_v59 = vadd.f32 %v1744_v29, %v1743_v32  ;;  %v1746_v7 = vmul.f32 %v4144_v17, %v5063_v57  ;;  %v1634_v58 = vpop.f32.mrb[13].mxu0 }
 0x370   :  { %v1962_v11 = vrot.slane %v5711_v54, 7  ;;  %v1886_v44 = vmul.f32 %v5698_v52, %v1785_v8  ;;  %v1791_v37 = vrot.slane %v1790_v49, 1  ;;  %v1796_v2 = vrot.slane %v1795_v43, 2 }
 0x371   :  { %v1801_v40 = vrot.slane %v1800_v59, 4  ;;  %v1745_v26 = vmul.f32 %v1634_v58, %v5068_v63  ;;  %vm1924_vm14 = vcmp.ge.f32.partialorder %v5711_v54, 0.0 }
 0x372   :  { %v1964_v50 = vsel %vm1963_vm6, %v1962_v11, %v5715_v42  ;;  %v5723_v61 = vadd.f32 %v5707_v28, %v1886_v44  ;;  %v1792_v18 = vadd.f32 %v1791_v37, %v1790_v49  ;;  %v4147_v53 = vpop.f32.mrb[14].mxu0  ;;  %v1797_v14 = vadd.f32 %v1796_v2, %v1795_v43 }
 0x373   :  { %v1802_v35 = vadd.f32 %v1801_v40, %v1800_v59  ;;  %v1807_v30 = vadd.f32 %v1746_v7, %v1745_v26  ;;  %v1748_v55 = vmul.f32 %v4147_v53, %v5063_v57  ;;  %v1644_v24 = vpop.f32.mrb[15].mxu0 }
 0x374   :  { %v1965_v33 = vrot.slane %v5723_v61, 6  ;;  %v1887_v0 = vmul.f32 %v5698_v52, %v1792_v18  ;;  %v1747_v25 = vmul.f32 %v1644_v24, %v5068_v63  ;;  %v1798_v19 = vrot.slane %v1797_v14, 1 }
 0x375   :  { %v1803_v10 = vrot.slane %v1802_v35, 2  ;;  %v1808_v5 = vrot.slane %v1807_v30, 4  ;;  %vm1925_vm15 = vcmp.ge.f32.partialorder %v5723_v61, 0.0 }
 0x376   :  { %v1967_v60 = vsel %vm1966_vm7, %v1965_v33, %v1964_v50  ;;  %v5731_v6 = vadd.f32 %v5707_v28, %v1887_v0  ;;  %v1814_v47 = vadd.f32 %v1748_v55, %v1747_v25  ;;  %v4150_v48 = vpop.f32.mrb[16].mxu0  ;;  %v1799_v31 = vadd.f32 %v1798_v19, %v1797_v14 }
 0x377   :  { %v1804_v20 = vadd.f32 %v1803_v10, %v1802_v35  ;;  %v1809_v41 = vadd.f32 %v1808_v5, %v1807_v30  ;;  %v1750_v27 = vmul.f32 %v4150_v48, %v5063_v57  ;;  %v1654_v39 = vpop.f32.mrb[17].mxu0 }
 0x378   :  { %v1968_v22 = vrot.slane %v5731_v6, 5  ;;  %v1815_v1 = vrot.slane %v1814_v47, 4  ;;  %v1749_v3 = vmul.f32 %v1654_v39, %v5068_v63  ;;  %v1888_v34 = vmul.f32 %v5698_v52, %v1799_v31 }
 0x379   :  { %v1805_v56 = vrot.slane %v1804_v20, 1  ;;  %v1810_v51 = vrot.slane %v1809_v41, 2  ;;  %vm1926_vm0 = vcmp.ge.f32.partialorder %v5731_v6, 0.0 }
 0x37a   :  { %v1970_v4 = vsel %vm1969_vm8, %v1968_v22, %v1967_v60  ;;  %v1816_v36 = vadd.f32 %v1815_v1, %v1814_v47  ;;  %v1821_v45 = vadd.f32 %v1750_v27, %v1749_v3  ;;  %v4153_v62 = vpop.f32.mrb[18].mxu0  ;;  %v5739_v23 = vadd.f32 %v5707_v28, %v1888_v34 }
 0x37b   :  { %v1806_v29 = vadd.f32 %v1805_v56, %v1804_v20  ;;  %v1811_v15 = vadd.f32 %v1810_v51, %v1809_v41  ;;  %v1752_v13 = vmul.f32 %v4153_v62, %v5063_v57  ;;  %v1664_v21 = vpop.f32.mrb[19].mxu0 }
 0x37c   :  { %v1817_v9 = vrot.slane %v1816_v36, 2  ;;  %v1822_v38 = vrot.slane %v1821_v45, 4  ;;  %v1751_v12 = vmul.f32 %v1664_v21, %v5068_v63  ;;  %v1971_v32 = vrot.slane %v5739_v23, 4 }
 0x37d   :  { %v1889_v8 = vmul.f32 %v5698_v52, %v1806_v29  ;;  %v1812_v49 = vrot.slane %v1811_v15, 1  ;;  %vm1927_vm1 = vcmp.ge.f32.partialorder %v5739_v23, 0.0 }
 0x37e   :  { %v1818_v17 = vadd.f32 %v1817_v9, %v1816_v36  ;;  %v1823_v43 = vadd.f32 %v1822_v38, %v1821_v45  ;;  %v1828_v59 = vadd.f32 %v1752_v13, %v1751_v12  ;;  %v4156_v7 = vpop.f32.mrb[20].mxu0  ;;  %v1973_v58 = vsel %vm1972_vm9, %v1971_v32, %v1970_v4  ;;  %v5769_v4 = vld [vmem:[%s6646_s8] ss:$0 sm:$0xff] }
 0x37f   :  { %v5747_v11 = vadd.f32 %v5707_v28, %v1889_v8  ;;  %v1813_v44 = vadd.f32 %v1812_v49, %v1811_v15  ;;  %v1754_v37 = vmul.f32 %v4156_v7, %v5063_v57  ;;  %v1674_v2 = vpop.f32.mrb[21].mxu0 }
 0x380   :  { %v1819_v40 = vrot.slane %v1818_v17, 1  ;;  %v1824_v26 = vrot.slane %v1823_v43, 2  ;;  %v1829_v50 = vrot.slane %v1828_v59, 4  ;;  %v1753_v18 = vmul.f32 %v1674_v2, %v5068_v63 }
 0x381   :  { %v1974_v53 = vrot.slane %v5747_v11, 3  ;;  %v1890_v14 = vmul.f32 %v5698_v52, %v1813_v44  ;;  %vm1928_vm2 = vcmp.ge.f32.partialorder %v5747_v11, 0.0 }
 0x382   :  { %v1820_v35 = vadd.f32 %v1819_v40, %v1818_v17  ;;  %v1825_v30 = vadd.f32 %v1824_v26, %v1823_v43  ;;  %v1830_v55 = vadd.f32 %v1829_v50, %v1828_v59  ;;  %v1835_v24 = vadd.f32 %v1754_v37, %v1753_v18  ;;  %v4159_v33 = vpop.f32.mrb[22].mxu0 }
 0x383   :  { %v1976_v0 = vsel %vm1975_vm10, %v1974_v53, %v1973_v58  ;;  %v5755_v25 = vadd.f32 %v5707_v28, %v1890_v14  ;;  %v1756_v19 = vmul.f32 %v4159_v33, %v5063_v57  ;;  %v1684_v10 = vpop.f32.mrb[23].mxu0 }
 0x384   :  { %v1891_v5 = vmul.f32 %v5698_v52, %v1820_v35  ;;  %v1826_v60 = vrot.slane %v1825_v30, 1  ;;  %v1831_v47 = vrot.slane %v1830_v55, 2  ;;  %v1836_v48 = vrot.slane %v1835_v24, 4 }
 0x385   :  { %v1977_v31 = vrot.slane %v5755_v25, 2  ;;  %v1755_v20 = vmul.f32 %v1684_v10, %v5068_v63  ;;  %vm1929_vm3 = vcmp.ge.f32.partialorder %v5755_v25, 0.0 }
 0x386   :  { %v5762_v41 = vadd.f32 %v5707_v28, %v1891_v5  ;;  %v1827_v27 = vadd.f32 %v1826_v60, %v1825_v30  ;;  %v1832_v39 = vadd.f32 %v1831_v47, %v1830_v55  ;;  %v1837_v22 = vadd.f32 %v1836_v48, %v1835_v24  ;;  %v4162_v1 = vpop.f32.mrb[24].mxu0 }
 0x387   :  { %v1979_v3 = vsel %vm1978_vm11, %v1977_v31, %v1976_v0  ;;  %v1842_v34 = vadd.f32 %v1756_v19, %v1755_v20  ;;  %v1758_v56 = vmul.f32 %v4162_v1, %v5063_v57  ;;  %v1694_v51 = vpop.f32.mrb[25].mxu0 }
 0x388   :  { %v1980_v36 = vrot.slane %v5762_v41, 1  ;;  %v1833_v45 = vrot.slane %v1832_v39, 1  ;;  %v1838_v62 = vrot.slane %v1837_v22, 2  ;;  %v1892_v29 = vmul.f32 %v5698_v52, %v1827_v27 }
 0x389   :  { %v1843_v15 = vrot.slane %v1842_v34, 4  ;;  %v1757_v13 = vmul.f32 %v1694_v51, %v5068_v63  ;;  %vm1930_vm4 = vcmp.ge.f32.partialorder %v5762_v41, 0.0 }
 0x38a   :  { %v1982_v21 = vsel %vm1981_vm12, %v1980_v36, %v1979_v3  ;;  %v1834_v9 = vadd.f32 %v1833_v45, %v1832_v39  ;;  %v1839_v38 = vadd.f32 %v1838_v62, %v1837_v22  ;;  %v4165_v12 = vpop.f32.mrb[26].mxu0  ;;  %v5783_v44 = vadd.f32 %v5707_v28, %v1892_v29 }
 0x38b   :  { %v5776_v32 = vmul.f32 %v5769_v4, %v1982_v21  ;;  %v1844_v8 = vadd.f32 %v1843_v15, %v1842_v34  ;;  %v1849_v49 = vadd.f32 %v1758_v56, %v1757_v13  ;;  %v1760_v17 = vmul.f32 %v4165_v12, %v5063_v57  ;;  %v1704_v43 = vpop.f32.mrb[27].mxu0 }
 0x38c   :  { %v1893_v59 = vmul.f32 %v5698_v52, %v1834_v9  ;;  %v1840_v7 = vrot.slane %v1839_v38, 1  ;;  %v1759_v58 = vmul.f32 %v1704_v43, %v5068_v63  ;;  %vm1931_vm5 = vcmp.ge.f32.partialorder %v5783_v44, 0.0 }
 0x38d   :  { %v1845_v37 = vrot.slane %v1844_v8, 2  ;;  %v1850_v2 = vrot.slane %v1849_v49, 4  ;;  %v2003_v53 = vrot.slane %v5776_v32, 1  ;;  %v2004_v24 = vrot.slane %v5776_v32, 2 }
 0x38e   :  { %v5787_v40 = vadd.f32 %v5707_v28, %v1893_v59  ;;  %v1841_v26 = vadd.f32 %v1840_v7, %v1839_v38  ;;  %v1856_v50 = vadd.f32 %v1760_v17, %v1759_v58  ;;  %v4168_v18 = vpop.f32.mrb[28].mxu0  ;;  %v2005_v10 = vrot.slane %v5776_v32, 3 }
 0x38f   :  { %v1846_v14 = vadd.f32 %v1845_v37, %v1844_v8  ;;  %v1851_v35 = vadd.f32 %v1850_v2, %v1849_v49  ;;  %v1762_v30 = vmul.f32 %v4168_v18, %v5063_v57  ;;  %v1714_v55 = vpop.f32.mrb[29].mxu0  ;;  %v2006_v48 = vrot.slane %v5776_v32, 4 }
 0x390   :  { %v1983_v33 = vrot.slane %v5787_v40, 7  ;;  %v1894_v0 = vmul.f32 %v5698_v52, %v1841_v26  ;;  %v1857_v19 = vrot.slane %v1856_v50, 4  ;;  %v1761_v47 = vmul.f32 %v1714_v55, %v5068_v63 }
 0x391   :  { %v1847_v5 = vrot.slane %v1846_v14, 1  ;;  %v1852_v60 = vrot.slane %v1851_v35, 2  ;;  %v2007_v22 = vrot.slane %v5776_v32, 5  ;;  %v2008_v29 = vrot.slane %v5776_v32, 6 }
 0x392   :  { %v1984_v31 = vsel %vm1963_vm6, %v1983_v33, %v5783_v44  ;;  %v5804_v20 = vadd.f32 %v5707_v28, %v1894_v0  ;;  %v1858_v27 = vadd.f32 %v1857_v19, %v1856_v50  ;;  %v4171_v39 = vpop.f32.mrb[30].mxu0  ;;  %v1863_v34 = vadd.f32 %v1762_v30, %v1761_v47 }
 0x393   :  { %v1848_v1 = vadd.f32 %v1847_v5, %v1846_v14  ;;  %v1853_v3 = vadd.f32 %v1852_v60, %v1851_v35  ;;  %v1764_v56 = vmul.f32 %v4171_v39, %v5063_v57  ;;  %v1724_v51 = vpop.f32.mrb[31].mxu0  ;;  %v2009_v9 = vrot.slane %v5776_v32, 7 }
 0x394   :  { %v1985_v36 = vrot.slane %v5804_v20, 6  ;;  %v1859_v45 = vrot.slane %v1858_v27, 2  ;;  %v1763_v62 = vmul.f32 %v1724_v51, %v5068_v63  ;;  %v1864_v21 = vrot.slane %v1863_v34, 4 }
 0x395   :  { %v1895_v15 = vmul.f32 %v5698_v52, %v1848_v1  ;;  %v1854_v13 = vrot.slane %v1853_v3, 1  ;;  %v2033_v57 = vsel %vm1923_vm13, %v5715_v42, %v5776_v32  ;;  %v2034_v43 = vsel %vm1924_vm14, %v5711_v54, %v2003_v53 }
 0x396   :  { %v1986_v38 = vsel %vm1966_vm7, %v1985_v36, %v1984_v31  ;;  %v1860_v12 = vadd.f32 %v1859_v45, %v1858_v27  ;;  %v1870_v8 = vadd.f32 %v1764_v56, %v1763_v62  ;;  %v1865_v17 = vadd.f32 %v1864_v21, %v1863_v34 }
 0x397   :  { %v5820_v49 = vadd.f32 %v5707_v28, %v1895_v15  ;;  %v1855_v63 = vadd.f32 %v1854_v13, %v1853_v3  ;;  %v2035_v58 = vsel %vm1925_vm15, %v5723_v61, %v2004_v24  ;;  %v2036_v37 = vsel %vm1926_vm0, %v5731_v6, %v2005_v10 }
 0x398   :  { %v1861_v59 = vrot.slane %v1860_v12, 1  ;;  %v1871_v7 = vrot.slane %v1870_v8, 4  ;;  %v1866_v2 = vrot.slane %v1865_v17, 2  ;;  %v2037_v54 = vsel %vm1927_vm1, %v5739_v23, %v2006_v48 }
 0x399   :  { %v1987_v42 = vrot.slane %v5820_v49, 5  ;;  %v1896_v32 = vmul.f32 %v5698_v52, %v1855_v63  ;;  %v2038_v61 = vsel %vm1928_vm2, %v5747_v11, %v2007_v22  ;;  %v2039_v14 = vsel %vm1929_vm3, %v5755_v25, %v2008_v29 }
 0x39a   :  { %v1862_v26 = vadd.f32 %v1861_v59, %v1860_v12  ;;  %v1872_v50 = vadd.f32 %v1871_v7, %v1870_v8  ;;  %v1867_v53 = vadd.f32 %v1866_v2, %v1865_v17  ;;  %v2040_v55 = vsel %vm1930_vm4, %v5762_v41, %v2009_v9 }
 0x39b   :  { %v1988_v18 = vsel %vm1969_vm8, %v1987_v42, %v1986_v38  ;;  %v1919_v6 = vadd.f32 %v5707_v28, %v1896_v32  ;;  %v2125_v24 = vrot.slane %v2034_v43, 7  ;;  %v2127_v0 = vrot.slane %v2035_v58, 6 }
 0x39c   :  { %v1897_v35 = vmul.f32 %v5698_v52, %v1862_v26  ;;  %v1873_v30 = vrot.slane %v1872_v50, 2  ;;  %v1868_v33 = vrot.slane %v1867_v53, 1  ;;  %v2129_v5 = vrot.slane %v2036_v37, 5 }
 0x39d   :  { %v1989_v23 = vrot.slane %v1919_v6, 4  ;;  %v2126_v10 = vsel %vm1963_vm6, %v2125_v24, %v2033_v57  ;;  %v2131_v48 = vrot.slane %v2037_v54, 4  ;;  %v2133_v39 = vrot.slane %v2038_v61, 3 }
 0x39e   :  { %v1920_v11 = vadd.f32 %v5707_v28, %v1897_v35  ;;  %v1874_v19 = vadd.f32 %v1873_v30, %v1872_v50  ;;  %v1869_v47 = vadd.f32 %v1868_v33, %v1867_v53  ;;  %v2128_v25 = vsel %vm1966_vm7, %v2127_v0, %v2126_v10  ;;  %v2091_v33 = vld [vmem:[%s6649_s11 + $0x48] sm:$0xff]  ;;  %v2092_v0 = vld [vmem:[%s6649_s11 + $0x50] sm:$0xff] }
 0x39f   :  { %v1990_v60 = vsel %vm1972_vm9, %v1989_v23, %v1988_v18  ;;  %v2130_v41 = vsel %vm1969_vm8, %v2129_v5, %v2128_v25  ;;  %v2135_v3 = vrot.slane %v2039_v14, 2  ;;  %v2137_v36 = vrot.slane %v2040_v55, 1  ;;  %v2090_v23 = vld [vmem:[%s6649_s11 + $0x40] sm:$0xff] }
 0x3a0   :  { %v1991_v31 = vrot.slane %v1920_v11, 3  ;;  %v1875_v27 = vrot.slane %v1874_v19, 1  ;;  %v1898_v22 = vmul.f32 %v5698_v52, %v1869_v47  ;;  %v2132_v1 = vsel %vm1972_vm9, %v2131_v48, %v2130_v41  ;;  %v2094_v5 = vld [vmem:[%s6649_s11 + $0x60] sm:$0xff]  ;;  %v2096_v47 = vld [vmem:[%s6649_s11 + $0x70] sm:$0xff]  ;;  %v2097_v48 = vld [vmem:[%s6649_s11 + $0x78] sm:$0xff] }
 0x3a1   :  { %v2134_v51 = vsel %vm1975_vm10, %v2133_v39, %v2132_v1  ;;  %v6722_v21 = vmov 0.0   ;;  %vm1932_vm13 = vcmp.ge.f32.partialorder %v5787_v40, 0.0  ;;  %vm1933_vm14 = vcmp.ge.f32.partialorder %v5804_v20, 0.0 }
 0x3a2   :  { %v1992_v34 = vsel %vm1975_vm10, %v1991_v31, %v1990_v60  ;;  %v1876_v56 = vadd.f32 %v1875_v27, %v1874_v19  ;;  %v1921_v45 = vadd.f32 %v5707_v28, %v1898_v22  ;;  %v2136_v62 = vsel %vm1978_vm11, %v2135_v3, %v2134_v51  ;;  %v2093_v19 = vld [vmem:[%s6649_s11 + $0x58] sm:$0xff]  ;;  %v2095_v60 = vld [vmem:[%s6649_s11 + $0x68] sm:$0xff]  ;;  %v2081_v27 = vld [vmem:[%s6648_s10] sm:$0x3] }
 0x3a3   :  { %v2138_v15 = vsel %vm1981_vm12, %v2137_v36, %v2136_v62  ;;  %vm1934_vm15 = vcmp.ge.f32.partialorder %v5820_v49, 0.0  ;;  %vm1935_vm0 = vcmp.ge.f32.partialorder %v1919_v6, 0.0  ;;  %vm1936_vm1 = vcmp.ge.f32.partialorder %v1920_v11, 0.0 }
 0x3a4   :  { %v1899_v29 = vmul.f32 %v5698_v52, %v1876_v56  ;;  %v1993_v13 = vrot.slane %v1921_v45, 2  ;;  %2220 = vmatmul.mubr.f32.vlgmr.msra.gmra.mrb[36].mxu1 %v2138_v15  ;;  %vm1937_vm2 = vcmp.ge.f32.partialorder %v1921_v45, 0.0  ;;  %v4374_v10 = vpack.c.bf16 %v2093_v19, %v2092_v0 }
 0x3a5   :  { %2225 = vmatprep.mubr.f32.mxu1 %v6722_v21  ;;  %v4378_v25 = vpack.c.bf16 %v2095_v60, %v2094_v5  ;;  %v4382_v31 = vpack.c.bf16 %v2097_v48, %v2096_v47  ;;  %v2106_v41 = vrot.slane %v2081_v27, %v5041_v16 }
 0x3a6   :  { %v1922_v9 = vadd.f32 %v5707_v28, %v1899_v29  ;;  %v1994_v38 = vsel %vm1978_vm11, %v1993_v13, %v1992_v34  ;;  %v6723_v34 = vld [vmem:[#allocation15_spill] sm:$0xff] }
 0x3a7   :  { %v2102_v56 = vrot.slane %v2081_v27, %v6723_v34 }
 0x3a8   :  { %v1995_v12 = vrot.slane %v1922_v9, 1  ;;  %vm1938_vm3 = vcmp.ge.f32.partialorder %v1922_v9, 0.0 }
 0x3aa   :  { %v1996_v8 = vsel %vm1981_vm12, %v1995_v12, %v1994_v38 }
 0x3ab   :  { %v2000_v52 = vmul.f32 %v5769_v4, %v1996_v8 }
 0x3ad   :  { %v2010_v28 = vrot.slane %v2000_v52, 1  ;;  %v2011_v57 = vrot.slane %v2000_v52, 2  ;;  %v2012_v63 = vrot.slane %v2000_v52, 3  ;;  %v2013_v17 = vrot.slane %v2000_v52, 4 }
 0x3ae   :  { %v2014_v43 = vrot.slane %v2000_v52, 5  ;;  %v2015_v59 = vrot.slane %v2000_v52, 6  ;;  %v2016_v7 = vrot.slane %v2000_v52, 7  ;;  %v2041_v58 = vsel %vm1931_vm5, %v5783_v44, %v2000_v52 }
 0x3af   :  { %v2042_v37 = vsel %vm1932_vm13, %v5787_v40, %v2010_v28  ;;  %v2043_v4 = vsel %vm1933_vm14, %v5804_v20, %v2011_v57  ;;  %v2044_v42 = vsel %vm1934_vm15, %v5820_v49, %v2012_v63  ;;  %v2045_v32 = vsel %vm1935_vm0, %v1919_v6, %v2013_v17 }
 0x3b0   :  { %v2046_v2 = vsel %vm1936_vm1, %v1920_v11, %v2014_v43  ;;  %v2047_v26 = vsel %vm1937_vm2, %v1921_v45, %v2015_v59  ;;  %v2048_v50 = vsel %vm1938_vm3, %v1922_v9, %v2016_v7  ;;  %v2139_v54 = vrot.slane %v2042_v37, 7 }
 0x3b1   :  { %v2141_v61 = vrot.slane %v2043_v4, 6  ;;  %v2143_v18 = vrot.slane %v2044_v42, 5  ;;  %v2145_v40 = vrot.slane %v2045_v32, 4  ;;  %v2147_v35 = vrot.slane %v2046_v2, 3 }
 0x3b2   :  { %v2140_v44 = vsel %vm1963_vm6, %v2139_v54, %v2041_v58  ;;  %v2149_v30 = vrot.slane %v2047_v26, 2  ;;  %v2151_v6 = vrot.slane %v2048_v50, 1  ;;  %v4370_v11 = vpack.c.bf16 %v2091_v33, %v2090_v23 }
 0x3b3   :  { %v2142_v53 = vsel %vm1966_vm7, %v2141_v61, %v2140_v44 }
 0x3b4   :  { %v2144_v14 = vsel %vm1969_vm8, %v2143_v18, %v2142_v53  ;;  %4371 = vmatprep.subr.bf16.mxu0 %v4370_v11 }
 0x3b5   :  { %v2146_v20 = vsel %vm1972_vm9, %v2145_v40, %v2144_v14  ;;  %4373 = vmatpush3.bf16.msra.mxu0 %v4370_v11 }
 0x3b6   :  { %v2148_v49 = vsel %vm1975_vm10, %v2147_v35, %v2146_v20  ;;  %4375 = vmatprep.subr.bf16.mxu0 %v4374_v10 }
 0x3b7   :  { %v2150_v55 = vsel %vm1978_vm11, %v2149_v30, %v2148_v49 }
 0x3b8   :  { %v2152_v24 = vsel %vm1981_vm12, %v2151_v6, %v2150_v55 }
 0x3b9   :  { %2226 = vmatmul.mubr.f32.gmra.mrb[38].mxu1 %v2152_v24  ;;  %4377 = vmatpush3.bf16.msra.mxu0 %v4374_v10 }
 0x3ba   :  { %4379 = vmatprep.subr.bf16.mxu0 %v4378_v25 }
 0x3bd   :  { %4381 = vmatpush3.bf16.msra.mxu0 %v4378_v25 }
 0x3be   :  { %4383 = vmatprep.subr.bf16.mxu0 %v4382_v31 }
 0x3c1   :  { %4385 = vmatpush3.bf16.msra.mxu0 %v4382_v31 }
 0x477   :  { %v2221_v39 = vpop.f32.mrb[36].mxu1 }
 0x478   :  { %v2223_v22 = vpop.f32.mrb[37].mxu1  ;;  %v5919_v45 = vadd.f32 %v2221_v39, %v2102_v56 }
 0x479   :  { %v2224_v1 = vadd.f32 %v2223_v22, %v2106_v41 }
 0x47b   :  { %v2241_v3 = vrot.slane %v2224_v1, %v5057_v46  ;;  %v2234_v13 = vcombine.high %v2224_v1, %v2224_v1 }
 0x47d   :  { %v2257_v51 = vrot.slane %v2241_v3, %v5057_v46  ;;  %v2249_v36 = vcombine.high %v2241_v3, %v2241_v3  ;;  %v2248_v12 = vrot.slane %v2234_v13, %v5057_v46 }
 0x47f   :  { %v2335_v62 = vrot.slane %v2257_v51, %v6723_v34  ;;  %v2271_v15 = vrot.slane %v2249_v36, %v5057_v46  ;;  %v2279_v9 = vcombine.high %v2257_v51, %v2257_v51  ;;  %v2250_v43 = vcombine.high %v2248_v12, %v2248_v12 }
 0x480   :  { %v2264_v59 = vrot.slane %v2248_v12, %v5057_v46 }
 0x481   :  { %v2412_v29 = vadd.f32 %v2335_v62, %v5919_v45  ;;  %v2339_v38 = vrot.slane %v2271_v15, %v6723_v34  ;;  %v2281_v8 = vcombine.high %v2271_v15, %v2271_v15  ;;  %v2343_v57 = vrot.slane %v2279_v9, %v6723_v34 }
 0x482   :  { %v2278_v2 = vrot.slane %v2250_v43, %v5057_v46  ;;  %v2351_v61 = vrot.slane %v2264_v59, %v6723_v34  ;;  %v2280_v40 = vcombine.high %v2264_v59, %v2264_v59 }
 0x483   :  { %vm2444_vm4 = vcmp.ge.f32.partialorder %v2412_v29, 0.0  ;;  %v2476_v16 = vmul.f32 0.2, %v2412_v29  ;;  %v2414_v28 = vadd.f32 %v2339_v38, %v5919_v45  ;;  %v2416_v4 = vadd.f32 %v2343_v57, %v5919_v45 }
 0x484   :  { %v2347_v42 = vrot.slane %v2281_v8, %v6723_v34  ;;  %v2355_v14 = vrot.slane %v2278_v2, %v6723_v34  ;;  %v2420_v49 = vadd.f32 %v2351_v61, %v5919_v45  ;;  %v2359_v33 = vrot.slane %v2280_v40, %v6723_v34 }
 0x485   :  { %v2508_v21 = vsel %vm2444_vm4, %v2412_v29, %v2476_v16  ;;  %v2478_v37 = vmul.f32 0.2, %v2414_v28  ;;  %vm2446_vm13 = vcmp.ge.f32.partialorder %v2414_v28, 0.0  ;;  %v2480_v18 = vmul.f32 0.2, %v2416_v4 }
 0x486   :  { %4204 = vmatprep.mubr.f32.mxu0 %v2508_v21  ;;  %v2418_v53 = vadd.f32 %v2347_v42, %v5919_v45  ;;  %vm2448_vm15 = vcmp.ge.f32.partialorder %v2416_v4, 0.0  ;;  %v2422_v23 = vadd.f32 %v2355_v14, %v5919_v45  ;;  %v2282_v10 = vcombine.high %v2278_v2, %v2278_v2 }
 0x487   :  { %v2510_v44 = vsel %vm2446_vm13, %v2414_v28, %v2478_v37  ;;  %v2512_v55 = vsel %vm2448_vm15, %v2416_v4, %v2480_v18  ;;  %v2484_v47 = vmul.f32 0.2, %v2420_v49  ;;  %vm2452_vm3 = vcmp.ge.f32.partialorder %v2420_v49, 0.0 }
 0x488   :  { %v2482_v24 = vmul.f32 0.2, %v2418_v53  ;;  %vm2450_vm1 = vcmp.ge.f32.partialorder %v2418_v53, 0.0  ;;  %v2486_v25 = vmul.f32 0.2, %v2422_v23  ;;  %v2424_v48 = vadd.f32 %v2359_v33, %v5919_v45 }
 0x489   :  { %v2363_v39 = vrot.slane %v2282_v10, %v6723_v34  ;;  %v2516_v3 = vsel %vm2452_vm3, %v2420_v49, %v2484_v47 }
 0x48a   :  { %v2514_v60 = vsel %vm2450_vm1, %v2418_v53, %v2482_v24  ;;  %vm2456_vm13 = vcmp.ge.f32.partialorder %v2424_v48, 0.0 }
 0x48b   :  { %v2426_v29 = vadd.f32 %v2363_v39, %v5919_v45 }
 0x48c   :  { %v2227_v52 = vpop.f32.mrb[38].mxu1 }
 0x48d   :  { %v5928_v63 = vadd.f32 %v2227_v52, %v2102_v56  ;;  %v2229_v17 = vpop.f32.mrb[39].mxu1  ;;  %v2488_v56 = vmul.f32 0.2, %v2424_v48  ;;  %v2490_v52 = vmul.f32 0.2, %v2426_v29 }
 0x48e   :  { %v2230_v6 = vadd.f32 %v2229_v17, %v2106_v41 }
 0x48f   :  { %v2413_v7 = vadd.f32 %v2335_v62, %v5928_v63  ;;  %v2415_v58 = vadd.f32 %v2339_v38, %v5928_v63  ;;  %v2417_v54 = vadd.f32 %v2343_v57, %v5928_v63  ;;  %v2419_v30 = vadd.f32 %v2347_v42, %v5928_v63 }
 0x490   :  { %v2421_v19 = vadd.f32 %v2351_v61, %v5928_v63  ;;  %v2290_v5 = vrot.slane %v2230_v6, %v5057_v46  ;;  %v2423_v41 = vadd.f32 %v2355_v14, %v5928_v63  ;;  %v2425_v62 = vadd.f32 %v2359_v33, %v5928_v63 }
 0x491   :  { %vm2445_vm5 = vcmp.ge.f32.partialorder %v2413_v7, 0.0  ;;  %v2477_v32 = vmul.f32 0.2, %v2413_v7  ;;  %v2479_v50 = vmul.f32 0.2, %v2415_v58  ;;  %vm2447_vm14 = vcmp.ge.f32.partialorder %v2415_v58, 0.0 }
 0x492   :  { %v2481_v20 = vmul.f32 0.2, %v2417_v54  ;;  %vm2449_vm0 = vcmp.ge.f32.partialorder %v2417_v54, 0.0  ;;  %v2483_v11 = vmul.f32 0.2, %v2419_v30  ;;  %vm2451_vm2 = vcmp.ge.f32.partialorder %v2419_v30, 0.0 }
 0x493   :  { %v2509_v26 = vsel %vm2445_vm5, %v2413_v7, %v2477_v32  ;;  %v2511_v35 = vsel %vm2447_vm14, %v2415_v58, %v2479_v50  ;;  %v2485_v27 = vmul.f32 0.2, %v2421_v19  ;;  %v2298_v22 = vcombine.high %v2290_v5, %v2290_v5 }
 0x494   :  { %4205 = vmatmul.mubr.f32.vlgmr.msra.gmra.mrb[32].mxu0 %v2509_v26  ;;  %v2513_v0 = vsel %vm2449_vm0, %v2417_v54, %v2481_v20  ;;  %v2515_v31 = vsel %vm2451_vm2, %v2419_v30, %v2483_v11  ;;  %v2306_v1 = vrot.slane %v2290_v5, %v5057_v46  ;;  %vm2453_vm4 = vcmp.ge.f32.partialorder %v2421_v19, 0.0 }
 0x495   :  { %4207 = vmatprep.mubr.f32.mxu0 %v2510_v44  ;;  %vm2454_vm5 = vcmp.ge.f32.partialorder %v2422_v23, 0.0  ;;  %v2517_v51 = vsel %vm2453_vm4, %v2421_v19, %v2485_v27  ;;  %v2487_v36 = vmul.f32 0.2, %v2423_v41  ;;  %v2320_v15 = vrot.slane %v2298_v22, %v5057_v46 }
 0x496   :  { %v2367_v16 = vrot.slane %v2306_v1, %v6723_v34  ;;  %v2518_v13 = vsel %vm2454_vm5, %v2422_v23, %v2486_v25  ;;  %vm2455_vm14 = vcmp.ge.f32.partialorder %v2423_v41, 0.0  ;;  %v2283_v21 = vcombine.high %v2230_v6, %v2230_v6 }
 0x497   :  { %v2328_v9 = vcombine.high %v2306_v1, %v2306_v1  ;;  %v2520_v38 = vsel %vm2456_vm13, %v2424_v48, %v2488_v56  ;;  %v2519_v12 = vsel %vm2455_vm14, %v2423_v41, %v2487_v36  ;;  %v2489_v8 = vmul.f32 0.2, %v2425_v62 }
 0x498   :  { %4208 = vmatmul.mubr.f32.gmra.mrb[34].mxu0 %v2511_v35  ;;  %v2427_v28 = vadd.f32 %v2363_v39, %v5928_v63  ;;  %vm2457_vm15 = vcmp.ge.f32.partialorder %v2425_v62, 0.0  ;;  %vm2458_vm0 = vcmp.ge.f32.partialorder %v2426_v29, 0.0  ;;  %v2428_v57 = vadd.f32 %v2367_v16, %v5919_v45 }
 0x499   :  { %4210 = vmatprep.mubr.f32.mxu0 %v2512_v55  ;;  %v2371_v17 = vrot.slane %v2320_v15, %v6723_v34  ;;  %v2297_v43 = vrot.slane %v2283_v21, %v5057_v46  ;;  %v2330_v59 = vcombine.high %v2320_v15, %v2320_v15  ;;  %v2521_v7 = vsel %vm2457_vm15, %v2425_v62, %v2489_v8 }
 0x49a   :  { %v2522_v58 = vsel %vm2458_vm0, %v2426_v29, %v2490_v52  ;;  %v2491_v37 = vmul.f32 0.2, %v2427_v28  ;;  %v2429_v4 = vadd.f32 %v2367_v16, %v5928_v63  ;;  %vm2459_vm1 = vcmp.ge.f32.partialorder %v2427_v28, 0.0 }
 0x49b   :  { %v2492_v42 = vmul.f32 0.2, %v2428_v57  ;;  %v2430_v32 = vadd.f32 %v2371_v17, %v5919_v45  ;;  %v2375_v2 = vrot.slane %v2328_v9, %v6723_v34  ;;  %vm2460_vm2 = vcmp.ge.f32.partialorder %v2428_v57, 0.0 }
 0x49c   :  { %4211 = vmatmul.mubr.f32.gmra.mrb[36].mxu0 %v2513_v0  ;;  %v2299_v26 = vcombine.high %v2297_v43, %v2297_v43  ;;  %v2313_v50 = vrot.slane %v2297_v43, %v5057_v46  ;;  %v2523_v54 = vsel %vm2459_vm1, %v2427_v28, %v2491_v37  ;;  %vm2461_vm3 = vcmp.ge.f32.partialorder %v2429_v4, 0.0  ;;  %v6724_v37 = vld [vmem:[#allocation19_spill] sm:$0xff] }
 0x49d   :  { %4213 = vmatprep.mubr.f32.mxu0 %v2514_v60  ;;  %v2493_v61 = vmul.f32 0.2, %v2429_v4  ;;  %v2431_v44 = vadd.f32 %v2371_v17, %v5928_v63  ;;  %v2524_v18 = vsel %vm2460_vm2, %v2428_v57, %v2492_v42  ;;  %v2494_v53 = vmul.f32 0.2, %v2430_v32 }
 0x49e   :  { %v2432_v40 = vadd.f32 %v2375_v2, %v5919_v45  ;;  %v2379_v14 = vrot.slane %v2330_v59, %v6723_v34  ;;  %vm2462_vm4 = vcmp.ge.f32.partialorder %v2430_v32, 0.0  ;;  %v2433_v35 = vadd.f32 %v2375_v2, %v5928_v63 }
 0x49f   :  { %v2327_v20 = vrot.slane %v2299_v26, %v5057_v46  ;;  %v2525_v30 = vsel %vm2461_vm3, %v2429_v4, %v2493_v61  ;;  %v2495_v49 = vmul.f32 0.2, %v2431_v44  ;;  %v2383_v6 = vrot.slane %v2313_v50, %v6723_v34 }
 0x4a0   :  { %4214 = vmatmul.mubr.f32.gmra.mrb[38].mxu0 %v2515_v31  ;;  %v2526_v55 = vsel %vm2462_vm4, %v2430_v32, %v2494_v53  ;;  %vm2463_vm5 = vcmp.ge.f32.partialorder %v2431_v44, 0.0  ;;  %v2496_v24 = vmul.f32 0.2, %v2432_v40  ;;  %v2434_v23 = vadd.f32 %v2379_v14, %v5919_v45  ;;  %v6725_v32 = vld [vmem:[#allocation17_spill] sm:$0xff] }
 0x4a1   :  { %4216 = vmatprep.mubr.f32.mxu0 %v2516_v3  ;;  %vm2464_vm13 = vcmp.ge.f32.partialorder %v2432_v40, 0.0  ;;  %v2497_v33 = vmul.f32 0.2, %v2433_v35  ;;  %v2527_v0 = vsel %vm2463_vm5, %v2431_v44, %v2495_v49  ;;  %vm2465_vm14 = vcmp.ge.f32.partialorder %v2433_v35, 0.0  ;;  %v6726_v44 = vld [vmem:[#allocation18_spill] sm:$0xff] }
 0x4a2   :  { %v2435_v11 = vadd.f32 %v2379_v14, %v5928_v63  ;;  %v2436_v19 = vadd.f32 %v2383_v6, %v5919_v45  ;;  %v2329_v46 = vcombine.high %v2313_v50, %v2313_v50  ;;  %v2528_v10 = vsel %vm2464_vm13, %v2432_v40, %v2496_v24  ;;  %v6727_v40 = vld [vmem:[#allocation16_spill] sm:$0xff] }
 0x4a3   :  { %v2498_v5 = vmul.f32 0.2, %v2434_v23  ;;  %v2387_v60 = vrot.slane %v2327_v20, %v6723_v34  ;;  %vm2466_vm15 = vcmp.ge.f32.partialorder %v2434_v23, 0.0  ;;  %v2529_v47 = vsel %vm2465_vm14, %v2433_v35, %v2497_v33  ;;  %v6728_v24 = vld [vmem:[#allocation20_spill] sm:$0xff] }
 0x4a4   :  { %4217 = vmatmul.mubr.f32.gmra.mrb[40].mxu0 %v2517_v51  ;;  %vm2467_vm0 = vcmp.ge.f32.partialorder %v2435_v11, 0.0  ;;  %v2499_v25 = vmul.f32 0.2, %v2435_v11  ;;  %v2500_v48 = vmul.f32 0.2, %v2436_v19  ;;  %v2437_v31 = vadd.f32 %v2383_v6, %v5928_v63 }
 0x4a5   :  { %4219 = vmatprep.mubr.f32.mxu0 %v2518_v13  ;;  %v2530_v27 = vsel %vm2466_vm15, %v2434_v23, %v2498_v5  ;;  %v2438_v41 = vadd.f32 %v2387_v60, %v5919_v45  ;;  %v2391_v39 = vrot.slane %v2329_v46, %v6723_v34  ;;  %v2331_v22 = vcombine.high %v2327_v20, %v2327_v20 }
 0x4a6   :  { %vm2468_vm1 = vcmp.ge.f32.partialorder %v2436_v19, 0.0  ;;  %v2531_v1 = vsel %vm2467_vm0, %v2435_v11, %v2499_v25  ;;  %vm2469_vm2 = vcmp.ge.f32.partialorder %v2437_v31, 0.0  ;;  %v2501_v3 = vmul.f32 0.2, %v2437_v31 }
 0x4a7   :  { %v2439_v56 = vadd.f32 %v2387_v60, %v5928_v63  ;;  %v2532_v51 = vsel %vm2468_vm1, %v2436_v19, %v2500_v48  ;;  %v2502_v36 = vmul.f32 0.2, %v2438_v41  ;;  %v2440_v62 = vadd.f32 %v2391_v39, %v5919_v45 }
 0x4a8   :  { %4220 = vmatmul.mubr.f32.gmra.mrb[42].mxu0 %v2519_v12  ;;  %v2395_v29 = vrot.slane %v2331_v22, %v6723_v34  ;;  %vm2470_vm3 = vcmp.ge.f32.partialorder %v2438_v41, 0.0  ;;  %v2533_v15 = vsel %vm2469_vm2, %v2437_v31, %v2501_v3  ;;  %v2441_v13 = vadd.f32 %v2391_v39, %v5928_v63  ;;  %v6730_v31 = vld [vmem:[#allocation22_spill] sm:$0xff]  ;;  %v6731_v39 = vld [vmem:[#allocation23_spill] sm:$0xff] }
 0x4a9   :  { %4222 = vmatprep.mubr.f32.mxu0 %v2520_v38  ;;  %v2503_v16 = vmul.f32 0.2, %v2439_v56  ;;  %v2534_v21 = vsel %vm2470_vm3, %v2438_v41, %v2502_v36  ;;  %vm2471_vm4 = vcmp.ge.f32.partialorder %v2439_v56, 0.0  ;;  %v2504_v9 = vmul.f32 0.2, %v2440_v62 }
 0x4aa   :  { %v2442_v38 = vadd.f32 %v2395_v29, %v5919_v45  ;;  %vm2472_vm5 = vcmp.ge.f32.partialorder %v2440_v62, 0.0  ;;  %v2505_v8 = vmul.f32 0.2, %v2441_v13  ;;  %v2443_v52 = vadd.f32 %v2395_v29, %v5928_v63 }
 0x4ab   :  { %v2535_v12 = vsel %vm2471_vm4, %v2439_v56, %v2503_v16  ;;  %v2536_v34 = vsel %vm2472_vm5, %v2440_v62, %v2504_v9  ;;  %vm2473_vm13 = vcmp.ge.f32.partialorder %v2441_v13, 0.0  ;;  %vm2797_vm0 = vcmask 7168   ;;  %v6732_v9 = vld [vmem:[#allocation24_spill] sm:$0xff] }
 0x4ac   :  { %4223 = vmatmul.mubr.f32.gmra.mrb[44].mxu0 %v2521_v7  ;;  %v2506_v28 = vmul.f32 0.2, %v2442_v38  ;;  %vm2474_vm14 = vcmp.ge.f32.partialorder %v2442_v38, 0.0  ;;  %v2537_v57 = vsel %vm2473_vm13, %v2441_v13, %v2505_v8  ;;  %v2507_v17 = vmul.f32 0.2, %v2443_v52 }
 0x4ad   :  { %4225 = vmatprep.mubr.f32.mxu0 %v2522_v58  ;;  %vm2475_vm15 = vcmp.ge.f32.partialorder %v2443_v52, 0.0  ;;  %v4759_v7 = vmov 0  }
 0x4ae   :  { %v2538_v43 = vsel %vm2474_vm14, %v2442_v38, %v2506_v28  ;;  %v2539_v59 = vsel %vm2475_vm15, %v2443_v52, %v2507_v17  ;;  %4401 = vset.pattern.permute.xlu0 %v4759_v7  ;;  %4400 = vset.pattern.permute.xlu1 %v4759_v7 }
 0x4b0   :  { %4226 = vmatmul.mubr.f32.gmra.mrb[46].mxu0 %v2523_v54 }
 0x4b1   :  { %4228 = vmatprep.mubr.f32.mxu0 %v2524_v18 }
 0x4b4   :  { %4229 = vmatmul.mubr.f32.gmra.mrb[48].mxu0 %v2525_v30 }
 0x4b5   :  { %4231 = vmatprep.mubr.f32.mxu0 %v2526_v55 }
 0x4b8   :  { %4232 = vmatmul.mubr.f32.gmra.mrb[50].mxu0 %v2527_v0  ;;  %v6729_v0 = vld [vmem:[#allocation21_spill] sm:$0xff] }
 0x4b9   :  { %4234 = vmatprep.mubr.f32.mxu0 %v2528_v10 }
 0x4bc   :  { %4235 = vmatmul.mubr.f32.gmra.mrb[52].mxu0 %v2529_v47 }
 0x4bd   :  { %4237 = vmatprep.mubr.f32.mxu0 %v2530_v27 }
 0x4c0   :  { %4238 = vmatmul.mubr.f32.gmra.mrb[54].mxu0 %v2531_v1 }
 0x4c1   :  { %4240 = vmatprep.mubr.f32.mxu0 %v2532_v51 }
 0x4c4   :  { %4241 = vmatmul.mubr.f32.gmra.mrb[56].mxu0 %v2533_v15 }
 0x4c5   :  { %4243 = vmatprep.mubr.f32.mxu0 %v2534_v21 }
 0x4c8   :  { %4244 = vmatmul.mubr.f32.gmra.mrb[58].mxu0 %v2535_v12  ;;  %v6733_v12 = vld [vmem:[#allocation25_spill] sm:$0xff] }
 0x4c9   :  { %4246 = vmatprep.mubr.f32.mxu0 %v2536_v34 }
 0x4cc   :  { %4247 = vmatmul.mubr.f32.gmra.mrb[60].mxu0 %v2537_v57 }
 0x4cd   :  { %4249 = vmatprep.mubr.f32.mxu0 %v2538_v43 }
 0x4d0   :  { %4250 = vmatmul.mubr.f32.gmra.mrb[62].mxu0 %v2539_v59 }
 0x567   :  { %v4206_v58 = vpop.f32.mrb[32].mxu0 }
 0x568   :  { %v2766_v4 = vadd.f32 %v4206_v58, %v6724_v37  ;;  %v2606_v42 = vpop.f32.mrb[33].mxu0 }
 0x569   :  { %v2765_v2 = vadd.f32 %v2606_v42, %v6725_v32 }
 0x56a   :  { %v2799_v26 = vsel %vm2797_vm0, %v2766_v4, -inf }
 0x56b   :  { %v2798_v50 = vsel %vm2797_vm0, %v2765_v2, -inf  ;;  %v4209_v54 = vpop.f32.mrb[34].mxu0 }
 0x56c   :  { %v2800_v61 = vmax.f32 %v2798_v50, %v2799_v26  ;;  %v5986_v18 = vadd.f32 %v4209_v54, %v6726_v44  ;;  %v2616_v53 = vpop.f32.mrb[35].mxu0 }
 0x56d   :  { %v2767_v14 = vadd.f32 %v2616_v53, %v6727_v40 }
 0x56e   :  { %v2801_v35 = vrot.slane %v2800_v61, 4  ;;  %v2808_v20 = vsel %vm2797_vm0, %v5986_v18, -inf }
 0x56f   :  { %v2807_v30 = vsel %vm2797_vm0, %v2767_v14, -inf  ;;  %v4212_v49 = vpop.f32.mrb[36].mxu0 }
 0x570   :  { %v2802_v6 = vmax.f32 %v2800_v61, %v2801_v35  ;;  %v2809_v55 = vmax.f32 %v2807_v30, %v2808_v20  ;;  %v5993_v23 = vadd.f32 %v4212_v49, %v6728_v24  ;;  %v2626_v33 = vpop.f32.mrb[37].mxu0  ;;  %v6734_v61 = vld [vmem:[#allocation26_spill] sm:$0xff] }
 0x571   :  { %v5996_v11 = vadd.f32 %v2626_v33, %v6729_v0 }
 0x572   :  { %v2803_v19 = vrot.slane %v2802_v6, 2  ;;  %v2810_v46 = vrot.slane %v2809_v55, 4  ;;  %v2817_v10 = vsel %vm2797_vm0, %v5993_v23, -inf }
 0x573   :  { %v2816_v5 = vsel %vm2797_vm0, %v5996_v11, -inf  ;;  %v4215_v60 = vpop.f32.mrb[38].mxu0 }
 0x574   :  { %v2804_v47 = vmax.f32 %v2802_v6, %v2803_v19  ;;  %v2811_v25 = vmax.f32 %v2809_v55, %v2810_v46  ;;  %v2818_v48 = vmax.f32 %v2816_v5, %v2817_v10  ;;  %v6003_v27 = vadd.f32 %v4215_v60, %v6730_v31  ;;  %v2636_v41 = vpop.f32.mrb[39].mxu0  ;;  %v6736_v5 = vld [vmem:[#allocation28_spill] sm:$0xff] }
 0x575   :  { %v6006_v22 = vadd.f32 %v2636_v41, %v6731_v39 }
 0x576   :  { %v2805_v1 = vrot.slane %v2804_v47, 1  ;;  %v2812_v3 = vrot.slane %v2811_v25, 2  ;;  %v2819_v56 = vrot.slane %v2818_v48, 4  ;;  %v2826_v51 = vsel %vm2797_vm0, %v6003_v27, -inf }
 0x577   :  { %v2825_v36 = vsel %vm2797_vm0, %v6006_v22, -inf  ;;  %v4218_v62 = vpop.f32.mrb[40].mxu0 }
 0x578   :  { %v2806_v29 = vmax.f32 %v2804_v47, %v2805_v1  ;;  %v2813_v15 = vmax.f32 %v2811_v25, %v2812_v3  ;;  %v2820_v16 = vmax.f32 %v2818_v48, %v2819_v56  ;;  %v2827_v13 = vmax.f32 %v2825_v36, %v2826_v51  ;;  %v2646_v21 = vpop.f32.mrb[41].mxu0  ;;  %v6737_v25 = vld [vmem:[#allocation29_spill] sm:$0xff] }
 0x579   :  { %v6013_v38 = vadd.f32 %v4218_v62, %v6732_v9  ;;  %v6016_v8 = vadd.f32 %v2646_v21, %v6733_v12  ;;  %v6739_v21 = vld [vmem:[#allocation31_spill] sm:$0xff] }
 0x57a   :  { %v2942_v52 = vsub.f32 %v2765_v2, %v2806_v29  ;;  %v2943_v34 = vsub.f32 %v2766_v4, %v2806_v29  ;;  %v2814_v28 = vrot.slane %v2813_v15, 1  ;;  %v2821_v57 = vrot.slane %v2820_v16, 2  ;;  %v6735_v4 = vld [vmem:[#allocation27_spill] sm:$0xff] }
 0x57b   :  { %v2828_v17 = vrot.slane %v2827_v13, 4  ;;  %v2835_v43 = vsel %vm2797_vm0, %v6013_v38, -inf  ;;  %v2834_v59 = vsel %vm2797_vm0, %v6016_v8, -inf  ;;  %v4221_v7 = vpop.f32.mrb[42].mxu0 }
 0x57c   :  { %v2974_v58 = vmul.f32 1.442695, %v2942_v52  ;;  %v2976_v37 = vmul.f32 1.442695, %v2943_v34  ;;  %v2815_v42 = vmax.f32 %v2813_v15, %v2814_v28  ;;  %v2822_v32 = vmax.f32 %v2820_v16, %v2821_v57  ;;  %v2656_v26 = vpop.f32.mrb[43].mxu0  ;;  %v6738_v16 = vld [vmem:[#allocation30_spill] sm:$0xff] }
 0x57d   :  { %v2829_v50 = vmax.f32 %v2827_v13, %v2828_v17  ;;  %v2836_v54 = vmax.f32 %v2834_v59, %v2835_v43  ;;  %v6023_v2 = vadd.f32 %v4221_v7, %v6734_v61  ;;  %v6026_v44 = vadd.f32 %v2656_v26, %v6735_v4 }
 0x57e   :  { %4498 = vpow2.f32 %v2974_v58  ;;  %v2944_v53 = vsub.f32 %v2767_v14, %v2815_v42  ;;  %v2945_v40 = vsub.f32 %v5986_v18, %v2815_v42  ;;  %v2823_v35 = vrot.slane %v2822_v32, 1 }
 0x57f   :  { %4500 = vpow2.f32 %v2976_v37  ;;  %v2830_v20 = vrot.slane %v2829_v50, 2  ;;  %v2837_v30 = vrot.slane %v2836_v54, 4  ;;  %v2844_v49 = vsel %vm2797_vm0, %v6023_v2, -inf  ;;  %v4224_v6 = vpop.f32.mrb[44].mxu0 }
 0x580   :  { %v2978_v55 = vmul.f32 1.442695, %v2944_v53  ;;  %v2980_v24 = vmul.f32 1.442695, %v2945_v40  ;;  %v2824_v33 = vmax.f32 %v2822_v32, %v2823_v35  ;;  %v2843_v0 = vsel %vm2797_vm0, %v6026_v44, -inf  ;;  %v2666_v19 = vpop.f32.mrb[45].mxu0 }
 0x581   :  { %v2831_v46 = vmax.f32 %v2829_v50, %v2830_v20  ;;  %v2838_v10 = vmax.f32 %v2836_v54, %v2837_v30  ;;  %v2845_v14 = vmax.f32 %v2843_v0, %v2844_v49  ;;  %v6034_v18 = vadd.f32 %v4224_v6, %v6736_v5 }
 0x582   :  { %4502 = vpow2.f32 %v2978_v55  ;;  %v2946_v60 = vsub.f32 %v5996_v11, %v2824_v33  ;;  %v2947_v47 = vsub.f32 %v5993_v23, %v2824_v33  ;;  %v6039_v48 = vadd.f32 %v2666_v19, %v6737_v25 }
 0x583   :  { %4504 = vpow2.f32 %v2980_v24  ;;  %v2832_v31 = vrot.slane %v2831_v46, 1  ;;  %v2839_v41 = vrot.slane %v2838_v10, 2  ;;  %v2846_v39 = vrot.slane %v2845_v14, 4  ;;  %v4227_v1 = vpop.f32.mrb[46].mxu0 }
 0x584   :  { %v2982_v3 = vmul.f32 1.442695, %v2946_v60  ;;  %v2984_v56 = vmul.f32 1.442695, %v2947_v47  ;;  %v2853_v51 = vsel %vm2797_vm0, %v6034_v18, -inf  ;;  %v2852_v36 = vsel %vm2797_vm0, %v6039_v48, -inf }
 0x585   :  { %v2833_v62 = vmax.f32 %v2831_v46, %v2832_v31  ;;  %v2840_v11 = vmax.f32 %v2838_v10, %v2839_v41  ;;  %v2847_v29 = vmax.f32 %v2845_v14, %v2846_v39  ;;  %v2854_v23 = vmax.f32 %v2852_v36, %v2853_v51  ;;  %v2676_v15 = vpop.f32.mrb[47].mxu0  ;;  %v6740_v47 = vld [vmem:[#allocation32_spill] sm:$0xff] }
 0x586   :  { %4506 = vpow2.f32 %v2982_v3  ;;  %v6046_v13 = vadd.f32 %v4227_v1, %v6738_v16  ;;  %v6049_v9 = vadd.f32 %v2676_v15, %v6739_v21 }
 0x587   :  { %4508 = vpow2.f32 %v2984_v56  ;;  %v2948_v12 = vsub.f32 %v6006_v22, %v2833_v62  ;;  %v2949_v52 = vsub.f32 %v6003_v27, %v2833_v62  ;;  %v2841_v34 = vrot.slane %v2840_v11, 1  ;;  %v4230_v28 = vpop.f32.mrb[48].mxu0 }
 0x588   :  { %v6053_v57 = vpop.eup %4498  ;;  %v2848_v17 = vrot.slane %v2847_v29, 2  ;;  %v2855_v43 = vrot.slane %v2854_v23, 4  ;;  %v2862_v59 = vsel %vm2797_vm0, %v6046_v13, -inf  ;;  %v2861_v7 = vsel %vm2797_vm0, %v6049_v9, -inf  ;;  %v2686_v58 = vpop.f32.mrb[49].mxu0 }
 0x589   :  { %v6059_v37 = vpop.eup %4500  ;;  %v3038_v22 = vsel %vm2797_vm0, %v6053_v57, 0.0  ;;  %v2986_v42 = vmul.f32 1.442695, %v2948_v12  ;;  %v2988_v27 = vmul.f32 1.442695, %v2949_v52  ;;  %v2842_v32 = vmax.f32 %v2840_v11, %v2841_v34  ;;  %v6741_v52 = vld [vmem:[#allocation33_spill] sm:$0xff] }
 0x58a   :  { %v3039_v26 = vsel %vm2797_vm0, %v6059_v37, 0.0  ;;  %v2849_v50 = vmax.f32 %v2847_v29, %v2848_v17  ;;  %v2856_v54 = vmax.f32 %v2854_v23, %v2855_v43  ;;  %v2863_v61 = vmax.f32 %v2861_v7, %v2862_v59  ;;  %v6742_v59 = vld [vmem:[#allocation34_spill] sm:$0xff] }
 0x58b   :  { %v3040_v4 = vadd.f32 %v3039_v26, %v3038_v22  ;;  %4510 = vpow2.f32 %v2986_v42  ;;  %v2950_v53 = vsub.f32 %v6016_v8, %v2842_v32  ;;  %v2951_v40 = vsub.f32 %v6013_v38, %v2842_v32  ;;  %v4233_v35 = vpop.f32.mrb[50].mxu0 }
 0x58c   :  { %v6067_v20 = vpop.eup %4502  ;;  %4512 = vpow2.f32 %v2988_v27  ;;  %v2850_v30 = vrot.slane %v2849_v50, 1  ;;  %v2857_v49 = vrot.slane %v2856_v54, 2  ;;  %v2864_v6 = vrot.slane %v2863_v61, 4  ;;  %v2696_v55 = vpop.f32.mrb[51].mxu0 }
 0x58d   :  { %v6069_v24 = vpop.eup %4504  ;;  %v3041_v33 = vrot.slane %v3040_v4, 4  ;;  %v3047_v0 = vsel %vm2797_vm0, %v6067_v20, 0.0  ;;  %v2990_v19 = vmul.f32 1.442695, %v2950_v53  ;;  %v2992_v46 = vmul.f32 1.442695, %v2951_v40 }
 0x58e   :  { %v3048_v8 = vsel %vm2797_vm0, %v6069_v24, 0.0  ;;  %v2851_v38 = vmax.f32 %v2849_v50, %v2850_v30  ;;  %v2858_v10 = vmax.f32 %v2856_v54, %v2857_v49  ;;  %v2865_v14 = vmax.f32 %v2863_v61, %v2864_v6  ;;  %v6743_v6 = vld [vmem:[#allocation35_spill] sm:$0xff] }
 0x58f   :  { %v6075_v5 = vadd.f32 %v3041_v33, %v3040_v4  ;;  %v3049_v60 = vadd.f32 %v3048_v8, %v3047_v0  ;;  %4514 = vpow2.f32 %v2990_v19  ;;  %v6078_v25 = vadd.f32 %v4230_v28, %v6740_v47  ;;  %v4236_v31 = vpop.f32.mrb[52].mxu0 }
 0x590   :  { %v6080_v41 = vpop.eup %4506  ;;  %4516 = vpow2.f32 %v2992_v46  ;;  %v2952_v39 = vsub.f32 %v6026_v44, %v2851_v38  ;;  %v2953_v1 = vsub.f32 %v6023_v2, %v2851_v38  ;;  %v2859_v3 = vrot.slane %v2858_v10, 1  ;;  %v2706_v56 = vpop.f32.mrb[53].mxu0  ;;  %v6744_v38 = vld [vmem:[#allocation36_spill] sm:$0xff] }
 0x591   :  { %v6084_v51 = vpop.eup %4508  ;;  %v3050_v36 = vrot.slane %v3049_v60, 4  ;;  %v3056_v62 = vsel %vm2797_vm0, %v6080_v41, 0.0  ;;  %v2866_v11 = vrot.slane %v2865_v14, 2  ;;  %v2871_v29 = vsel %vm2797_vm0, %v6078_v25, -inf }
 0x592   :  { %v3057_v23 = vsel %vm2797_vm0, %v6084_v51, 0.0  ;;  %v2994_v15 = vmul.f32 1.442695, %v2952_v39  ;;  %v2996_v16 = vmul.f32 1.442695, %v2953_v1  ;;  %v2860_v44 = vmax.f32 %v2858_v10, %v2859_v3 }
 0x593   :  { %v6092_v21 = vadd.f32 %v3050_v36, %v3049_v60  ;;  %v3058_v2 = vadd.f32 %v3057_v23, %v3056_v62  ;;  %v2867_v12 = vmax.f32 %v2865_v14, %v2866_v11  ;;  %v6095_v34 = vadd.f32 %v2686_v58, %v6741_v52  ;;  %v4239_v28 = vpop.f32.mrb[54].mxu0 }
 0x594   :  { %4518 = vpow2.f32 %v2994_v15  ;;  %v2954_v17 = vsub.f32 %v6039_v48, %v2860_v44  ;;  %v2955_v43 = vsub.f32 %v6034_v18, %v2860_v44  ;;  %v6100_v7 = vadd.f32 %v4233_v35, %v6742_v59  ;;  %v2716_v22 = vpop.f32.mrb[55].mxu0  ;;  %v6747_v59 = vld [vmem:[#allocation39_spill] sm:$0xff] }
 0x595   :  { %v6102_v42 = vpop.eup %4510  ;;  %v3059_v27 = vrot.slane %v3058_v2, 4  ;;  %4520 = vpow2.f32 %v2996_v16  ;;  %v2868_v32 = vrot.slane %v2867_v12, 1  ;;  %v2870_v26 = vsel %vm2797_vm0, %v6095_v34, -inf  ;;  %v6745_v16 = vld [vmem:[#allocation37_spill] sm:$0xff] }
 0x596   :  { %v6106_v58 = vpop.eup %4512  ;;  %v3065_v50 = vsel %vm2797_vm0, %v6102_v42, 0.0  ;;  %v2998_v48 = vmul.f32 1.442695, %v2954_v17  ;;  %v3000_v54 = vmul.f32 1.442695, %v2955_v43  ;;  %v2872_v18 = vmax.f32 %v2870_v26, %v2871_v29 }
 0x597   :  { %v6110_v61 = vadd.f32 %v3059_v27, %v3058_v2  ;;  %v3066_v4 = vsel %vm2797_vm0, %v6106_v58, 0.0  ;;  %v2869_v53 = vmax.f32 %v2867_v12, %v2868_v32  ;;  %v2880_v40 = vsel %vm2797_vm0, %v6100_v7, -inf  ;;  %v4242_v35 = vpop.f32.mrb[56].mxu0  ;;  %v6746_v2 = vld [vmem:[#allocation38_spill] sm:$0xff] }
 0x598   :  { %v3067_v30 = vadd.f32 %v3066_v4, %v3065_v50  ;;  %4522 = vpow2.f32 %v2998_v48  ;;  %v2873_v49 = vrot.slane %v2872_v18, 4  ;;  %v6117_v33 = vadd.f32 %v2696_v55, %v6743_v6  ;;  %v2726_v0 = vpop.f32.mrb[57].mxu0  ;;  %v6748_v6 = vld [vmem:[#allocation40_spill] sm:$0xff] }
 0x599   :  { %v6119_v19 = vpop.eup %4514  ;;  %4524 = vpow2.f32 %v3000_v54  ;;  %v2956_v46 = vsub.f32 %v6049_v9, %v2869_v53  ;;  %v2957_v8 = vsub.f32 %v6046_v13, %v2869_v53  ;;  %v6124_v10 = vadd.f32 %v4236_v31, %v6744_v38 }
 0x59a   :  { %v6126_v14 = vpop.eup %4516  ;;  %v3068_v60 = vrot.slane %v3067_v30, 4  ;;  %v3074_v47 = vsel %vm2797_vm0, %v6119_v19, 0.0  ;;  %v2874_v39 = vmax.f32 %v2872_v18, %v2873_v49  ;;  %v2879_v55 = vsel %vm2797_vm0, %v6117_v33, -inf }
 0x59b   :  { %v3075_v1 = vsel %vm2797_vm0, %v6126_v14, 0.0  ;;  %v3002_v3 = vmul.f32 1.442695, %v2956_v46  ;;  %v3004_v9 = vmul.f32 1.442695, %v2957_v8  ;;  %v2881_v36 = vmax.f32 %v2879_v55, %v2880_v40  ;;  %v6134_v13 = vpop.f32.mrb[58].mxu0 }
 0x59c   :  { %v6136_v31 = vadd.f32 %v3068_v60, %v3067_v30  ;;  %v3076_v62 = vadd.f32 %v3075_v1, %v3074_v47  ;;  %v2875_v11 = vrot.slane %v2874_v39, 2  ;;  %v2889_v29 = vsel %vm2797_vm0, %v6124_v10, -inf  ;;  %v6140_v23 = vpop.f32.mrb[59].mxu0 }
 0x59d   :  { %4526 = vpow2.f32 %v3002_v3  ;;  %v2882_v15 = vrot.slane %v2881_v36, 4  ;;  %v6143_v44 = vadd.f32 %v2706_v56, %v6745_v16  ;;  %v6146_v12 = vadd.f32 %v4239_v28, %v6746_v2 }
 0x59e   :  { %v6148_v52 = vpop.eup %4518  ;;  %v3077_v17 = vrot.slane %v3076_v62, 4  ;;  %4528 = vpow2.f32 %v3004_v9  ;;  %v2876_v43 = vmax.f32 %v2874_v39, %v2875_v11  ;;  %v6151_v27 = vadd.f32 %v2716_v22, %v6747_v59  ;;  %v6749_v39 = vld [vmem:[#allocation41_spill] sm:$0xff] }
 0x59f   :  { %v6153_v32 = vpop.eup %4520  ;;  %v3083_v26 = vsel %vm2797_vm0, %v6148_v52, 0.0  ;;  %v2883_v50 = vmax.f32 %v2881_v36, %v2882_v15  ;;  %v2888_v56 = vsel %vm2797_vm0, %v6143_v44, -inf  ;;  %v2898_v28 = vsel %vm2797_vm0, %v6146_v12, -inf  ;;  %v6161_v48 = vpop.f32.mrb[60].mxu0 }
 0x5a0   :  { %v6163_v54 = vadd.f32 %v3077_v17, %v3076_v62  ;;  %v3084_v22 = vsel %vm2797_vm0, %v6153_v32, 0.0  ;;  %v2877_v18 = vrot.slane %v2876_v43, 1  ;;  %v2890_v4 = vmax.f32 %v2888_v56, %v2889_v29  ;;  %v6167_v53 = vpop.f32.mrb[61].mxu0 }
 0x5a1   :  { %v3085_v40 = vadd.f32 %v3084_v22, %v3083_v26  ;;  %v2884_v30 = vrot.slane %v2883_v50, 2  ;;  %v2897_v49 = vsel %vm2797_vm0, %v6151_v27, -inf  ;;  %v6172_v46 = vadd.f32 %v4242_v35, %v6748_v6  ;;  %v6750_v6 = vld [vmem:[#allocation42_spill] sm:$0xff] }
 0x5a2   :  { %v6174_v8 = vpop.eup %4522  ;;  %v2878_v38 = vmax.f32 %v2876_v43, %v2877_v18  ;;  %v2891_v60 = vrot.slane %v2890_v4, 4  ;;  %v2899_v47 = vmax.f32 %v2897_v49, %v2898_v28  ;;  %v6177_v55 = vadd.f32 %v2726_v0, %v6749_v39 }
 0x5a3   :  { %v6179_v1 = vpop.eup %4524  ;;  %v3086_v3 = vrot.slane %v3085_v40, 4  ;;  %v3092_v9 = vsel %vm2797_vm0, %v6174_v8, 0.0  ;;  %v2885_v36 = vmax.f32 %v2883_v50, %v2884_v30  ;;  %v2907_v62 = vsel %vm2797_vm0, %v6172_v46, -inf  ;;  %v4251_v35 = vpop.f32.mrb[62].mxu0 }
 0x5a4   :  { %v3093_v11 = vsel %vm2797_vm0, %v6179_v1, 0.0  ;;  %v2958_v29 = vsub.f32 %v6095_v34, %v2878_v38  ;;  %v2959_v15 = vsub.f32 %v6078_v25, %v2878_v38  ;;  %v2892_v0 = vmax.f32 %v2890_v4, %v2891_v60  ;;  %v2756_v16 = vpop.f32.mrb[63].mxu0 }
 0x5a5   :  { %v6189_v2 = vadd.f32 %v3086_v3, %v3085_v40  ;;  %v3094_v17 = vadd.f32 %v3093_v11, %v3092_v9  ;;  %v2886_v43 = vrot.slane %v2885_v36, 1  ;;  %v2900_v59 = vrot.slane %v2899_v47, 4 }
 0x5a6   :  { %v3006_v26 = vmul.f32 1.442695, %v2958_v29  ;;  %v3008_v50 = vmul.f32 1.442695, %v2959_v15  ;;  %v2893_v56 = vrot.slane %v2892_v0, 2  ;;  %v2906_v28 = vsel %vm2797_vm0, %v6177_v55, -inf }
 0x5a7   :  { %v6193_v22 = vpop.eup %4526  ;;  %v3095_v18 = vrot.slane %v3094_v17, 4  ;;  %v2887_v30 = vmax.f32 %v2885_v36, %v2886_v43  ;;  %v2901_v34 = vmax.f32 %v2899_v47, %v2900_v59  ;;  %v2908_v49 = vmax.f32 %v2906_v28, %v2907_v62 }
 0x5a8   :  { %v6195_v25 = vpop.eup %4528  ;;  %v3101_v4 = vsel %vm2797_vm0, %v6193_v22, 0.0  ;;  %4530 = vpow2.f32 %v3006_v26  ;;  %v2894_v40 = vmax.f32 %v2892_v0, %v2893_v56  ;;  %v6201_v38 = vadd.f32 %v6134_v13, %v6750_v6  ;;  %v6751_v13 = vld [vmem:[#allocation43_spill] sm:$0xff] }
 0x5a9   :  { %v6203_v60 = vadd.f32 %v3095_v18, %v3094_v17  ;;  %v3102_v39 = vsel %vm2797_vm0, %v6195_v25, 0.0  ;;  %4532 = vpow2.f32 %v3008_v50  ;;  %v2960_v47 = vsub.f32 %v6117_v33, %v2887_v30  ;;  %v6752_v50 = vld [vmem:[#allocation44_spill] sm:$0xff] }
 0x5aa   :  { %v3103_v3 = vadd.f32 %v3102_v39, %v3101_v4  ;;  %v2961_v9 = vsub.f32 %v6100_v7, %v2887_v30  ;;  %v2895_v36 = vrot.slane %v2894_v40, 1  ;;  %v2902_v62 = vrot.slane %v2901_v34, 2  ;;  %v6753_v39 = vld [vmem:[#allocation45_spill] sm:$0xff] }
 0x5ab   :  { %v3010_v11 = vmul.f32 1.442695, %v2960_v47  ;;  %v2909_v29 = vrot.slane %v2908_v49, 4  ;;  %v2916_v15 = vsel %vm2797_vm0, %v6201_v38, -inf  ;;  %v6213_v0 = vadd.f32 %v6140_v23, %v6751_v13 }
 0x5ac   :  { %v3104_v17 = vrot.slane %v3103_v3, 4  ;;  %v3012_v43 = vmul.f32 1.442695, %v2961_v9  ;;  %v2896_v59 = vmax.f32 %v2894_v40, %v2895_v36  ;;  %v2903_v26 = vmax.f32 %v2901_v34, %v2902_v62  ;;  %v6755_v62 = vld [vmem:[#allocation47_spill] sm:$0xff] }
 0x5ad   :  { %4534 = vpow2.f32 %v3010_v11  ;;  %v2910_v33 = vmax.f32 %v2908_v49, %v2909_v29  ;;  %v2915_v7 = vsel %vm2797_vm0, %v6213_v0, -inf  ;;  %v6219_v56 = vadd.f32 %v6161_v48, %v6752_v50  ;;  %v6754_v48 = vld [vmem:[#allocation46_spill] sm:$0xff] }
 0x5ae   :  { %v6221_v28 = vadd.f32 %v3104_v17, %v3103_v3  ;;  %4536 = vpow2.f32 %v3012_v43  ;;  %v2962_v18 = vsub.f32 %v6143_v44, %v2896_v59  ;;  %v2963_v23 = vsub.f32 %v6124_v10, %v2896_v59 }
 0x5af   :  { %v2904_v30 = vrot.slane %v2903_v26, 1  ;;  %v2911_v4 = vrot.slane %v2910_v33, 2  ;;  %v2917_v40 = vmax.f32 %v2915_v7, %v2916_v15  ;;  %v2925_v34 = vsel %vm2797_vm0, %v6219_v56, -inf }
 0x5b0   :  { %v3014_v49 = vmul.f32 1.442695, %v2962_v18  ;;  %v3016_v6 = vmul.f32 1.442695, %v2963_v23  ;;  %v6229_v47 = vadd.f32 %v6167_v53, %v6753_v39  ;;  %v6232_v3 = vadd.f32 %v4251_v35, %v6754_v48 }
 0x5b1   :  { %v2905_v9 = vmax.f32 %v2903_v26, %v2904_v30  ;;  %v2912_v36 = vmax.f32 %v2910_v33, %v2911_v4  ;;  %v2918_v44 = vrot.slane %v2917_v40, 4  ;;  %v6235_v10 = vadd.f32 %v2756_v16, %v6755_v62 }
 0x5b2   :  { %v6237_v11 = vpop.eup %4530  ;;  %4538 = vpow2.f32 %v3014_v49  ;;  %v2924_v29 = vsel %vm2797_vm0, %v6229_v47, -inf  ;;  %v2934_v15 = vsel %vm2797_vm0, %v6232_v3, -inf  ;;  %v3043_v53 = vrot.slane %v6075_v5, 2 }
 0x5b3   :  { %v6244_v13 = vpop.eup %4532  ;;  %v3110_v35 = vsel %vm2797_vm0, %v6237_v11, 0.0  ;;  %4540 = vpow2.f32 %v3016_v6  ;;  %v2964_v16 = vsub.f32 %v6151_v27, %v2905_v9  ;;  %v2965_v17 = vsub.f32 %v6146_v12, %v2905_v9 }
 0x5b4   :  { %v3111_v43 = vsel %vm2797_vm0, %v6244_v13, 0.0  ;;  %v2913_v59 = vrot.slane %v2912_v36, 1  ;;  %v2919_v26 = vmax.f32 %v2917_v40, %v2918_v44  ;;  %v2926_v33 = vmax.f32 %v2924_v29, %v2925_v34 }
 0x5b5   :  { %v3112_v7 = vadd.f32 %v3111_v43, %v3110_v35  ;;  %v3018_v50 = vmul.f32 1.442695, %v2964_v16  ;;  %v3020_v18 = vmul.f32 1.442695, %v2965_v17  ;;  %v2933_v23 = vsel %vm2797_vm0, %v6235_v10, -inf }
 0x5b6   :  { %v2914_v30 = vmax.f32 %v2912_v36, %v2913_v59  ;;  %v2920_v4 = vrot.slane %v2919_v26, 2  ;;  %v2927_v49 = vrot.slane %v2926_v33, 4  ;;  %v2935_v6 = vmax.f32 %v2933_v23, %v2934_v15 }
 0x5b7   :  { %v6254_v39 = vpop.eup %4534  ;;  %v3113_v27 = vrot.slane %v3112_v7, 4  ;;  %4542 = vpow2.f32 %v3018_v50  ;;  %v3044_v12 = vadd.f32 %v3043_v53, %v6075_v5  ;;  %v3052_v48 = vrot.slane %v6092_v21, 2 }
 0x5b8   :  { %v6258_v40 = vpop.eup %4536  ;;  %v3119_v34 = vsel %vm2797_vm0, %v6254_v39, 0.0  ;;  %4544 = vpow2.f32 %v3020_v18  ;;  %v2966_v9 = vsub.f32 %v6177_v55, %v2914_v30  ;;  %v2967_v36 = vsub.f32 %v6172_v46, %v2914_v30 }
 0x5b9   :  { %v6264_v44 = vadd.f32 %v3113_v27, %v3112_v7  ;;  %v3120_v62 = vsel %vm2797_vm0, %v6258_v40, 0.0  ;;  %v2921_v29 = vmax.f32 %v2919_v26, %v2920_v4  ;;  %v2928_v15 = vmax.f32 %v2926_v33, %v2927_v49 }
 0x5ba   :  { %v3121_v5 = vadd.f32 %v3120_v62, %v3119_v34  ;;  %v3022_v53 = vmul.f32 1.442695, %v2966_v9  ;;  %v3024_v35 = vmul.f32 1.442695, %v2967_v36  ;;  %v2936_v16 = vrot.slane %v2935_v6, 4 }
 0x5bb   :  { %v2922_v17 = vrot.slane %v2921_v29, 1  ;;  %v2929_v43 = vrot.slane %v2928_v15, 2  ;;  %v3045_v59 = vrot.slane %v3044_v12, 1  ;;  %v3053_v50 = vadd.f32 %v3052_v48, %v6092_v21 }
 0x5bc   :  { %v6269_v18 = vpop.eup %4538  ;;  %v3122_v55 = vrot.slane %v3121_v5, 4  ;;  %4546 = vpow2.f32 %v3022_v53  ;;  %v2937_v46 = vmax.f32 %v2935_v6, %v2936_v16  ;;  %v3061_v7 = vrot.slane %v6110_v61, 2 }
 0x5bd   :  { %v6272_v23 = vpop.eup %4540  ;;  %v3128_v26 = vsel %vm2797_vm0, %v6269_v18, 0.0  ;;  %4548 = vpow2.f32 %v3024_v35  ;;  %v2923_v33 = vmax.f32 %v2921_v29, %v2922_v17  ;;  %v2930_v30 = vmax.f32 %v2928_v15, %v2929_v43 }
 0x5be   :  { %v6276_v4 = vadd.f32 %v3122_v55, %v3121_v5  ;;  %v3129_v21 = vsel %vm2797_vm0, %v6272_v23, 0.0  ;;  %v2938_v49 = vrot.slane %v2937_v46, 2  ;;  %v3046_v27 = vadd.f32 %v3045_v59, %v3044_v12 }
 0x5bf   :  { %v3130_v48 = vadd.f32 %v3129_v21, %v3128_v26  ;;  %v2968_v6 = vsub.f32 %v6213_v0, %v2923_v33  ;;  %v2969_v34 = vsub.f32 %v6201_v38, %v2923_v33  ;;  %v2931_v9 = vrot.slane %v2930_v30, 1 }
 0x5c0   :  { %v2939_v36 = vmax.f32 %v2937_v46, %v2938_v49  ;;  %4550 = vrcp.f32 %v3046_v27  ;;  %v3054_v62 = vrot.slane %v3053_v50, 1  ;;  %v3062_v53 = vadd.f32 %v3061_v7, %v6110_v61 }
 0x5c1   :  { %v6283_v29 = vpop.eup %4542  ;;  %v3131_v15 = vrot.slane %v3130_v48, 4  ;;  %v3026_v5 = vmul.f32 1.442695, %v2968_v6  ;;  %v3028_v35 = vmul.f32 1.442695, %v2969_v34  ;;  %v2932_v16 = vmax.f32 %v2930_v30, %v2931_v9 }
 0x5c2   :  { %v6285_v17 = vpop.eup %4544  ;;  %v3137_v12 = vsel %vm2797_vm0, %v6283_v29, 0.0  ;;  %v2940_v0 = vrot.slane %v2939_v36, 1  ;;  %v3055_v43 = vadd.f32 %v3054_v62, %v3053_v50  ;;  %v3063_v38 = vrot.slane %v3062_v53, 1 }
 0x5c3   :  { %v6289_v59 = vadd.f32 %v3131_v15, %v3130_v48  ;;  %v3138_v55 = vsel %vm2797_vm0, %v6285_v17, 0.0  ;;  %4552 = vpow2.f32 %v3026_v5  ;;  %v2970_v61 = vsub.f32 %v6229_v47, %v2932_v16 }
 0x5c4   :  { %v3139_v46 = vadd.f32 %v3138_v55, %v3137_v12  ;;  %4554 = vpow2.f32 %v3028_v35  ;;  %v2971_v7 = vsub.f32 %v6219_v56, %v2932_v16  ;;  %v2941_v26 = vmax.f32 %v2939_v36, %v2940_v0 }
 0x5c5   :  { %v3030_v33 = vmul.f32 1.442695, %v2970_v61  ;;  %4556 = vrcp.f32 %v3055_v43  ;;  %v3064_v30 = vadd.f32 %v3063_v38, %v3062_v53  ;;  %v3070_v21 = vrot.slane %v6136_v31, 2 }
 0x5c6   :  { %v6296_v50 = vpop.eup %4546  ;;  %v3140_v49 = vrot.slane %v3139_v46, 4  ;;  %v3032_v27 = vmul.f32 1.442695, %v2971_v7  ;;  %v2972_v48 = vsub.f32 %v6235_v10, %v2941_v26  ;;  %v2973_v6 = vsub.f32 %v6232_v3, %v2941_v26 }
 0x5c7   :  { %v6300_v34 = vpop.eup %4548  ;;  %v3146_v47 = vsel %vm2797_vm0, %v6296_v50, 0.0  ;;  %4558 = vpow2.f32 %v3030_v33  ;;  %v3071_v56 = vadd.f32 %v3070_v21, %v6136_v31  ;;  %v3079_v9 = vrot.slane %v6163_v54, 2 }
 0x5c8   :  { %v6306_v36 = vadd.f32 %v3140_v49, %v3139_v46  ;;  %v3147_v62 = vsel %vm2797_vm0, %v6300_v34, 0.0  ;;  %4560 = vpow2.f32 %v3032_v27  ;;  %v3034_v53 = vmul.f32 1.442695, %v2972_v48 }
 0x5c9   :  { %v3148_v10 = vadd.f32 %v3147_v62, %v3146_v47  ;;  %v3036_v15 = vmul.f32 1.442695, %v2973_v6  ;;  %4562 = vrcp.f32 %v3064_v30  ;;  %v3072_v3 = vrot.slane %v3071_v56, 1 }
 0x5ca   :  { %v4551_v5 = vpop.eup %4550  ;;  %4564 = vpow2.f32 %v3034_v53  ;;  %v3080_v35 = vadd.f32 %v3079_v9, %v6163_v54  ;;  %v3088_v16 = vrot.slane %v6189_v2, 2  ;;  %v3097_v31 = vrot.slane %v6203_v60, 2 }
 0x5cb   :  { %v3149_v12 = vrot.slane %v3148_v10, 4  ;;  %4566 = vpow2.f32 %v3036_v15  ;;  %v3199_v0 = vmul.f32 %v4551_v5, %v6059_v37  ;;  %v3198_v43 = vmul.f32 %v4551_v5, %v6053_v57 }
 0x5cc   :  { %v3073_v38 = vadd.f32 %v3072_v3, %v3071_v56  ;;  %v3081_v55 = vrot.slane %v3080_v35, 1  ;;  %v3089_v61 = vadd.f32 %v3088_v16, %v6189_v2  ;;  %v3098_v46 = vadd.f32 %v3097_v31, %v6203_v60 }
 0x5cd   :  { %v6317_v7 = vpop.eup %4552  ;;  %v6319_v26 = vadd.f32 %v3149_v12, %v3148_v10  ;;  %3237 = vperm.xlu0 %4401, %v3199_v0   ;;  %3232 = vperm.xlu1 %4400, %v3198_v43   ;;  %v3106_v54 = vrot.slane %v6221_v28, 2  ;;  %v3115_v33 = vrot.slane %v6264_v44, 2  ;;  %v3124_v37 = vrot.slane %v6276_v4, 2 }
 0x5ce   :  { %v6324_v30 = vpop.eup %4554  ;;  %v3155_v57 = vsel %vm2797_vm0, %v6317_v7, 0.0  ;;  %4568 = vrcp.f32 %v3073_v38  ;;  %v3082_v2 = vadd.f32 %v3081_v55, %v3080_v35  ;;  %v3090_v60 = vrot.slane %v3089_v61, 1 }
 0x5cf   :  { %v4557_v21 = vpop.eup %4556  ;;  %v3156_v49 = vsel %vm2797_vm0, %v6324_v30, 0.0  ;;  %v3099_v27 = vrot.slane %v3098_v46, 1  ;;  %v3107_v48 = vadd.f32 %v3106_v54, %v6221_v28  ;;  %v3116_v6 = vadd.f32 %v3115_v33, %v6264_v44 }
 0x5d0   :  { %v3157_v47 = vadd.f32 %v3156_v49, %v3155_v57  ;;  %v3201_v56 = vmul.f32 %v4557_v21, %v6069_v24  ;;  %v3200_v9 = vmul.f32 %v4557_v21, %v6067_v20  ;;  %4570 = vrcp.f32 %v3082_v2 }
 0x5d1   :  { %v6334_v62 = vpop.eup %4558  ;;  %v3091_v53 = vadd.f32 %v3090_v60, %v3089_v61  ;;  %v3100_v10 = vadd.f32 %v3099_v27, %v3098_v46  ;;  %v3108_v15 = vrot.slane %v3107_v48, 1  ;;  %v3117_v3 = vrot.slane %v3116_v6, 1 }
 0x5d2   :  { %v6336_v5 = vpop.eup %4560  ;;  %v3158_v35 = vrot.slane %v3157_v47, 4  ;;  %v3164_v28 = vsel %vm2797_vm0, %v6334_v62, 0.0  ;;  %3247 = vperm.xlu1 %4400, %v3201_v56   ;;  %3242 = vperm.xlu0 %4401, %v3200_v9   ;;  %v3125_v44 = vadd.f32 %v3124_v37, %v6276_v4  ;;  %v3133_v24 = vrot.slane %v6289_v59, 2 }
 0x5d3   :  { %v4563_v20 = vpop.eup %4562  ;;  %v3165_v16 = vsel %vm2797_vm0, %v6336_v5, 0.0  ;;  %4572 = vrcp.f32 %v3091_v53  ;;  %v3109_v31 = vadd.f32 %v3108_v15, %v3107_v48  ;;  %v3118_v12 = vadd.f32 %v3117_v3, %v3116_v6 }
 0x5d4   :  { %v6344_v0 = vpop.eup %4564  ;;  %v3159_v43 = vadd.f32 %v3158_v35, %v3157_v47  ;;  %v3166_v38 = vadd.f32 %v3165_v16, %v3164_v28  ;;  %v3203_v55 = vmul.f32 %v4563_v20, %v6084_v51  ;;  %v3202_v61 = vmul.f32 %v4563_v20, %v6080_v41 }
 0x5d5   :  { %v6348_v46 = vpop.eup %4566  ;;  %v3173_v4 = vsel %vm2797_vm0, %v6344_v0, 0.0  ;;  %4574 = vrcp.f32 %v3100_v10  ;;  %v3126_v54 = vrot.slane %v3125_v44, 1  ;;  %v3134_v33 = vadd.f32 %v3133_v24, %v6289_v59 }
 0x5d6   :  { %v3167_v37 = vrot.slane %v3166_v38, 4  ;;  %v3174_v57 = vsel %vm2797_vm0, %v6348_v46, 0.0  ;;  %3257 = vperm.xlu0 %4401, %v3203_v55   ;;  %3252 = vperm.xlu1 %4400, %v3202_v61   ;;  %4576 = vrcp.f32 %v3109_v31  ;;  %v3142_v51 = vrot.slane %v6306_v36, 2 }
 0x5d7   :  { %v3175_v2 = vadd.f32 %v3174_v57, %v3173_v4  ;;  %4578 = vrcp.f32 %v3118_v12  ;;  %v3127_v41 = vadd.f32 %v3126_v54, %v3125_v44  ;;  %v3135_v60 = vrot.slane %v3134_v33, 1 }
 0x5d8   :  { %v4569_v21 = vpop.eup %4568  ;;  %v3168_v49 = vadd.f32 %v3167_v37, %v3166_v38  ;;  %v3143_v27 = vadd.f32 %v3142_v51, %v6306_v36  ;;  %v3151_v48 = vrot.slane %v6319_v26, 2  ;;  %v3160_v59 = vrot.slane %v3159_v43, 2 }
 0x5d9   :  { %v3176_v6 = vrot.slane %v3175_v2, 4  ;;  %v3205_v47 = vmul.f32 %v4569_v21, %v6106_v58  ;;  %v3204_v56 = vmul.f32 %v4569_v21, %v6102_v42  ;;  %4580 = vrcp.f32 %v3127_v41 }
 0x5da   :  { %v4571_v9 = vpop.eup %4570  ;;  %v3136_v53 = vadd.f32 %v3135_v60, %v3134_v33  ;;  %v3144_v10 = vrot.slane %v3143_v27, 1  ;;  %v3152_v15 = vadd.f32 %v3151_v48, %v6319_v26  ;;  %v3161_v3 = vadd.f32 %v3160_v59, %v3159_v43 }
 0x5db   :  { %v3177_v35 = vadd.f32 %v3176_v6, %v3175_v2  ;;  %3267 = vperm.xlu0 %4401, %v3205_v47   ;;  %3262 = vperm.xlu1 %4400, %v3204_v56   ;;  %v3207_v36 = vmul.f32 %v4571_v9, %v6126_v14  ;;  %v3206_v28 = vmul.f32 %v4571_v9, %v6119_v19  ;;  %v3169_v44 = vrot.slane %v3168_v49, 2 }
 0x5dc   :  { %4582 = vrcp.f32 %v3136_v53  ;;  %v3145_v24 = vadd.f32 %v3144_v10, %v3143_v27  ;;  %v3153_v58 = vrot.slane %v3152_v15, 1  ;;  %v3162_v20 = vrot.slane %v3161_v3, 1 }
 0x5dd   :  { %v4573_v42 = vpop.eup %4572  ;;  %v3170_v16 = vadd.f32 %v3169_v44, %v3168_v49  ;;  %v3178_v31 = vrot.slane %v3177_v35, 2 }
 0x5de   :  { %v3209_v12 = vmul.f32 %v4573_v42, %v6153_v32  ;;  %v3208_v26 = vmul.f32 %v4573_v42, %v6148_v52  ;;  %4584 = vrcp.f32 %v3145_v24  ;;  %v3154_v43 = vadd.f32 %v3153_v58, %v3152_v15 }
 0x5df   :  { %v4575_v38 = vpop.eup %4574  ;;  %3277 = vperm.xlu0 %4401, %v3207_v36   ;;  %3272 = vperm.xlu1 %4400, %v3206_v28   ;;  %v3163_v14 = vadd.f32 %v3162_v20, %v3161_v3  ;;  %v3171_v55 = vrot.slane %v3170_v16, 1  ;;  %v3179_v19 = vadd.f32 %v3178_v31, %v3177_v35 }
 0x5e0   :  { %v4577_v61 = vpop.eup %4576  ;;  %v3211_v4 = vmul.f32 %v4575_v38, %v6179_v1  ;;  %v3210_v54 = vmul.f32 %v4575_v38, %v6174_v8  ;;  %4586 = vrcp.f32 %v3154_v43 }
 0x5e1   :  { %v4579_v33 = vpop.eup %4578  ;;  %v3213_v37 = vmul.f32 %v4577_v61, %v6195_v25  ;;  %v3212_v32 = vmul.f32 %v4577_v61, %v6193_v22  ;;  %4588 = vrcp.f32 %v3163_v14  ;;  %v3172_v52 = vadd.f32 %v3171_v55, %v3170_v16 }
 0x5e2   :  { %v3215_v57 = vmul.f32 %v4579_v33, %v6244_v13  ;;  %v3214_v51 = vmul.f32 %v4579_v33, %v6237_v11  ;;  %v3180_v2 = vrot.slane %v3179_v19, 1 }
 0x5e3   :  { %v4581_v41 = vpop.eup %4580  ;;  %3287 = vperm.xlu0 %4401, %v3209_v12   ;;  %3282 = vperm.xlu1 %4400, %v3208_v26   ;;  %4590 = vrcp.f32 %v3172_v52 }
 0x5e4   :  { %v3217_v1 = vmul.f32 %v4581_v41, %v6258_v40  ;;  %v3216_v8 = vmul.f32 %v4581_v41, %v6254_v39  ;;  %v3181_v60 = vadd.f32 %v3180_v2, %v3179_v19 }
 0x5e6   :  { %v4583_v21 = vpop.eup %4582  ;;  %4592 = vrcp.f32 %v3181_v60 }
 0x5e7   :  { %3297 = vperm.xlu0 %4401, %v3211_v4   ;;  %3292 = vperm.xlu1 %4400, %v3210_v54   ;;  %v3219_v22 = vmul.f32 %v4583_v21, %v6272_v23  ;;  %v3218_v25 = vmul.f32 %v4583_v21, %v6269_v18 }
 0x5e8   :  { %v4585_v13 = vpop.eup %4584 }
 0x5e9   :  { %v3221_v11 = vmul.f32 %v4585_v13, %v6285_v17  ;;  %v3220_v49 = vmul.f32 %v4585_v13, %v6283_v29 }
 0x5ea   :  { %v4587_v27 = vpop.eup %4586 }
 0x5eb   :  { %v4589_v48 = vpop.eup %4588  ;;  %3307 = vperm.xlu0 %4401, %v3213_v37   ;;  %3302 = vperm.xlu1 %4400, %v3212_v32   ;;  %v3223_v39 = vmul.f32 %v4587_v27, %v6300_v34  ;;  %v3222_v40 = vmul.f32 %v4587_v27, %v6296_v50 }
 0x5ec   :  { %v3225_v59 = vmul.f32 %v4589_v48, %v6324_v30  ;;  %v3224_v6 = vmul.f32 %v4589_v48, %v6317_v7 }
 0x5ed   :  { %v4591_v23 = vpop.eup %4590 }
 0x5ee   :  { %v3227_v18 = vmul.f32 %v4591_v23, %v6336_v5  ;;  %v3226_v47 = vmul.f32 %v4591_v23, %v6334_v62 }
 0x5ef   :  { %3317 = vperm.xlu0 %4401, %v3215_v57   ;;  %3312 = vperm.xlu1 %4400, %v3214_v51  }
 0x5f0   :  { %v4593_v29 = vpop.eup %4592 }
 0x5f1   :  { %v3229_v17 = vmul.f32 %v4593_v29, %v6348_v46  ;;  %v3228_v56 = vmul.f32 %v4593_v29, %v6344_v0 }
 0x5f3   :  { %3327 = vperm.xlu0 %4401, %v3217_v1   ;;  %3322 = vperm.xlu1 %4400, %v3216_v8  }
 0x5f7   :  { %3337 = vperm.xlu0 %4401, %v3219_v22   ;;  %3332 = vperm.xlu1 %4400, %v3218_v25  }
 0x5fb   :  { %3347 = vperm.xlu0 %4401, %v3221_v11   ;;  %3342 = vperm.xlu1 %4400, %v3220_v49  }
 0x5ff   :  { %3357 = vperm.xlu0 %4401, %v3223_v39   ;;  %3352 = vperm.xlu1 %4400, %v3222_v40  }
 0x603   :  { %3367 = vperm.xlu0 %4401, %v3225_v59   ;;  %3362 = vperm.xlu1 %4400, %v3224_v6  }
 0x607   :  { %3377 = vperm.xlu0 %4401, %v3227_v18   ;;  %3372 = vperm.xlu1 %4400, %v3226_v47  }
 0x60b   :  { %3387 = vperm.xlu0 %4401, %v3229_v17   ;;  %3382 = vperm.xlu1 %4400, %v3228_v56  }
 0x64c   :  { %v3238_v50 = vpop.permute.xlu0 %3237  ;;  %v3233_v34 = vpop.permute.xlu1 %3232 }
 0x64d   :  { %v3391_v15 = vmul.f32 %v3238_v50, %v5928_v63  ;;  %v3390_v3 = vmul.f32 %v3233_v34, %v5919_v45 }
 0x64f   :  { %v3422_v42 = vadd.f32 %v3391_v15, %v3390_v3 }
 0x651   :  { %v3248_v7 = vpop.permute.xlu1 %3247  ;;  %v3243_v30 = vpop.permute.xlu0 %3242  ;;  %v3423_v19 = vrot.slane %v3422_v42, 4 }
 0x652   :  { %v3393_v62 = vmul.f32 %v3248_v7, %v5928_v63  ;;  %v3392_v5 = vmul.f32 %v3243_v30, %v5919_v45 }
 0x653   :  { %v3424_v2 = vadd.f32 %v3423_v19, %v3422_v42 }
 0x654   :  { %v3429_v9 = vadd.f32 %v3393_v62, %v3392_v5 }
 0x655   :  { %v3258_v0 = vpop.permute.xlu0 %3257  ;;  %v3253_v46 = vpop.permute.xlu1 %3252  ;;  %v3425_v27 = vrot.slane %v3424_v2, 2 }
 0x656   :  { %v3395_v53 = vmul.f32 %v3258_v0, %v5928_v63  ;;  %v3394_v10 = vmul.f32 %v3253_v46, %v5919_v45  ;;  %v3430_v36 = vrot.slane %v3429_v9, 4 }
 0x657   :  { %v3426_v50 = vadd.f32 %v3425_v27, %v3424_v2 }
 0x658   :  { %v3436_v35 = vadd.f32 %v3395_v53, %v3394_v10  ;;  %v3431_v31 = vadd.f32 %v3430_v36, %v3429_v9 }
 0x65a   :  { %v3268_v28 = vpop.permute.xlu0 %3267  ;;  %v3263_v44 = vpop.permute.xlu1 %3262  ;;  %v3437_v24 = vrot.slane %v3436_v35, 4  ;;  %v3432_v54 = vrot.slane %v3431_v31, 2 }
 0x65b   :  { %v3397_v58 = vmul.f32 %v3268_v28, %v5928_v63  ;;  %v3396_v20 = vmul.f32 %v3263_v44, %v5919_v45 }
 0x65c   :  { %v3438_v43 = vadd.f32 %v3437_v24, %v3436_v35  ;;  %v3433_v60 = vadd.f32 %v3432_v54, %v3431_v31  ;;  %v3427_v35 = vrot.slane %v3426_v50, 1  ;;  %v6404_v24 = vld [vmem:[%s6650_s12] ss:$0 sm:$0xff]  ;;  %s4760_s12 = smov [#allocation8]  }
 0x65d   :  { %v3443_v16 = vadd.f32 %v3397_v58, %v3396_v20  ;;  %s3844_s17 = sshll.u32 %s4760_s12, 4  ;;  %s3845_s17 = int_to_ptr.vmem [resolvable:$true] %s3844_s17 }
 0x65e   :  { %v3278_v12 = vpop.permute.xlu0 %3277  ;;  %v3273_v26 = vpop.permute.xlu1 %3272  ;;  %v3439_v32 = vrot.slane %v3438_v43, 2  ;;  %v3434_v6 = vrot.slane %v3433_v60, 1  ;;  %s4696_s4 = scalar_lea.vmem %s3845_s17, 256  ;;  %p4701_p11 = scmp.lt.s32.totalorder %s3845_s17, %s3845_s17 }
 0x65f   :  { %v3444_v38 = vrot.slane %v3443_v16, 4  ;;  %v3399_v14 = vmul.f32 %v3278_v12, %v5928_v63  ;;  %v3398_v55 = vmul.f32 %v3273_v26, %v5919_v45  ;;  %p4697_p10 = scmp.ne.s32.totalorder %s3845_s17, %s4696_s4  ;;  %p4702_p12 = scmp.lt.s32.totalorder %s4696_s4, %s4696_s4 }
 0x660   :  { %v3440_v25 = vadd.f32 %v3439_v32, %v3438_v43  ;;  %v3435_v0 = vadd.f32 %v3434_v6, %v3433_v60 }
 0x661   :  { %v3445_v61 = vadd.f32 %v3444_v38, %v3443_v16  ;;  %v3450_v4 = vadd.f32 %v3399_v14, %v3398_v55  ;;  %v3428_v55 = vadd.f32 %v3427_v35, %v3426_v50  ;;  %p4703_p13 = por %p4702_p12, %p4701_p11 }
 0x662   :  { %v3288_v33 = vpop.permute.xlu0 %3287  ;;  %v3283_v37 = vpop.permute.xlu1 %3282  ;;  %v3441_v29 = vrot.slane %v3440_v25, 1  ;;  %v6407_v20 = vadd.f32 %v6404_v24, %v3435_v0 }
 0x663   :  { %v3451_v52 = vrot.slane %v3450_v4, 4  ;;  %v3401_v57 = vmul.f32 %v3288_v33, %v5928_v63  ;;  %v3400_v51 = vmul.f32 %v3283_v37, %v5919_v45  ;;  %v3446_v41 = vrot.slane %v3445_v61, 2  ;;  %p4704_p0 = pnand %p4703_p13, %p4697_p10 }
 0x664   :  { %v3442_v15 = vadd.f32 %v3441_v29, %v3440_v25 }
 0x665   :  { %v3452_v1 = vadd.f32 %v3451_v52, %v3450_v4  ;;  %v3457_v8 = vadd.f32 %v3401_v57, %v3400_v51  ;;  %v3447_v48 = vadd.f32 %v3446_v41, %v3445_v61  ;;  %v3573_v52 = vrot.slane %v6407_v20, 7 }
 0x666   :  { %v3298_v21 = vpop.permute.xlu0 %3297  ;;  %v3293_v22 = vpop.permute.xlu1 %3292  ;;  %v6410_v43 = vadd.f32 %v6404_v24, %v3442_v15 }
 0x667   :  { %v3453_v13 = vrot.slane %v3452_v1, 2  ;;  %v3458_v11 = vrot.slane %v3457_v8, 4  ;;  %v3403_v49 = vmul.f32 %v3298_v21, %v5928_v63  ;;  %v3402_v39 = vmul.f32 %v3293_v22, %v5919_v45 }
 0x668   :  { %v3448_v34 = vrot.slane %v3447_v48, 1  ;;  %v6430_v22 = vadd.f32 %v6404_v24, %v3428_v55 }
 0x669   :  { %v3454_v40 = vadd.f32 %v3453_v13, %v3452_v1  ;;  %v3459_v59 = vadd.f32 %v3458_v11, %v3457_v8  ;;  %v3464_v23 = vadd.f32 %v3403_v49, %v3402_v39  ;;  %v3575_v8 = vrot.slane %v6410_v43, 6 }
 0x66a   :  { %v3308_v18 = vpop.permute.xlu0 %3307  ;;  %v3303_v47 = vpop.permute.xlu1 %3302  ;;  %v3449_v36 = vadd.f32 %v3448_v34, %v3447_v48 }
 0x66b   :  { %v3460_v17 = vrot.slane %v3459_v59, 2  ;;  %v3405_v56 = vmul.f32 %v3308_v18, %v5928_v63  ;;  %v3465_v7 = vrot.slane %v3464_v23, 4  ;;  %v3404_v30 = vmul.f32 %v3303_v47, %v5919_v45 }
 0x66c   :  { %v3455_v62 = vrot.slane %v3454_v40, 1  ;;  %v6415_v19 = vadd.f32 %v6404_v24, %v3449_v36 }
 0x66d   :  { %v3461_v5 = vadd.f32 %v3460_v17, %v3459_v59  ;;  %v3466_v46 = vadd.f32 %v3465_v7, %v3464_v23  ;;  %v3471_v9 = vadd.f32 %v3405_v56, %v3404_v30  ;;  %v3574_v23 = vsel %vm1963_vm6, %v3573_v52, %v6430_v22 }
 0x66e   :  { %v3318_v53 = vpop.permute.xlu0 %3317  ;;  %v3313_v10 = vpop.permute.xlu1 %3312  ;;  %v3456_v58 = vadd.f32 %v3455_v62, %v3454_v40  ;;  %v3577_v25 = vrot.slane %v6415_v19, 5  ;;  %v3576_v17 = vsel %vm1966_vm7, %v3575_v8, %v3574_v23 }
 0x66f   :  { %v3462_v3 = vrot.slane %v3461_v5, 1  ;;  %v3467_v28 = vrot.slane %v3466_v46, 2  ;;  %v3472_v44 = vrot.slane %v3471_v9, 4  ;;  %v3407_v33 = vmul.f32 %v3318_v53, %v5928_v63 }
 0x670   :  { %v6418_v54 = vadd.f32 %v6404_v24, %v3456_v58  ;;  %v3406_v37 = vmul.f32 %v3313_v10, %v5919_v45  ;;  %v3578_v7 = vsel %vm1969_vm8, %v3577_v25, %v3576_v17 }
 0x671   :  { %v3463_v42 = vadd.f32 %v3462_v3, %v3461_v5  ;;  %v3468_v16 = vadd.f32 %v3467_v28, %v3466_v46  ;;  %v3473_v31 = vadd.f32 %v3472_v44, %v3471_v9 }
 0x672   :  { %v3328_v12 = vpop.permute.xlu0 %3327  ;;  %v3323_v26 = vpop.permute.xlu1 %3322  ;;  %v3478_v49 = vadd.f32 %v3407_v33, %v3406_v37  ;;  %v3579_v39 = vrot.slane %v6418_v54, 4 }
 0x673   :  { %v3409_v38 = vmul.f32 %v3328_v12, %v5928_v63  ;;  %v3408_v14 = vmul.f32 %v3323_v26, %v5919_v45  ;;  %v3469_v61 = vrot.slane %v3468_v16, 1  ;;  %v3474_v4 = vrot.slane %v3473_v31, 2 }
 0x674   :  { %v6424_v57 = vadd.f32 %v6404_v24, %v3463_v42  ;;  %v3479_v30 = vrot.slane %v3478_v49, 4  ;;  %v3580_v5 = vsel %vm1972_vm9, %v3579_v39, %v3578_v7 }
 0x675   :  { %v3485_v32 = vadd.f32 %v3409_v38, %v3408_v14  ;;  %v3470_v51 = vadd.f32 %v3469_v61, %v3468_v16  ;;  %v3475_v2 = vadd.f32 %v3474_v4, %v3473_v31 }
 0x676   :  { %v3338_v41 = vpop.permute.xlu0 %3337  ;;  %v3333_v1 = vpop.permute.xlu1 %3332  ;;  %v3581_v18 = vrot.slane %v6424_v57, 3  ;;  %v3480_v42 = vadd.f32 %v3479_v30, %v3478_v49 }
 0x677   :  { %v3411_v60 = vmul.f32 %v3338_v41, %v5928_v63  ;;  %v3410_v21 = vmul.f32 %v3333_v1, %v5919_v45  ;;  %v3476_v13 = vrot.slane %v3475_v2, 1  ;;  %v6434_v11 = vadd.f32 %v6404_v24, %v3470_v51 }
 0x678   :  { %v3486_v27 = vrot.slane %v3485_v32, 4  ;;  %v3582_v10 = vsel %vm1975_vm10, %v3581_v18, %v3580_v5 }
 0x679   :  { %v3492_v48 = vadd.f32 %v3411_v60, %v3410_v21  ;;  %v3477_v40 = vadd.f32 %v3476_v13, %v3475_v2  ;;  %v3583_v56 = vrot.slane %v6434_v11, 2 }
 0x67a   :  { %v3348_v59 = vpop.permute.xlu0 %3347  ;;  %v3343_v6 = vpop.permute.xlu1 %3342  ;;  %v3487_v62 = vadd.f32 %v3486_v27, %v3485_v32  ;;  %v3481_v32 = vrot.slane %v3480_v42, 2 }
 0x67b   :  { %v3493_v47 = vrot.slane %v3492_v48, 4  ;;  %v3413_v29 = vmul.f32 %v3348_v59, %v5928_v63  ;;  %v3412_v50 = vmul.f32 %v3343_v6, %v5919_v45  ;;  %v6445_v34 = vadd.f32 %v6404_v24, %v3477_v40 }
 0x67c   :  { %v3584_v35 = vsel %vm1978_vm11, %v3583_v56, %v3582_v10  ;;  %v3488_v58 = vrot.slane %v3487_v62, 2 }
 0x67d   :  { %v3494_v0 = vadd.f32 %v3493_v47, %v3492_v48  ;;  %v3499_v46 = vadd.f32 %v3413_v29, %v3412_v50  ;;  %v3585_v15 = vrot.slane %v6445_v34, 1  ;;  %v3482_v48 = vadd.f32 %v3481_v32, %v3480_v42 }
 0x67e   :  { %v3358_v9 = vpop.permute.xlu0 %3357  ;;  %v3353_v53 = vpop.permute.xlu1 %3352  ;;  %v3489_v33 = vadd.f32 %v3488_v58, %v3487_v62 }
 0x67f   :  { %v3415_v3 = vmul.f32 %v3358_v9, %v5928_v63  ;;  %v3500_v36 = vrot.slane %v3499_v46, 4  ;;  %v3414_v28 = vmul.f32 %v3353_v53, %v5919_v45  ;;  %v3586_v44 = vsel %vm1981_vm12, %v3585_v15, %v3584_v35 }
 0x680   :  { %3603 = vst [vmem:[#allocation8] sm:$0xff] %v3586_v44  ;;  %3605 = vmax.xlane.f32.xlu1 %v3586_v44  ;;  %v3495_v16 = vrot.slane %v3494_v0, 2  ;;  %v3490_v13 = vrot.slane %v3489_v33, 1  ;;  %v3483_v5 = vrot.slane %v3482_v48, 1 }
 0x681   :  { %v3501_v31 = vadd.f32 %v3500_v36, %v3499_v46  ;;  %v3506_v12 = vadd.f32 %v3415_v3, %v3414_v28 }
 0x682   :  { %v3368_v26 = vpop.permute.xlu0 %3367  ;;  %v3363_v38 = vpop.permute.xlu1 %3362  ;;  %v3496_v52 = vadd.f32 %v3495_v16, %v3494_v0  ;;  %v3491_v50 = vadd.f32 %v3490_v13, %v3489_v33  ;;  %v3484_v28 = vadd.f32 %v3483_v5, %v3482_v48 }
 0x683   :  { %v3417_v14 = vmul.f32 %v3368_v26, %v5928_v63  ;;  %v3416_v55 = vmul.f32 %v3363_v38, %v5919_v45  ;;  %v3502_v61 = vrot.slane %v3501_v31, 2  ;;  %v3507_v4 = vrot.slane %v3506_v12, 4 }
 0x684   :  { %v3497_v39 = vrot.slane %v3496_v52, 1  ;;  %v6462_v3 = vadd.f32 %v6404_v24, %v3491_v50 }
 0x685   :  { %v3513_v37 = vadd.f32 %v3417_v14, %v3416_v55  ;;  %v3503_v51 = vadd.f32 %v3502_v61, %v3501_v31  ;;  %v3508_v2 = vadd.f32 %v3507_v4, %v3506_v12  ;;  %v6479_v55 = vadd.f32 %v6404_v24, %v3484_v28 }
 0x686   :  { %v3378_v41 = vpop.permute.xlu0 %3377  ;;  %v3373_v1 = vpop.permute.xlu1 %3372  ;;  %v3498_v0 = vadd.f32 %v3497_v39, %v3496_v52  ;;  %v3587_v31 = vrot.slane %v6462_v3, 7 }
 0x687   :  { %v3514_v8 = vrot.slane %v3513_v37, 4  ;;  %v3419_v60 = vmul.f32 %v3378_v41, %v5928_v63  ;;  %v3418_v21 = vmul.f32 %v3373_v1, %v5919_v45  ;;  %v3509_v25 = vrot.slane %v3508_v2, 2 }
 0x688   :  { %v3504_v40 = vrot.slane %v3503_v51, 1  ;;  %v3588_v52 = vsel %vm1963_vm6, %v3587_v31, %v6479_v55 }
 0x689   :  { %v3515_v49 = vadd.f32 %v3514_v8, %v3513_v37  ;;  %v3520_v27 = vadd.f32 %v3419_v60, %v3418_v21  ;;  %v3510_v59 = vadd.f32 %v3509_v25, %v3508_v2 }
 0x68a   :  { %v3388_v6 = vpop.permute.xlu0 %3387  ;;  %v3383_v23 = vpop.permute.xlu1 %3382  ;;  %v3505_v46 = vadd.f32 %v3504_v40, %v3503_v51 }
 0x68b   :  { %v3516_v18 = vrot.slane %v3515_v49, 2  ;;  %v3521_v47 = vrot.slane %v3520_v27, 4  ;;  %v3421_v29 = vmul.f32 %v3388_v6, %v5928_v63  ;;  %v3420_v17 = vmul.f32 %v3383_v23, %v5919_v45 }
 0x68c   :  { %v3511_v56 = vrot.slane %v3510_v59, 1  ;;  %v6465_v45 = vadd.f32 %v6404_v24, %v3498_v0  ;;  %v6468_v44 = vadd.f32 %v6404_v24, %v3505_v46 }
 0x68d   :  { %v3517_v7 = vadd.f32 %v3516_v18, %v3515_v49  ;;  %v3522_v30 = vadd.f32 %v3521_v47, %v3520_v27  ;;  %v3527_v62 = vadd.f32 %v3421_v29, %v3420_v17 }
 0x68e   :  { %v3512_v15 = vadd.f32 %v3511_v56, %v3510_v59  ;;  %v3589_v14 = vrot.slane %v6465_v45, 6  ;;  %v3591_v61 = vrot.slane %v6468_v44, 5 }
 0x68f   :  { %v3518_v9 = vrot.slane %v3517_v7, 1  ;;  %v3523_v53 = vrot.slane %v3522_v30, 2  ;;  %v3528_v10 = vrot.slane %v3527_v62, 4 }
 0x690   :  { %v6471_v16 = vadd.f32 %v6404_v24, %v3512_v15  ;;  %v3590_v2 = vsel %vm1966_vm7, %v3589_v14, %v3588_v52 }
 0x691   :  { %v3519_v35 = vadd.f32 %v3518_v9, %v3517_v7  ;;  %v3524_v36 = vadd.f32 %v3523_v53, %v3522_v30  ;;  %v3529_v63 = vadd.f32 %v3528_v10, %v3527_v62  ;;  %v3592_v8 = vsel %vm1969_vm8, %v3591_v61, %v3590_v2 }
 0x692   :  { %v3593_v37 = vrot.slane %v6471_v16, 4 }
 0x693   :  { %v3525_v58 = vrot.slane %v3524_v36, 1  ;;  %v3530_v42 = vrot.slane %v3529_v63, 2  ;;  %v6475_v12 = vadd.f32 %v6404_v24, %v3519_v35 }
 0x694   :  { %v3594_v60 = vsel %vm1972_vm9, %v3593_v37, %v3592_v8 }
 0x695   :  { %v3526_v26 = vadd.f32 %v3525_v58, %v3524_v36  ;;  %v3531_v38 = vadd.f32 %v3530_v42, %v3529_v63  ;;  %v3595_v51 = vrot.slane %v6475_v12, 3 }
 0x697   :  { %v3532_v4 = vrot.slane %v3531_v38, 1  ;;  %v6483_v33 = vadd.f32 %v6404_v24, %v3526_v26  ;;  %v3596_v21 = vsel %vm1975_vm10, %v3595_v51, %v3594_v60 }
 0x699   :  { %v3533_v32 = vadd.f32 %v3532_v4, %v3531_v38  ;;  %v3597_v41 = vrot.slane %v6483_v33, 2 }
 0x69b   :  { %v6492_v1 = vadd.f32 %v6404_v24, %v3533_v32  ;;  %v3598_v13 = vsel %vm1978_vm11, %v3597_v41, %v3596_v21 }
 0x69d   :  { %v3599_v25 = vrot.slane %v6492_v1, 1 }
 0x69f   :  { %v3600_v49 = vsel %vm1981_vm12, %v3599_v25, %v3598_v13 }
 0x6a0   :  { %3607 = vmax.xlane.f32.xlu0 %v3600_v49  ;;  %3604 = vst [vmem:[#allocation8 + $0x8] sm:$0xff] %v3600_v49 }
 0x70d   :  { %v3606_v27 = vpop.xlane.xlu1 %3605 }
 0x70e   :  { %v3611_v48 = vrot.slane %v3606_v27, 1  ;;  %v3612_v39 = vrot.slane %v3606_v27, 2  ;;  %v3613_v40 = vrot.slane %v3606_v27, 3  ;;  %v6501_v24 = vsub.f32 %v6430_v22, %v3606_v27 }
 0x70f   :  { %v3614_v59 = vrot.slane %v3606_v27, 4  ;;  %v3615_v6 = vrot.slane %v3606_v27, 5  ;;  %v3616_v23 = vrot.slane %v3606_v27, 6  ;;  %v3617_v18 = vrot.slane %v3606_v27, 7 }
 0x710   :  { %v6504_v47 = vsub.f32 %v6407_v20, %v3611_v48  ;;  %v3657_v29 = vmul.f32 1.442695, %v6501_v24  ;;  %v6508_v17 = vsub.f32 %v6410_v43, %v3612_v39  ;;  %v6511_v56 = vsub.f32 %v6415_v19, %v3613_v40 }
 0x711   :  { %v6514_v50 = vsub.f32 %v6418_v54, %v3614_v59  ;;  %v6517_v22 = vsub.f32 %v6424_v57, %v3615_v6  ;;  %v6520_v7 = vsub.f32 %v6434_v11, %v3616_v23  ;;  %v6523_v20 = vsub.f32 %v6445_v34, %v3617_v18 }
 0x712   :  { %v3659_v30 = vmul.f32 1.442695, %v6504_v47  ;;  %v3661_v43 = vmul.f32 1.442695, %v6508_v17  ;;  %v3663_v62 = vmul.f32 1.442695, %v6511_v56  ;;  %4594 = vpow2.f32 %v3657_v29 }
 0x713   :  { %v3665_v19 = vmul.f32 1.442695, %v6514_v50  ;;  %v3667_v54 = vmul.f32 1.442695, %v6517_v22  ;;  %v3669_v57 = vmul.f32 1.442695, %v6520_v7 }
 0x714   :  { %4596 = vpow2.f32 %v3659_v30  ;;  %v3671_v11 = vmul.f32 1.442695, %v6523_v20 }
 0x715   :  { %4598 = vpow2.f32 %v3661_v43 }
 0x716   :  { %4600 = vpow2.f32 %v3663_v62 }
 0x717   :  { %4602 = vpow2.f32 %v3665_v19 }
 0x718   :  { %4604 = vpow2.f32 %v3667_v54 }
 0x719   :  { %4606 = vpow2.f32 %v3669_v57 }
 0x71a   :  { %4608 = vpow2.f32 %v3671_v11 }
 0x71c   :  { %v4595_v34 = vpop.eup %4594 }
 0x71e   :  { %v4597_v5 = vpop.eup %4596 }
 0x71f   :  { %v4599_v0 = vpop.eup %4598  ;;  %v3705_v46 = vrot.slane %v4597_v5, 7 }
 0x720   :  { %v4601_v9 = vpop.eup %4600  ;;  %v3707_v53 = vrot.slane %v4599_v0, 6 }
 0x721   :  { %v4603_v10 = vpop.eup %4602  ;;  %v3706_v15 = vsel %vm1963_vm6, %v3705_v46, %v4595_v34  ;;  %v3709_v35 = vrot.slane %v4601_v9, 5 }
 0x722   :  { %v4605_v36 = vpop.eup %4604  ;;  %v3708_v63 = vsel %vm1966_vm7, %v3707_v53, %v3706_v15  ;;  %v3711_v28 = vrot.slane %v4603_v10, 4 }
 0x723   :  { %v4607_v58 = vpop.eup %4606  ;;  %v3710_v42 = vsel %vm1969_vm8, %v3709_v35, %v3708_v63  ;;  %v3713_v31 = vrot.slane %v4605_v36, 3 }
 0x724   :  { %v4609_v26 = vpop.eup %4608  ;;  %v3712_v38 = vsel %vm1972_vm9, %v3711_v28, %v3710_v42  ;;  %v3715_v14 = vrot.slane %v4607_v58, 2 }
 0x725   :  { %v3714_v61 = vsel %vm1975_vm10, %v3713_v31, %v3712_v38  ;;  %v3717_v4 = vrot.slane %v4609_v26, 1 }
 0x726   :  { %v3716_v37 = vsel %vm1978_vm11, %v3715_v14, %v3714_v61 }
 0x727   :  { %v3718_v32 = vsel %vm1981_vm12, %v3717_v4, %v3716_v37 }
 0x728   :  { %3735 = vadd.xlane.f32.xlu0 %v3718_v32 }
 0x72d   :  { %v3608_v52 = vpop.xlane.xlu0 %3607 }
 0x72e   :  { %v3618_v51 = vrot.slane %v3608_v52, 1  ;;  %v3619_v2 = vrot.slane %v3608_v52, 2  ;;  %v3620_v41 = vrot.slane %v3608_v52, 3  ;;  %v6540_v8 = vsub.f32 %v6479_v55, %v3608_v52 }
 0x72f   :  { %v3621_v60 = vrot.slane %v3608_v52, 4  ;;  %v3622_v21 = vrot.slane %v3608_v52, 5  ;;  %v3623_v25 = vrot.slane %v3608_v52, 6  ;;  %v3624_v13 = vrot.slane %v3608_v52, 7 }
 0x730   :  { %v6543_v49 = vsub.f32 %v6462_v3, %v3618_v51  ;;  %v3673_v27 = vmul.f32 1.442695, %v6540_v8  ;;  %v6547_v48 = vsub.f32 %v6465_v45, %v3619_v2  ;;  %v6550_v39 = vsub.f32 %v6468_v44, %v3620_v41 }
 0x731   :  { %v6553_v40 = vsub.f32 %v6471_v16, %v3621_v60  ;;  %v6556_v55 = vsub.f32 %v6475_v12, %v3622_v21  ;;  %v6559_v59 = vsub.f32 %v6483_v33, %v3623_v25  ;;  %v6562_v3 = vsub.f32 %v6492_v1, %v3624_v13 }
 0x732   :  { %v3675_v6 = vmul.f32 1.442695, %v6543_v49  ;;  %v3677_v45 = vmul.f32 1.442695, %v6547_v48  ;;  %v3679_v23 = vmul.f32 1.442695, %v6550_v39  ;;  %4610 = vpow2.f32 %v3673_v27 }
 0x733   :  { %v3681_v44 = vmul.f32 1.442695, %v6553_v40  ;;  %v3683_v16 = vmul.f32 1.442695, %v6556_v55  ;;  %v3685_v12 = vmul.f32 1.442695, %v6559_v59 }
 0x734   :  { %4612 = vpow2.f32 %v3675_v6  ;;  %v3687_v33 = vmul.f32 1.442695, %v6562_v3 }
 0x735   :  { %4614 = vpow2.f32 %v3677_v45 }
 0x736   :  { %4616 = vpow2.f32 %v3679_v23 }
 0x737   :  { %4618 = vpow2.f32 %v3681_v44 }
 0x738   :  { %4620 = vpow2.f32 %v3683_v16 }
 0x739   :  { %4622 = vpow2.f32 %v3685_v12 }
 0x73a   :  { %4624 = vpow2.f32 %v3687_v33 }
 0x73c   :  { %v4611_v1 = vpop.eup %4610 }
 0x73e   :  { %v4613_v18 = vpop.eup %4612 }
 0x73f   :  { %v4615_v29 = vpop.eup %4614  ;;  %v3719_v30 = vrot.slane %v4613_v18, 7 }
 0x740   :  { %v4617_v43 = vpop.eup %4616  ;;  %v3721_v62 = vrot.slane %v4615_v29, 6 }
 0x741   :  { %v4619_v19 = vpop.eup %4618  ;;  %v3720_v54 = vsel %vm1963_vm6, %v3719_v30, %v4611_v1  ;;  %v3723_v57 = vrot.slane %v4617_v43, 5 }
 0x742   :  { %v4621_v11 = vpop.eup %4620  ;;  %v3722_v34 = vsel %vm1966_vm7, %v3721_v62, %v3720_v54  ;;  %v3725_v5 = vrot.slane %v4619_v19, 4 }
 0x743   :  { %v4623_v0 = vpop.eup %4622  ;;  %v3724_v46 = vsel %vm1969_vm8, %v3723_v57, %v3722_v34  ;;  %v3727_v9 = vrot.slane %v4621_v11, 3 }
 0x744   :  { %v4625_v53 = vpop.eup %4624  ;;  %v3726_v10 = vsel %vm1972_vm9, %v3725_v5, %v3724_v46  ;;  %v3729_v15 = vrot.slane %v4623_v0, 2 }
 0x745   :  { %v3728_v35 = vsel %vm1975_vm10, %v3727_v9, %v3726_v10  ;;  %v3731_v36 = vrot.slane %v4625_v53, 1 }
 0x746   :  { %v3730_v63 = vsel %vm1978_vm11, %v3729_v15, %v3728_v35 }
 0x747   :  { %v3732_v28 = vsel %vm1981_vm12, %v3731_v36, %v3730_v63 }
 0x748   :  { %3737 = vadd.xlane.f32.xlu1 %v3732_v28 }
 0x749   :  { %4707 = shalt.err (!%p4704_p0)
}
 0x74a   :  { %s4708_s6 = scalar_lea.hbm %s6651_s13, 256 }
 0x74b   :  { %p4709_p1 = scmp.ne.s32.totalorder %s6651_s13, %s4708_s6  ;;  %p4712_p2 = scmp.lt.u32.totalorder %s4708_s6, %s6651_s13 }
 0x74d   :  { %p4714_p3 = pnand %p4712_p2, %p4709_p1 }
 0x74f   :  { %4717 = shalt.err (!%p4714_p3)
}
 0x750   :  { %3850 = dma.vmem_to_hbm [thread:$0]  %s3845_s17, 256, %s6651_s13, [#allocation4], %s4750_s3, %s4750_s3, %s4751_s30  }
 0x751   :  { %s4761_s13 = smov [#allocation9]  }
 0x752   :  { %s3856_s20 = sshll.u32 %s4761_s13, 4  ;;  %s3857_s20 = int_to_ptr.vmem [resolvable:$true] %s3856_s20 }
 0x753   :  { %s4718_s21 = scalar_lea.vmem %s3857_s20, 256  ;;  %p4723_p5 = scmp.lt.s32.totalorder %s3857_s20, %s3857_s20 }
 0x754   :  { %p4719_p4 = scmp.ne.s32.totalorder %s3857_s20, %s4718_s21  ;;  %p4724_p6 = scmp.lt.s32.totalorder %s4718_s21, %s4718_s21 }
 0x756   :  { %p4725_p7 = por %p4724_p6, %p4723_p5 }
 0x758   :  { %p4726_p8 = pnand %p4725_p7, %p4719_p4 }
 0x7b5   :  { %v3736_v58 = vpop.xlane.xlu0 %3735 }
 0x7b6   :  { %4626 = vlog2.f32 %v3736_v58 }
 0x7c0   :  { %v4627_v42 = vpop.eup %4626 }
 0x7c1   :  { %v3740_v31 = vmul.f32 0.6931472, %v4627_v42 }
 0x7c3   :  { %v3745_v26 = vrot.slane %v3740_v31, 1  ;;  %v3746_v38 = vrot.slane %v3740_v31, 2  ;;  %v3747_v14 = vrot.slane %v3740_v31, 3  ;;  %v3748_v61 = vrot.slane %v3740_v31, 4 }
 0x7c4   :  { %v3749_v4 = vrot.slane %v3740_v31, 5  ;;  %v3750_v37 = vrot.slane %v3740_v31, 6  ;;  %v3751_v32 = vrot.slane %v3740_v31, 7  ;;  %v3775_v60 = vsub.f32 %v6501_v24, %v3740_v31 }
 0x7c5   :  { %v3776_v52 = vsub.f32 %v6504_v47, %v3745_v26  ;;  %v3777_v51 = vsub.f32 %v6508_v17, %v3746_v38  ;;  %v3778_v2 = vsub.f32 %v6511_v56, %v3747_v14  ;;  %v3779_v41 = vsub.f32 %v6514_v50, %v3748_v61 }
 0x7c6   :  { %v3780_v21 = vsub.f32 %v6517_v22, %v3749_v4  ;;  %v3781_v27 = vsub.f32 %v6520_v7, %v3750_v37  ;;  %v3782_v6 = vsub.f32 %v6523_v20, %v3751_v32 }
 0x7c7   :  { %v3807_v25 = vrot.slane %v3776_v52, 7  ;;  %v3809_v13 = vrot.slane %v3777_v51, 6  ;;  %v3811_v23 = vrot.slane %v3778_v2, 5  ;;  %v3813_v17 = vrot.slane %v3779_v41, 4 }
 0x7c8   :  { %v3815_v44 = vrot.slane %v3780_v21, 3  ;;  %v3817_v24 = vrot.slane %v3781_v27, 2  ;;  %v3819_v16 = vrot.slane %v3782_v6, 1 }
 0x7c9   :  { %v3808_v45 = vsel %vm1963_vm6, %v3807_v25, %v3775_v60 }
 0x7ca   :  { %v3810_v47 = vsel %vm1966_vm7, %v3809_v13, %v3808_v45 }
 0x7cb   :  { %v3812_v56 = vsel %vm1969_vm8, %v3811_v23, %v3810_v47 }
 0x7cc   :  { %v3814_v50 = vsel %vm1972_vm9, %v3813_v17, %v3812_v56 }
 0x7cd   :  { %v3816_v22 = vsel %vm1975_vm10, %v3815_v44, %v3814_v50 }
 0x7ce   :  { %v3818_v12 = vsel %vm1978_vm11, %v3817_v24, %v3816_v22 }
 0x7cf   :  { %v3820_v7 = vsel %vm1981_vm12, %v3819_v16, %v3818_v12 }
 0x7d0   :  { %3837 = vst [vmem:[#allocation9] sm:$0xff] %v3820_v7 }
 0x7d5   :  { %v3738_v20 = vpop.xlane.xlu1 %3737 }
 0x7d6   :  { %4628 = vlog2.f32 %v3738_v20 }
 0x7e0   :  { %v4629_v33 = vpop.eup %4628 }
 0x7e1   :  { %v3742_v1 = vmul.f32 0.6931472, %v4629_v33 }
 0x7e3   :  { %v3752_v18 = vrot.slane %v3742_v1, 1  ;;  %v3753_v29 = vrot.slane %v3742_v1, 2  ;;  %v3754_v30 = vrot.slane %v3742_v1, 3  ;;  %v3755_v43 = vrot.slane %v3742_v1, 4 }
 0x7e4   :  { %v3756_v62 = vrot.slane %v3742_v1, 5  ;;  %v3757_v19 = vrot.slane %v3742_v1, 6  ;;  %v3758_v54 = vrot.slane %v3742_v1, 7  ;;  %v3783_v0 = vsub.f32 %v6540_v8, %v3742_v1 }
 0x7e5   :  { %v3784_v57 = vsub.f32 %v6543_v49, %v3752_v18  ;;  %v3785_v11 = vsub.f32 %v6547_v48, %v3753_v29  ;;  %v3786_v34 = vsub.f32 %v6550_v39, %v3754_v30  ;;  %v3787_v5 = vsub.f32 %v6553_v40, %v3755_v43 }
 0x7e6   :  { %v3788_v46 = vsub.f32 %v6556_v55, %v3756_v62  ;;  %v3789_v10 = vsub.f32 %v6559_v59, %v3757_v19  ;;  %v3790_v15 = vsub.f32 %v6562_v3, %v3758_v54 }
 0x7e7   :  { %v3821_v9 = vrot.slane %v3784_v57, 7  ;;  %v3823_v53 = vrot.slane %v3785_v11, 6  ;;  %v3825_v36 = vrot.slane %v3786_v34, 5  ;;  %v3827_v48 = vrot.slane %v3787_v5, 4 }
 0x7e8   :  { %v3829_v63 = vrot.slane %v3788_v46, 3  ;;  %v3831_v40 = vrot.slane %v3789_v10, 2  ;;  %v3833_v28 = vrot.slane %v3790_v15, 1 }
 0x7e9   :  { %v3822_v35 = vsel %vm1963_vm6, %v3821_v9, %v3783_v0 }
 0x7ea   :  { %v3824_v49 = vsel %vm1966_vm7, %v3823_v53, %v3822_v35 }
 0x7eb   :  { %v3826_v39 = vsel %vm1969_vm8, %v3825_v36, %v3824_v49 }
 0x7ec   :  { %v3828_v8 = vsel %vm1972_vm9, %v3827_v48, %v3826_v39 }
 0x7ed   :  { %v3830_v55 = vsel %vm1975_vm10, %v3829_v63, %v3828_v8 }
 0x7ee   :  { %v3832_v59 = vsel %vm1978_vm11, %v3831_v40, %v3830_v55 }
 0x7ef   :  { %v3834_v3 = vsel %vm1981_vm12, %v3833_v28, %v3832_v59 }
 0x7f0   :  { %3838 = vst [vmem:[#allocation9 + $0x8] sm:$0xff] %v3834_v3 }
 0x7f1   :  { %4729 = shalt.err (!%p4726_p8)
}
 0x7f2   :  { %s4730_s25 = scalar_lea.hbm %s6652_s14, 256 }
 0x7f3   :  { %p4731_p9 = scmp.ne.s32.totalorder %s6652_s14, %s4730_s25  ;;  %p4734_p10 = scmp.lt.u32.totalorder %s4730_s25, %s6652_s14 }
 0x7f5   :  { %p4736_p11 = pnand %p4734_p10, %p4731_p9 }
 0x7f7   :  { %4739 = shalt.err (!%p4736_p11)
}
 0x7f8   :  { %3862 = dma.vmem_to_hbm [thread:$0]  %s3857_s20, 256, %s6652_s14, [#allocation10], %s4750_s3, %s4750_s3, %s4751_s30  }
 0x7f9   :  { %4744 = dma.done.wait [#allocation4], 256  }
 0x7fa   :  { %4745 = vsyncadd [#allocation4], 4294967040 }
 0x7fb   :  { %4746 = dma.done.wait [#allocation10], 256  }
 0x7fc   :  { %4747 = vsyncadd [#allocation10], 4294967040 }
 0x7fd   :  { %3869 = vsyncpa [#allocation3], 1 }
 0x7fe   :  { %3870 = vsyncpa [#allocation6], 1 }
 0x7ff   :  { %3871 = vsyncpa [#allocation4], 1 }
 0x800   :  { %3872 = vsyncpa [#allocation10], 1 }

</bundles_post_ra>
